<compile_context>
chip_gen: v7x
topology: tpu7x:2x2x1
jax: 0.10.0
libtpu: 0.0.40
codegen_flags: <defaults>
</compile_context>

<pallas_src>
import functools

import jax
import jax.numpy as jnp
from jax.experimental import pallas as pl
from jax.experimental.pallas import tpu as pltpu

LANE = 128


def mlp_kernel(x_ref, w1_ref, b1_ref, w2_ref, b2_ref, w3_ref, b3_ref,
               o_ref, acc_ref):
    k = pl.program_id(0)

    @pl.when(k == 0)
    def _():
        # Seed the f32 accumulator with the fc1 bias (saves the epilogue add).
        acc_ref[...] = jnp.broadcast_to(b1_ref[...], acc_ref.shape)

    # fc1 partial product for this K-tile on the MXU.  w1 arrives from HBM in
    # bf16 (the dominant byte stream); x tile is cast in-register; accumulation
    # stays f32.
    acc_ref[...] += jnp.dot(x_ref[...].astype(jnp.bfloat16), w1_ref[...],
                            preferred_element_type=jnp.float32)

    @pl.when(k == pl.num_programs(0) - 1)
    def _():
        h1 = jnp.maximum(acc_ref[...], 0.0)                          # ReLU(fc1)
        h2 = jnp.maximum(
            jnp.dot(h1, w2_ref[...], preferred_element_type=jnp.float32)
            + b2_ref[...], 0.0)                                      # ReLU(fc2)
        o_ref[...] = (jnp.dot(h2, w3_ref[...],
                              preferred_element_type=jnp.float32)
                      + b3_ref[...]).astype(o_ref.dtype)             # fc3


def _round_up(n, m=LANE):
    return ((n + m - 1) // m) * m


def _pad_to(a, rows, cols):
    return jnp.pad(a, ((0, rows - a.shape[0]), (0, cols - a.shape[1])))


def prepare_params(w1, b1, w2, b2, w3, b3):
    """One-time parameter prep (run at setup, NOT in the per-call hot path).

    * w1 (16384, 120) -> bf16, UNPADDED: halves the dominant HBM stream and
      avoids the useless 120->128 pad (its output dim only lives in VMEM).
    * fc2/fc3 feature dims (84, 36) are zero-padded to the 128-lane width so
      the in-VMEM tail matmuls and the HBM output store are lane-dense.
      Zero padding is exact: padded h2 lanes are ReLU(0)=0 and padded w3 rows
      are zero; padded output lanes are sliced away in the wrapper.
    """
    d2 = _round_up(w2.shape[1])   # 84  -> 128
    d3 = _round_up(w3.shape[1])   # 36  -> 128
    return (w1.astype(jnp.bfloat16), b1,
            _pad_to(w2, w2.shape[0], d2), _pad_to(b2, 1, d2),
            _pad_to(w3, d2, d3),          _pad_to(b3, 1, d3))


@functools.partial(jax.jit, static_argnames=("out_features", "tk"))
def fully_connected(x, w1, b1, w2, b2, w3, b3, *, out_features, tk=16384):
    """x: [B, 16384] f32; w1 bf16 (16384, 120) unpadded; w2/w3/b* pre-padded to
    the 128-lane width, stored (in, out); biases (1, out).
    Returns [B, out_features] f32."""
    B, K = x.shape
    D1 = w1.shape[1]            # 120 (unpadded)
    D2 = w2.shape[1]            # 128 (padded)
    D3 = w3.shape[1]            # 128 (padded)
    assert K % tk == 0
    nk = K // tk

    flops = 2 * B * (K * D1 + D1 * D2 + D2 * D3)
    bytes_accessed = (2 * w1.size                       # bf16 w1 stream
                      + 4 * (x.size + b1.size + w2.size + b2.size
                             + w3.size + b3.size + B * D3))

    out = pl.pallas_call(
        mlp_kernel,
        out_shape=jax.ShapeDtypeStruct((B, D3), x.dtype),
        grid_spec=pltpu.PrefetchScalarGridSpec(
            num_scalar_prefetch=0,
            grid=(nk,),
            in_specs=[
                pl.BlockSpec((B, tk), lambda k: (0, k)),    # x K-tile (128 KB)
                pl.BlockSpec((tk, D1), lambda k: (k, 0)),   # w1 K-tile (bf16)
                pl.BlockSpec((1, D1), lambda k: (0, 0)),    # b1 (resident)
                pl.BlockSpec((D1, D2), lambda k: (0, 0)),   # w2 (resident)
                pl.BlockSpec((1, D2), lambda k: (0, 0)),    # b2 (resident)
                pl.BlockSpec((D2, D3), lambda k: (0, 0)),   # w3 (resident)
                pl.BlockSpec((1, D3), lambda k: (0, 0)),    # b3 (resident)
            ],
            out_specs=pl.BlockSpec((B, D3), lambda k: (0, 0)),
            scratch_shapes=[pltpu.VMEM((B, D1), jnp.float32)],
        ),
        compiler_params=pltpu.CompilerParams(
            dimension_semantics=("arbitrary",),        # K is a reduction axis
            vmem_limit_bytes=32 * 1024 * 1024),        # v5e default is only 16 MiB
        cost_estimate=pl.CostEstimate(flops=flops, transcendentals=0,
                                      bytes_accessed=bytes_accessed),
    )(x, w1, b1, w2, b2, w3, b3)

    return out[:, :out_features]


def _init_linear(key, fan_in, fan_out):
    """Deterministic PyTorch-style init: U(-1/sqrt(fan_in), 1/sqrt(fan_in)).
    Weight returned transposed as (in, out); bias as (1, out)."""
    kw, kb = jax.random.split(key)
    bound = 1.0 / jnp.sqrt(fan_in)
    w = jax.random.uniform(kw, (fan_in, fan_out), jnp.float32, -bound, bound)
    b = jax.random.uniform(kb, (1, fan_out), jnp.float32, -bound, bound)
    return w, b


if __name__ == "__main__":
    root = jax.random.PRNGKey(0)
    kx, k1, k2, k3 = jax.random.split(root, 4)

    # NCHW input: 4 * 64 * 64 = 16384 features per sample (required by fc1),
    # batch = 2.
    x_nchw = jax.random.normal(kx, (2, 4, 64, 64), jnp.float32)
    x = x_nchw.reshape(x_nchw.shape[0], -1)   # torch.flatten(x, 1)

    w1, b1 = _init_linear(k1, 16384, 120)
    w2, b2 = _init_linear(k2, 120, 84)
    w3, b3 = _init_linear(k3, 84, 36)

    # Cast / lane-pad the parameters once, outside the per-call hot path.
    params = jax.block_until_ready(prepare_params(w1, b1, w2, b2, w3, b3))

    out = jax.block_until_ready(fully_connected(x, *params, out_features=36))

    # Pure-JAX f32 reference (unpadded, un-quantized parameters).  The kernel
    # streams w1 in bf16 with f32 accumulation; the induced error at the final
    # [2, 36] output is ~1e-4 (it averages down through fc2/fc3), so 2e-3 is a
    # comfortably tight tolerance.
    h = jnp.maximum(x @ w1 + b1, 0.0)
    h = jnp.maximum(h @ w2 + b2, 0.0)
    ref = h @ w3 + b3
    assert out.shape == (2, 36)
    assert jnp.allclose(out, ref, atol=2e-3, rtol=2e-3), "mismatch vs reference"

    print("KERNEL_OK")
</pallas_src>

<mosaic_0001>
module attributes {stable_mosaic.version = 11 : i64} {
  func.func @mlp_kernel(%arg0: i32, %arg1: memref<2x16384xf32, #tpu.memory_space<vmem>>, %arg2: memref<16384x120xbf16, #tpu.memory_space<vmem>>, %arg3: memref<1x120xf32, #tpu.memory_space<vmem>>, %arg4: memref<120x128xf32, #tpu.memory_space<vmem>>, %arg5: memref<1x128xf32, #tpu.memory_space<vmem>>, %arg6: memref<128x128xf32, #tpu.memory_space<vmem>>, %arg7: memref<1x128xf32, #tpu.memory_space<vmem>>, %arg8: memref<2x128xf32, #tpu.memory_space<vmem>>, %arg9: memref<2x120xf32, #tpu.memory_space<vmem>>) attributes {dimension_semantics = [#tpu.dimension_semantics<arbitrary>], iteration_bounds = array<i64: 1>, scalar_prefetch = 0 : i64, scratch_operands = 1 : i64, tpu.core_type = #tpu.core_type<tc>, window_params = [{transform_indices = @transform_0, window_bounds = array<i64: 2, 16384>}, {transform_indices = @transform_1, window_bounds = array<i64: 16384, 120>}, {pipeline_mode = #tpu.pipeline_mode<synchronous>, transform_indices = @transform_2, window_bounds = array<i64: 1, 120>}, {pipeline_mode = #tpu.pipeline_mode<synchronous>, transform_indices = @transform_3, window_bounds = array<i64: 120, 128>}, {pipeline_mode = #tpu.pipeline_mode<synchronous>, transform_indices = @transform_4, window_bounds = array<i64: 1, 128>}, {pipeline_mode = #tpu.pipeline_mode<synchronous>, transform_indices = @transform_5, window_bounds = array<i64: 128, 128>}, {pipeline_mode = #tpu.pipeline_mode<synchronous>, transform_indices = @transform_6, window_bounds = array<i64: 1, 128>}, {pipeline_mode = #tpu.pipeline_mode<synchronous>, transform_indices = @transform_7, window_bounds = array<i64: 2, 128>}]} {
    %c0_i32 = arith.constant 0 : i32
    %0 = arith.cmpi eq, %arg0, %c0_i32 : i32
    %1 = arith.extui %0 : i1 to i32
    %c0_i32_0 = arith.constant 0 : i32
    %2 = arith.cmpi ne, %1, %c0_i32_0 : i32
    scf.if %2 {
      %c0_10 = arith.constant 0 : index
      %c0_11 = arith.constant 0 : index
      %13 = vector.load %arg3[%c0_10, %c0_11] : memref<1x120xf32, #tpu.memory_space<vmem>>, vector<1x120xf32>
      %14 = vector.shape_cast %13 : vector<1x120xf32> to vector<1x120xf32>
      %15 = vector.broadcast %14 : vector<1x120xf32> to vector<2x120xf32>
      %c0_12 = arith.constant 0 : index
      %c0_13 = arith.constant 0 : index
      %16 = vector.load %arg9[%c0_12, %c0_13] : memref<2x120xf32, #tpu.memory_space<vmem>>, vector<2x120xf32>
      tpu.vector_store %arg9[%c0_12, %c0_13], %15 {strides = array<i32>} : memref<2x120xf32, #tpu.memory_space<vmem>>, vector<2x120xf32>,
    } else {
    }
    %c0 = arith.constant 0 : index
    %c0_1 = arith.constant 0 : index
    %3 = vector.load %arg9[%c0, %c0_1] : memref<2x120xf32, #tpu.memory_space<vmem>>, vector<2x120xf32>
    %c0_2 = arith.constant 0 : index
    %c0_3 = arith.constant 0 : index
    %4 = vector.load %arg1[%c0_2, %c0_3] : memref<2x16384xf32, #tpu.memory_space<vmem>>, vector<2x16384xf32>
    %5 = arith.truncf %4 : vector<2x16384xf32> to vector<2x16384xbf16>
    %c0_4 = arith.constant 0 : index
    %c0_5 = arith.constant 0 : index
    %6 = vector.load %arg2[%c0_4, %c0_5] : memref<16384x120xbf16, #tpu.memory_space<vmem>>, vector<16384x120xbf16>
    %cst = arith.constant dense<0.000000e+00> : vector<2x120xf32>
    %7 = tpu.matmul %5, %6, %cst {dimension_numbers = #tpu.dot_dimension_numbers<[1], [0], [0], [1], [0, 0, 1, 1], [], []>} : vector<2x16384xbf16>, vector<16384x120xbf16>, vector<2x120xf32> -> vector<2x120xf32>
    %8 = arith.addf %3, %7 : vector<2x120xf32>
    %c0_6 = arith.constant 0 : index
    %c0_7 = arith.constant 0 : index
    %9 = vector.load %arg9[%c0_6, %c0_7] : memref<2x120xf32, #tpu.memory_space<vmem>>, vector<2x120xf32>
    tpu.vector_store %arg9[%c0_6, %c0_7], %8 {strides = array<i32>} : memref<2x120xf32, #tpu.memory_space<vmem>>, vector<2x120xf32>,
    %c0_i32_8 = arith.constant 0 : i32
    %10 = arith.cmpi eq, %arg0, %c0_i32_8 : i32
    %11 = arith.extui %10 : i1 to i32
    %c0_i32_9 = arith.constant 0 : i32
    %12 = arith.cmpi ne, %11, %c0_i32_9 : i32
    scf.if %12 {
      %c0_10 = arith.constant 0 : index
      %c0_11 = arith.constant 0 : index
      %13 = vector.load %arg9[%c0_10, %c0_11] : memref<2x120xf32, #tpu.memory_space<vmem>>, vector<2x120xf32>
      %cst_12 = arith.constant 0.000000e+00 : f32
      %14 = vector.broadcast %cst_12 : f32 to vector<2x120xf32>
      %15 = arith.maximumf %13, %14 : vector<2x120xf32>
      %c0_13 = arith.constant 0 : index
      %c0_14 = arith.constant 0 : index
      %16 = vector.load %arg4[%c0_13, %c0_14] : memref<120x128xf32, #tpu.memory_space<vmem>>, vector<120x128xf32>
      %cst_15 = arith.constant dense<0.000000e+00> : vector<2x128xf32>
      %17 = tpu.matmul %15, %16, %cst_15 {dimension_numbers = #tpu.dot_dimension_numbers<[1], [0], [0], [1], [0, 0, 1, 1], [], []>} : vector<2x120xf32>, vector<120x128xf32>, vector<2x128xf32> -> vector<2x128xf32>
      %c0_16 = arith.constant 0 : index
      %c0_17 = arith.constant 0 : index
      %18 = vector.load %arg5[%c0_16, %c0_17] : memref<1x128xf32, #tpu.memory_space<vmem>>, vector<1x128xf32>
      %19 = vector.broadcast %18 : vector<1x128xf32> to vector<2x128xf32>
      %20 = arith.addf %17, %19 : vector<2x128xf32>
      %cst_18 = arith.constant 0.000000e+00 : f32
      %21 = vector.broadcast %cst_18 : f32 to vector<2x128xf32>
      %22 = arith.maximumf %20, %21 : vector<2x128xf32>
      %c0_19 = arith.constant 0 : index
      %c0_20 = arith.constant 0 : index
      %23 = vector.load %arg6[%c0_19, %c0_20] : memref<128x128xf32, #tpu.memory_space<vmem>>, vector<128x128xf32>
      %cst_21 = arith.constant dense<0.000000e+00> : vector<2x128xf32>
      %24 = tpu.matmul %22, %23, %cst_21 {dimension_numbers = #tpu.dot_dimension_numbers<[1], [0], [0], [1], [0, 0, 1, 1], [], []>} : vector<2x128xf32>, vector<128x128xf32>, vector<2x128xf32> -> vector<2x128xf32>
      %c0_22 = arith.constant 0 : index
      %c0_23 = arith.constant 0 : index
      %25 = vector.load %arg7[%c0_22, %c0_23] : memref<1x128xf32, #tpu.memory_space<vmem>>, vector<1x128xf32>
      %26 = vector.broadcast %25 : vector<1x128xf32> to vector<2x128xf32>
      %27 = arith.addf %24, %26 : vector<2x128xf32>
      %c0_24 = arith.constant 0 : index
      %c0_25 = arith.constant 0 : index
      %28 = vector.load %arg8[%c0_24, %c0_25] : memref<2x128xf32, #tpu.memory_space<vmem>>, vector<2x128xf32>
      tpu.vector_store %arg8[%c0_24, %c0_25], %27 {strides = array<i32>} : memref<2x128xf32, #tpu.memory_space<vmem>>, vector<2x128xf32>,
    } else {
    }
    return
  }
  func.func @transform_0(%arg0: i32) -> (i32, i32) {
    %c0_i32 = arith.constant 0 : i32
    %c0_i32_0 = arith.constant 0 : i32
    return %c0_i32, %arg0 : i32, i32
  }
  func.func @transform_1(%arg0: i32) -> (i32, i32) {
    %c0_i32 = arith.constant 0 : i32
    %c0_i32_0 = arith.constant 0 : i32
    return %arg0, %c0_i32 : i32, i32
  }
  func.func @transform_2(%arg0: i32) -> (i32, i32) {
    %c0_i32 = arith.constant 0 : i32
    %c0_i32_0 = arith.constant 0 : i32
    %c0_i32_1 = arith.constant 0 : i32
    return %c0_i32, %c0_i32_0 : i32, i32
  }
  func.func @transform_3(%arg0: i32) -> (i32, i32) {
    %c0_i32 = arith.constant 0 : i32
    %c0_i32_0 = arith.constant 0 : i32
    %c0_i32_1 = arith.constant 0 : i32
    return %c0_i32, %c0_i32_0 : i32, i32
  }
  func.func @transform_4(%arg0: i32) -> (i32, i32) {
    %c0_i32 = arith.constant 0 : i32
    %c0_i32_0 = arith.constant 0 : i32
    %c0_i32_1 = arith.constant 0 : i32
    return %c0_i32, %c0_i32_0 : i32, i32
  }
  func.func @transform_5(%arg0: i32) -> (i32, i32) {
    %c0_i32 = arith.constant 0 : i32
    %c0_i32_0 = arith.constant 0 : i32
    %c0_i32_1 = arith.constant 0 : i32
    return %c0_i32, %c0_i32_0 : i32, i32
  }
  func.func @transform_6(%arg0: i32) -> (i32, i32) {
    %c0_i32 = arith.constant 0 : i32
    %c0_i32_0 = arith.constant 0 : i32
    %c0_i32_1 = arith.constant 0 : i32
    return %c0_i32, %c0_i32_0 : i32, i32
  }
  func.func @transform_7(%arg0: i32) -> (i32, i32) {
    %c0_i32 = arith.constant 0 : i32
    %c0_i32_0 = arith.constant 0 : i32
    %c0_i32_1 = arith.constant 0 : i32
    return %c0_i32, %c0_i32_0 : i32, i32
  }
}

</mosaic_0001>

<bundles_post_ra>
// kernel: fully_connected.1
= control target key start
LH: loop header
LB: loop body
LE: loop exit
PB: predicated region body
PF: predicated region fallthrough
CT: control target
= control target key end

     0   :  { %v110_v28 = vlaneseq  ;;  %v15538_v36 = vmov 1983009808   ;;  %s19020_s0 = inlined_call_operand.vmem [shape: f32[2,16384], index: 0, kind: input, shape index: {}]   ;;  %s19021_s1 = inlined_call_operand.vmem [shape: bf16[16384,120], index: 1, kind: input, shape index: {}]   ;;  %s19022_s2 = inlined_call_operand.vmem [shape: f32[1,120], index: 2, kind: input, shape index: {}]   ;;  %s19023_s3 = inlined_call_operand.vmem [shape: f32[120,128], index: 3, kind: input, shape index: {}]   ;;  %s19024_s4 = inlined_call_operand.vmem [shape: f32[1,128], index: 4, kind: input, shape index: {}]   ;;  %s19025_s5 = inlined_call_operand.vmem [shape: f32[128,128], index: 5, kind: input, shape index: {}]   ;;  %s19026_s6 = inlined_call_operand.vmem [shape: f32[1,128], index: 6, kind: input, shape index: {}]   ;;  %s19027_s7 = inlined_call_operand.hbm [shape: f32[2,128], index: 7, kind: output, shape index: {}]  }
   0x1   :  { %v14458_v0 = vld [vmem:[%s19021_s1 + $0x40] sm:$0xff]   ;;  %v14462_v4 = vld [vmem:[%s19021_s1 + $0x48] sm:$0xff]   ;;  %v14466_v8 = vld [vmem:[%s19021_s1 + $0x50] sm:$0xff]   ;;  %v108_v37 = vunpack.c.l.s4 %v15538_v36 }
   0x2   :  { %v14459_v1 = vld [vmem:[%s19021_s1 + $0xc0] sm:$0xff]   ;;  %12899 = vmatprep.subr.bf16.mxu0 %v14458_v0  ;;  %v14463_v5 = vld [vmem:[%s19021_s1 + $0xc8] sm:$0xff]   ;;  %v14467_v9 = vld [vmem:[%s19021_s1 + $0xd0] sm:$0xff]   ;;  %v111_v33 = vshrl.u32 %v110_v28, 7 }
   0x3   :  { %v14460_v2 = vld [vmem:[%s19021_s1] sm:$0xff]   ;;  %12921 = vmatprep.subr.bf16.mxu1 %v14459_v1  ;;  %v14464_v6 = vld [vmem:[%s19021_s1 + $0x8] sm:$0xff]   ;;  %v14468_v10 = vld [vmem:[%s19021_s1 + $0x10] sm:$0xff]   ;;  %v109_v39 = vunpack.c.0.s8 %v108_v37 }
   0x4   :  { %v14461_v3 = vld [vmem:[%s19021_s1 + $0x80] sm:$0xff]   ;;  %12900 = vmatpush3.bf16.msra.mxu0 %v14460_v2  ;;  %v14465_v7 = vld [vmem:[%s19021_s1 + $0x88] sm:$0xff]   ;;  %v14469_v11 = vld [vmem:[%s19021_s1 + $0x90] sm:$0xff]  }
   0x5   :  { %12922 = vmatpush3.bf16.msra.mxu1 %v14461_v3  ;;  %12901 = vmatprep.subr.bf16.mxu0 %v14462_v4  ;;  %v14470_v12 = vld [vmem:[%s19021_s1 + $0x58] sm:$0xff]   ;;  %v14474_v16 = vld [vmem:[%s19021_s1 + $0x60] sm:$0xff]   ;;  %v14478_v20 = vld [vmem:[%s19021_s1 + $0x68] sm:$0xff]   ;;  %v15688_v41 = vsub.s32 %v109_v39, %v111_v33 }
   0x6   :  { %12923 = vmatprep.subr.bf16.mxu1 %v14463_v5  ;;  %v14471_v13 = vld [vmem:[%s19021_s1 + $0xd8] sm:$0xff]   ;;  %v14475_v17 = vld [vmem:[%s19021_s1 + $0xe0] sm:$0xff]   ;;  %v14479_v21 = vld [vmem:[%s19021_s1 + $0xe8] sm:$0xff]  }
   0x7   :  { %v14472_v14 = vld [vmem:[%s19021_s1 + $0x18] sm:$0xff]   ;;  %v14476_v18 = vld [vmem:[%s19021_s1 + $0x20] sm:$0xff]   ;;  %v14480_v22 = vld [vmem:[%s19021_s1 + $0x28] sm:$0xff]  }
   0x8   :  { %12902 = vmatpush3.bf16.msra.mxu0 %v14464_v6  ;;  %v14473_v15 = vld [vmem:[%s19021_s1 + $0x98] sm:$0xff]   ;;  %v14477_v19 = vld [vmem:[%s19021_s1 + $0xa0] sm:$0xff]   ;;  %v14481_v23 = vld [vmem:[%s19021_s1 + $0xa8] sm:$0xff]  }
   0x9   :  { %12924 = vmatpush3.bf16.msra.mxu1 %v14465_v7  ;;  %12903 = vmatprep.subr.bf16.mxu0 %v14466_v8  ;;  %v14482_v24 = vld [vmem:[%s19021_s1 + $0x70] sm:$0xff]   ;;  %v14486_v29 = vld [vmem:[%s19021_s1 + $0x78] sm:$0xff]   ;;  %v42_v34 = vld [vmem:[%s19020_s0] sm:$0xff] }
   0xa   :  { %12925 = vmatprep.subr.bf16.mxu1 %v14467_v9  ;;  %v14483_v25 = vld [vmem:[%s19021_s1 + $0xf0] sm:$0xff]   ;;  %v14487_v30 = vld [vmem:[%s19021_s1 + $0xf8] sm:$0xff]   ;;  %v14491_v35 = vld [vmem:[%s19021_s1 + $0x140] sm:$0xff]   ;;  %v106_v40 = vcombine.high %v42_v34, %v42_v34  ;;  %v113_v42 = vrot.slane %v42_v34, %v15688_v41 }
   0xb   :  { %v14484_v26 = vld [vmem:[%s19021_s1 + $0x30] sm:$0xff]   ;;  %v14488_v31 = vld [vmem:[%s19021_s1 + $0x38] sm:$0xff]   ;;  %v14492_v38 = vld [vmem:[%s19021_s1 + $0x1c0] sm:$0xff]  }
   0xc   :  { %12904 = vmatpush3.bf16.msra.mxu0 %v14468_v10  ;;  %v14485_v27 = vld [vmem:[%s19021_s1 + $0xb0] sm:$0xff]   ;;  %v14489_v32 = vld [vmem:[%s19021_s1 + $0xb8] sm:$0xff]   ;;  %v120_v43 = vrot.slane %v106_v40, %v15688_v41  ;;  %v121_v44 = vcombine.high %v113_v42, %v113_v42  ;;  %v14493_v46 = vld [vmem:[%s19021_s1 + $0x100] sm:$0xff]   ;;  %v778_v47 = vpack.c.bf16 %v113_v42, %v113_v42 }
   0xd   :  { %12926 = vmatpush3.bf16.msra.mxu1 %v14469_v11  ;;  %12905 = vmatprep.subr.bf16.mxu0 %v14470_v12  ;;  %v14494_v49 = vld [vmem:[%s19021_s1 + $0x180] sm:$0xff]   ;;  %v14495_v52 = vld [vmem:[%s19021_s1 + $0x148] sm:$0xff]   ;;  %v14499_v56 = vld [vmem:[%s19021_s1 + $0x150] sm:$0xff]  }
   0xe   :  { %12927 = vmatprep.subr.bf16.mxu1 %v14471_v13  ;;  %v122_v45 = vcombine.high %v120_v43, %v120_v43  ;;  %v780_v48 = vpack.c.bf16 %v120_v43, %v120_v43  ;;  %v779_v50 = vpack.c.bf16 %v121_v44, %v121_v44  ;;  %v14496_v53 = vld [vmem:[%s19021_s1 + $0x1c8] sm:$0xff]   ;;  %v14500_v57 = vld [vmem:[%s19021_s1 + $0x1d0] sm:$0xff]   ;;  %v14503_v60 = vld [vmem:[%s19021_s1 + $0x158] sm:$0xff]  }
   0xf   :  { %v14497_v54 = vld [vmem:[%s19021_s1 + $0x108] sm:$0xff]   ;;  %v14501_v58 = vld [vmem:[%s19021_s1 + $0x110] sm:$0xff]   ;;  %v14504_v61 = vld [vmem:[%s19021_s1 + $0x1d8] sm:$0xff]  }
  0x10   :  { %12906 = vmatpush3.bf16.msra.mxu0 %v14472_v14  ;;  %v781_v51 = vpack.c.bf16 %v122_v45, %v122_v45  ;;  %9130 = vmatprep.mubr.bf16.mxu0 %v779_v50  ;;  %v14498_v55 = vld [vmem:[%s19021_s1 + $0x188] sm:$0xff]   ;;  %v14502_v59 = vld [vmem:[%s19021_s1 + $0x190] sm:$0xff]   ;;  %v14505_v62 = vld [vmem:[%s19021_s1 + $0x118] sm:$0xff]  }
  0x11   :  { %12928 = vmatpush3.bf16.msra.mxu1 %v14473_v15  ;;  %12907 = vmatprep.subr.bf16.mxu0 %v14474_v16  ;;  %v14506_v63 = vld [vmem:[%s19021_s1 + $0x198] sm:$0xff]   ;;  %v14507_v0 = vld [vmem:[%s19021_s1 + $0x160] sm:$0xff]   ;;  %v14511_v4 = vld [vmem:[%s19021_s1 + $0x168] sm:$0xff]  }
  0x12   :  { %12929 = vmatprep.subr.bf16.mxu1 %v14475_v17  ;;  %9170 = vmatprep.mubr.bf16.mxu1 %v781_v51  ;;  %v14508_v1 = vld [vmem:[%s19021_s1 + $0x1e0] sm:$0xff]   ;;  %v14512_v5 = vld [vmem:[%s19021_s1 + $0x1e8] sm:$0xff]   ;;  %v14515_v8 = vld [vmem:[%s19021_s1 + $0x170] sm:$0xff]  }
  0x13   :  { %v14509_v2 = vld [vmem:[%s19021_s1 + $0x120] sm:$0xff]   ;;  %v14513_v6 = vld [vmem:[%s19021_s1 + $0x128] sm:$0xff]   ;;  %v14516_v9 = vld [vmem:[%s19021_s1 + $0x1f0] sm:$0xff]  }
  0x14   :  { %12908 = vmatpush3.bf16.msra.mxu0 %v14476_v18  ;;  %v14510_v3 = vld [vmem:[%s19021_s1 + $0x1a0] sm:$0xff]   ;;  %v14514_v7 = vld [vmem:[%s19021_s1 + $0x1a8] sm:$0xff]   ;;  %v14517_v11 = vld [vmem:[%s19021_s1 + $0x130] sm:$0xff]  }
  0x15   :  { %12930 = vmatpush3.bf16.msra.mxu1 %v14477_v19  ;;  %12909 = vmatprep.subr.bf16.mxu0 %v14478_v20  ;;  %v43_v10 = vld [vmem:[%s19020_s0 + $0x8] sm:$0xff]  ;;  %v14518_v14 = vld [vmem:[%s19021_s1 + $0x1b0] sm:$0xff]   ;;  %v14519_v15 = vld [vmem:[%s19021_s1 + $0x178] sm:$0xff]  }
  0x16   :  { %12931 = vmatprep.subr.bf16.mxu1 %v14479_v21  ;;  %v130_v12 = vrot.slane %v43_v10, %v15688_v41  ;;  %v123_v13 = vcombine.high %v43_v10, %v43_v10  ;;  %v14520_v18 = vld [vmem:[%s19021_s1 + $0x1f8] sm:$0xff]   ;;  %v14531_v33 = vld [vmem:[%s19021_s1 + $0x288] sm:$0xff]   ;;  %v14532_v34 = vld [vmem:[%s19021_s1 + $0x250] sm:$0xff]  }
  0x17   :  { %v14521_v19 = vld [vmem:[%s19021_s1 + $0x138] sm:$0xff]   ;;  %v14534_v36 = vld [vmem:[%s19021_s1 + $0x210] sm:$0xff]   ;;  %v14540_v43 = vld [vmem:[%s19021_s1 + $0x260] sm:$0xff]  }
  0x18   :  { %12910 = vmatpush3.bf16.msra.mxu0 %v14480_v22  ;;  %v138_v16 = vcombine.high %v130_v12, %v130_v12  ;;  %v137_v17 = vrot.slane %v123_v13, %v15688_v41  ;;  %v14522_v22 = vld [vmem:[%s19021_s1 + $0x1b8] sm:$0xff]   ;;  %v14535_v37 = vld [vmem:[%s19021_s1 + $0x290] sm:$0xff]   ;;  %v14541_v44 = vld [vmem:[%s19021_s1 + $0x2e0] sm:$0xff]  }
  0x19   :  { %12932 = vmatpush3.bf16.msra.mxu1 %v14481_v23  ;;  %12911 = vmatprep.subr.bf16.mxu0 %v14482_v24  ;;  %v14524_v24 = vld [vmem:[%s19021_s1 + $0x240] sm:$0xff]   ;;  %v14537_v39 = vld [vmem:[%s19021_s1 + $0x2d8] sm:$0xff]   ;;  %v14547_v50 = vld [vmem:[%s19021_s1 + $0x2a8] sm:$0xff]  }
  0x1a   :  { %12933 = vmatprep.subr.bf16.mxu1 %v14483_v25  ;;  %v783_v20 = vpack.c.bf16 %v138_v16, %v138_v16  ;;  %v139_v21 = vcombine.high %v137_v17, %v137_v17  ;;  %v14525_v25 = vld [vmem:[%s19021_s1 + $0x2c0] sm:$0xff]   ;;  %v784_v28 = vpack.c.bf16 %v137_v17, %v137_v17  ;;  %v14538_v40 = vld [vmem:[%s19021_s1 + $0x218] sm:$0xff]   ;;  %v14548_v51 = vld [vmem:[%s19021_s1 + $0x270] sm:$0xff]  }
  0x1b   :  { %v14539_v42 = vld [vmem:[%s19021_s1 + $0x298] sm:$0xff]   ;;  %v14542_v45 = vld [vmem:[%s19021_s1 + $0x220] sm:$0xff]   ;;  %v14562_v10 = vld [vmem:[%s19021_s1 + $0x3c8] sm:$0xff]  }
  0x1c   :  { %12912 = vmatpush3.bf16.msra.mxu0 %v14484_v26  ;;  %v785_v23 = vpack.c.bf16 %v139_v21, %v139_v21  ;;  %v14526_v26 = vld [vmem:[%s19021_s1 + $0x200] sm:$0xff]   ;;  %v14565_v13 = vld [vmem:[%s19021_s1 + $0x350] sm:$0xff]   ;;  %v14569_v17 = vld [vmem:[%s19021_s1 + $0x358] sm:$0xff]  }
  0x1d   :  { %12934 = vmatpush3.bf16.msra.mxu1 %v14485_v27  ;;  %12913 = vmatprep.subr.bf16.mxu0 %v14486_v29  ;;  %v782_v27 = vpack.c.bf16 %v130_v12, %v130_v12  ;;  %v14527_v29 = vld [vmem:[%s19021_s1 + $0x280] sm:$0xff]   ;;  %v14564_v12 = vld [vmem:[%s19021_s1 + $0x388] sm:$0xff]   ;;  %v14568_v16 = vld [vmem:[%s19021_s1 + $0x390] sm:$0xff]  }
  0x1e   :  { %12935 = vmatprep.subr.bf16.mxu1 %v14487_v30  ;;  %v14528_v30 = vld [vmem:[%s19021_s1 + $0x248] sm:$0xff]   ;;  %v14573_v21 = vld [vmem:[%s19021_s1 + $0x360] sm:$0xff]  }
  0x20   :  { %12914 = vmatpush3.bf16.msra.mxu0 %v14488_v31  ;;  %v14529_v31 = vld [vmem:[%s19021_s1 + $0x2c8] sm:$0xff]  }
  0x21   :  { %12936 = vmatpush3.bf16.msra.mxu1 %v14489_v32  ;;  %12943 = vmatprep.subr.bf16.mxu0 %v14491_v35  ;;  %v14530_v32 = vld [vmem:[%s19021_s1 + $0x208] sm:$0xff]   ;;  %v14533_v35 = vld [vmem:[%s19021_s1 + $0x2d0] sm:$0xff]  }
  0x22   :  { %12965 = vmatprep.subr.bf16.mxu1 %v14492_v38  ;;  %v14536_v38 = vld [vmem:[%s19021_s1 + $0x258] sm:$0xff]  }
  0x23   :  { %9131 = vmatmul.mubr.bf16.vlgmr.msra.gmra.mrb[0].mxu0 %v778_v47  ;;  %v14544_v47 = vld [vmem:[%s19021_s1 + $0x268] sm:$0xff]  }
  0x24   :  { %9171 = vmatmul.mubr.bf16.vlgmr.msra.gmra.mrb[0].mxu1 %v780_v48  ;;  %12944 = vmatpush3.bf16.msra.mxu0 %v14493_v46  ;;  %v14543_v46 = vld [vmem:[%s19021_s1 + $0x2a0] sm:$0xff]   ;;  %v14545_v48 = vld [vmem:[%s19021_s1 + $0x2e8] sm:$0xff]  }
  0x25   :  { %12966 = vmatpush3.bf16.msra.mxu1 %v14494_v49  ;;  %12945 = vmatprep.subr.bf16.mxu0 %v14495_v52  ;;  %v14546_v49 = vld [vmem:[%s19021_s1 + $0x228] sm:$0xff]   ;;  %v14549_v52 = vld [vmem:[%s19021_s1 + $0x2f0] sm:$0xff]  }
  0x26   :  { %12967 = vmatprep.subr.bf16.mxu1 %v14496_v53  ;;  %9210 = vmatprep.mubr.bf16.mxu0 %v783_v20  ;;  %v44_v53 = vld [vmem:[%s19020_s0 + $0x10] sm:$0xff]  ;;  %v14572_v20 = vld [vmem:[%s19021_s1 + $0x398] sm:$0xff]  }
  0x27   :  { %9250 = vmatprep.mubr.bf16.mxu1 %v785_v23  ;;  %v14575_v23 = vld [vmem:[%s19021_s1 + $0x320] sm:$0xff]  }
  0x28   :  { %12946 = vmatpush3.bf16.msra.mxu0 %v14497_v54  ;;  %v14550_v54 = vld [vmem:[%s19021_s1 + $0x230] sm:$0xff]  }
  0x29   :  { %12968 = vmatpush3.bf16.msra.mxu1 %v14498_v55  ;;  %12947 = vmatprep.subr.bf16.mxu0 %v14499_v56  ;;  %v147_v55 = vrot.slane %v44_v53, %v15688_v41  ;;  %v140_v56 = vcombine.high %v44_v53, %v44_v53  ;;  %v14595_v53 = vld [vmem:[%s19021_s1 + $0x4c8] sm:$0xff]  }
  0x2a   :  { %12969 = vmatprep.subr.bf16.mxu1 %v14500_v57  ;;  %v14551_v57 = vld [vmem:[%s19021_s1 + $0x2b0] sm:$0xff]  }
  0x2c   :  { %12948 = vmatpush3.bf16.msra.mxu0 %v14501_v58  ;;  %v14552_v58 = vld [vmem:[%s19021_s1 + $0x278] sm:$0xff]  }
  0x2d   :  { %12970 = vmatpush3.bf16.msra.mxu1 %v14502_v59  ;;  %12949 = vmatprep.subr.bf16.mxu0 %v14503_v60  ;;  %v155_v59 = vcombine.high %v147_v55, %v147_v55  ;;  %v154_v60 = vrot.slane %v140_v56, %v15688_v41  ;;  %v14598_v56 = vld [vmem:[%s19021_s1 + $0x450] sm:$0xff]  }
  0x2e   :  { %12971 = vmatprep.subr.bf16.mxu1 %v14504_v61  ;;  %v14553_v61 = vld [vmem:[%s19021_s1 + $0x2f8] sm:$0xff]  }
  0x30   :  { %12950 = vmatpush3.bf16.msra.mxu0 %v14505_v62  ;;  %v14554_v62 = vld [vmem:[%s19021_s1 + $0x238] sm:$0xff]  }
  0x31   :  { %12972 = vmatpush3.bf16.msra.mxu1 %v14506_v63  ;;  %12951 = vmatprep.subr.bf16.mxu0 %v14507_v0  ;;  %v787_v63 = vpack.c.bf16 %v155_v59, %v155_v59  ;;  %v156_v0 = vcombine.high %v154_v60, %v154_v60  ;;  %v14601_v59 = vld [vmem:[%s19021_s1 + $0x490] sm:$0xff]  }
  0x32   :  { %12973 = vmatprep.subr.bf16.mxu1 %v14508_v1  ;;  %v14555_v1 = vld [vmem:[%s19021_s1 + $0x2b8] sm:$0xff]  }
  0x34   :  { %12952 = vmatpush3.bf16.msra.mxu0 %v14509_v2  ;;  %v789_v2 = vpack.c.bf16 %v156_v0, %v156_v0  ;;  %v14606_v0 = vld [vmem:[%s19021_s1 + $0x460] sm:$0xff]  }
  0x35   :  { %12974 = vmatpush3.bf16.msra.mxu1 %v14510_v3  ;;  %12953 = vmatprep.subr.bf16.mxu0 %v14511_v4  ;;  %v14557_v3 = vld [vmem:[%s19021_s1 + $0x340] sm:$0xff]  }
  0x36   :  { %12975 = vmatprep.subr.bf16.mxu1 %v14512_v5  ;;  %v14558_v4 = vld [vmem:[%s19021_s1 + $0x3c0] sm:$0xff]  }
  0x37   :  { %v14559_v5 = vld [vmem:[%s19021_s1 + $0x300] sm:$0xff]  }
  0x38   :  { %12954 = vmatpush3.bf16.msra.mxu0 %v14513_v6  ;;  %v786_v6 = vpack.c.bf16 %v147_v55, %v147_v55  ;;  %v14597_v55 = vld [vmem:[%s19021_s1 + $0x488] sm:$0xff]  }
  0x39   :  { %12976 = vmatpush3.bf16.msra.mxu1 %v14514_v7  ;;  %12955 = vmatprep.subr.bf16.mxu0 %v14515_v8  ;;  %v788_v7 = vpack.c.bf16 %v154_v60, %v154_v60  ;;  %v14560_v8 = vld [vmem:[%s19021_s1 + $0x380] sm:$0xff]   ;;  %v14602_v60 = vld [vmem:[%s19021_s1 + $0x458] sm:$0xff]  }
  0x3a   :  { %12977 = vmatprep.subr.bf16.mxu1 %v14516_v9  ;;  %v14561_v9 = vld [vmem:[%s19021_s1 + $0x348] sm:$0xff]  }
  0x3c   :  { %12956 = vmatpush3.bf16.msra.mxu0 %v14517_v11  ;;  %v14563_v11 = vld [vmem:[%s19021_s1 + $0x308] sm:$0xff]  }
  0x3d   :  { %12978 = vmatpush3.bf16.msra.mxu1 %v14518_v14  ;;  %12957 = vmatprep.subr.bf16.mxu0 %v14519_v15  ;;  %v14566_v14 = vld [vmem:[%s19021_s1 + $0x3d0] sm:$0xff]  }
  0x3e   :  { %12979 = vmatprep.subr.bf16.mxu1 %v14520_v18  ;;  %v14567_v15 = vld [vmem:[%s19021_s1 + $0x310] sm:$0xff]   ;;  %v14570_v18 = vld [vmem:[%s19021_s1 + $0x3d8] sm:$0xff]  }
  0x40   :  { %12958 = vmatpush3.bf16.msra.mxu0 %v14521_v19  ;;  %v14571_v19 = vld [vmem:[%s19021_s1 + $0x318] sm:$0xff]  }
  0x41   :  { %12980 = vmatpush3.bf16.msra.mxu1 %v14522_v22  ;;  %12987 = vmatprep.subr.bf16.mxu0 %v14524_v24  ;;  %v14574_v22 = vld [vmem:[%s19021_s1 + $0x3e0] sm:$0xff]  }
  0x42   :  { %13009 = vmatprep.subr.bf16.mxu1 %v14525_v25  ;;  %v14576_v24 = vld [vmem:[%s19021_s1 + $0x3a0] sm:$0xff]   ;;  %v14577_v25 = vld [vmem:[%s19021_s1 + $0x368] sm:$0xff]  }
  0x43   :  { %9211 = vmatmul.mubr.bf16.vlgmr.msra.gmra.mrb[4].mxu0 %v782_v27  ;;  %v14579_v27 = vld [vmem:[%s19021_s1 + $0x328] sm:$0xff]  }
  0x44   :  { %9251 = vmatmul.mubr.bf16.vlgmr.msra.gmra.mrb[4].mxu1 %v784_v28  ;;  %12988 = vmatpush3.bf16.msra.mxu0 %v14526_v26  ;;  %v14578_v26 = vld [vmem:[%s19021_s1 + $0x3e8] sm:$0xff]  }
  0x45   :  { %13010 = vmatpush3.bf16.msra.mxu1 %v14527_v29  ;;  %12989 = vmatprep.subr.bf16.mxu0 %v14528_v30  ;;  %v14580_v28 = vld [vmem:[%s19021_s1 + $0x3a8] sm:$0xff]   ;;  %v14581_v29 = vld [vmem:[%s19021_s1 + $0x370] sm:$0xff]  }
  0x46   :  { %13011 = vmatprep.subr.bf16.mxu1 %v14529_v31  ;;  %9290 = vmatprep.mubr.bf16.mxu0 %v787_v63  ;;  %v14582_v30 = vld [vmem:[%s19021_s1 + $0x3f0] sm:$0xff]   ;;  %v14605_v63 = vld [vmem:[%s19021_s1 + $0x498] sm:$0xff]  }
  0x47   :  { %9330 = vmatprep.mubr.bf16.mxu1 %v789_v2  ;;  %v14583_v31 = vld [vmem:[%s19021_s1 + $0x330] sm:$0xff]   ;;  %v14608_v2 = vld [vmem:[%s19021_s1 + $0x420] sm:$0xff]  }
  0x48   :  { %12990 = vmatpush3.bf16.msra.mxu0 %v14530_v32  ;;  %v45_v32 = vld [vmem:[%s19020_s0 + $0x18] sm:$0xff] }
  0x49   :  { %13012 = vmatpush3.bf16.msra.mxu1 %v14531_v33  ;;  %12991 = vmatprep.subr.bf16.mxu0 %v14532_v34  ;;  %v14584_v33 = vld [vmem:[%s19021_s1 + $0x3b0] sm:$0xff]   ;;  %v164_v34 = vrot.slane %v45_v32, %v15688_v41 }
  0x4a   :  { %13013 = vmatprep.subr.bf16.mxu1 %v14533_v35  ;;  %v157_v35 = vcombine.high %v45_v32, %v45_v32  ;;  %v14629_v32 = vld [vmem:[%s19021_s1 + $0x508] sm:$0xff]  }
  0x4c   :  { %12992 = vmatpush3.bf16.msra.mxu0 %v14534_v36  ;;  %v14585_v36 = vld [vmem:[%s19021_s1 + $0x378] sm:$0xff]  }
  0x4d   :  { %13014 = vmatpush3.bf16.msra.mxu1 %v14535_v37  ;;  %12993 = vmatprep.subr.bf16.mxu0 %v14536_v38  ;;  %v14586_v37 = vld [vmem:[%s19021_s1 + $0x3f8] sm:$0xff]   ;;  %v172_v38 = vcombine.high %v164_v34, %v164_v34 }
  0x4e   :  { %13015 = vmatprep.subr.bf16.mxu1 %v14537_v39  ;;  %v171_v39 = vrot.slane %v157_v35, %v15688_v41  ;;  %v14632_v35 = vld [vmem:[%s19021_s1 + $0x5d0] sm:$0xff]  }
  0x50   :  { %12994 = vmatpush3.bf16.msra.mxu0 %v14538_v40  ;;  %v14587_v40 = vld [vmem:[%s19021_s1 + $0x338] sm:$0xff]  }
  0x51   :  { %13016 = vmatpush3.bf16.msra.mxu1 %v14539_v42  ;;  %12995 = vmatprep.subr.bf16.mxu0 %v14540_v43  ;;  %v14588_v42 = vld [vmem:[%s19021_s1 + $0x3b8] sm:$0xff]   ;;  %v791_v43 = vpack.c.bf16 %v172_v38, %v172_v38 }
  0x52   :  { %13017 = vmatprep.subr.bf16.mxu1 %v14541_v44  ;;  %v173_v44 = vcombine.high %v171_v39, %v171_v39  ;;  %v14635_v38 = vld [vmem:[%s19021_s1 + $0x558] sm:$0xff]  }
  0x54   :  { %12996 = vmatpush3.bf16.msra.mxu0 %v14542_v45  ;;  %v14590_v45 = vld [vmem:[%s19021_s1 + $0x440] sm:$0xff]  }
  0x55   :  { %13018 = vmatpush3.bf16.msra.mxu1 %v14543_v46  ;;  %12997 = vmatprep.subr.bf16.mxu0 %v14544_v47  ;;  %v793_v46 = vpack.c.bf16 %v173_v44, %v173_v44  ;;  %v14591_v47 = vld [vmem:[%s19021_s1 + $0x4c0] sm:$0xff]  }
  0x56   :  { %13019 = vmatprep.subr.bf16.mxu1 %v14545_v48  ;;  %v14592_v48 = vld [vmem:[%s19021_s1 + $0x400] sm:$0xff]  }
  0x57   :  { %v14640_v44 = vld [vmem:[%s19021_s1 + $0x5e0] sm:$0xff]  }
  0x58   :  { %12998 = vmatpush3.bf16.msra.mxu0 %v14546_v49  ;;  %v790_v49 = vpack.c.bf16 %v164_v34, %v164_v34  ;;  %v14631_v34 = vld [vmem:[%s19021_s1 + $0x550] sm:$0xff]  }
  0x59   :  { %13020 = vmatpush3.bf16.msra.mxu1 %v14547_v50  ;;  %12999 = vmatprep.subr.bf16.mxu0 %v14548_v51  ;;  %v792_v50 = vpack.c.bf16 %v171_v39, %v171_v39  ;;  %v14593_v51 = vld [vmem:[%s19021_s1 + $0x480] sm:$0xff]   ;;  %v14636_v39 = vld [vmem:[%s19021_s1 + $0x5d8] sm:$0xff]  }
  0x5a   :  { %13021 = vmatprep.subr.bf16.mxu1 %v14549_v52  ;;  %v14594_v52 = vld [vmem:[%s19021_s1 + $0x448] sm:$0xff]  }
  0x5c   :  { %13000 = vmatpush3.bf16.msra.mxu0 %v14550_v54  ;;  %v14596_v54 = vld [vmem:[%s19021_s1 + $0x408] sm:$0xff]  }
  0x5d   :  { %13022 = vmatpush3.bf16.msra.mxu1 %v14551_v57  ;;  %13001 = vmatprep.subr.bf16.mxu0 %v14552_v58  ;;  %v14599_v57 = vld [vmem:[%s19021_s1 + $0x4d0] sm:$0xff]  }
  0x5e   :  { %13023 = vmatprep.subr.bf16.mxu1 %v14553_v61  ;;  %v14600_v58 = vld [vmem:[%s19021_s1 + $0x410] sm:$0xff]   ;;  %v14603_v61 = vld [vmem:[%s19021_s1 + $0x4d8] sm:$0xff]  }
  0x60   :  { %13002 = vmatpush3.bf16.msra.mxu0 %v14554_v62  ;;  %v14604_v62 = vld [vmem:[%s19021_s1 + $0x418] sm:$0xff]  }
  0x61   :  { %13024 = vmatpush3.bf16.msra.mxu1 %v14555_v1  ;;  %13031 = vmatprep.subr.bf16.mxu0 %v14557_v3  ;;  %v14607_v1 = vld [vmem:[%s19021_s1 + $0x4e0] sm:$0xff]  }
  0x62   :  { %13053 = vmatprep.subr.bf16.mxu1 %v14558_v4  ;;  %v14609_v3 = vld [vmem:[%s19021_s1 + $0x4a0] sm:$0xff]   ;;  %v14610_v4 = vld [vmem:[%s19021_s1 + $0x468] sm:$0xff]  }
  0x63   :  { %9291 = vmatmul.mubr.bf16.vlgmr.msra.gmra.mrb[8].mxu0 %v786_v6  ;;  %v14612_v6 = vld [vmem:[%s19021_s1 + $0x428] sm:$0xff]  }
  0x64   :  { %9331 = vmatmul.mubr.bf16.vlgmr.msra.gmra.mrb[8].mxu1 %v788_v7  ;;  %13032 = vmatpush3.bf16.msra.mxu0 %v14559_v5  ;;  %v14611_v5 = vld [vmem:[%s19021_s1 + $0x4e8] sm:$0xff]  }
  0x65   :  { %13054 = vmatpush3.bf16.msra.mxu1 %v14560_v8  ;;  %13033 = vmatprep.subr.bf16.mxu0 %v14561_v9  ;;  %v14613_v7 = vld [vmem:[%s19021_s1 + $0x4a8] sm:$0xff]   ;;  %v14614_v8 = vld [vmem:[%s19021_s1 + $0x470] sm:$0xff]  }
  0x66   :  { %13055 = vmatprep.subr.bf16.mxu1 %v14562_v10  ;;  %9370 = vmatprep.mubr.bf16.mxu0 %v791_v43  ;;  %v14615_v9 = vld [vmem:[%s19021_s1 + $0x4f0] sm:$0xff]   ;;  %v14639_v43 = vld [vmem:[%s19021_s1 + $0x560] sm:$0xff]  }
  0x67   :  { %9410 = vmatprep.mubr.bf16.mxu1 %v793_v46  ;;  %v14616_v10 = vld [vmem:[%s19021_s1 + $0x430] sm:$0xff]   ;;  %v14642_v46 = vld [vmem:[%s19021_s1 + $0x5a0] sm:$0xff]  }
  0x68   :  { %13034 = vmatpush3.bf16.msra.mxu0 %v14563_v11  ;;  %v46_v11 = vld [vmem:[%s19020_s0 + $0x20] sm:$0xff] }
  0x69   :  { %13056 = vmatpush3.bf16.msra.mxu1 %v14564_v12  ;;  %13035 = vmatprep.subr.bf16.mxu0 %v14565_v13  ;;  %v14617_v12 = vld [vmem:[%s19021_s1 + $0x4b0] sm:$0xff]   ;;  %v181_v13 = vrot.slane %v46_v11, %v15688_v41 }
  0x6a   :  { %13057 = vmatprep.subr.bf16.mxu1 %v14566_v14  ;;  %v174_v14 = vcombine.high %v46_v11, %v46_v11  ;;  %v14662_v11 = vld [vmem:[%s19021_s1 + $0x608] sm:$0xff]  }
  0x6c   :  { %13036 = vmatpush3.bf16.msra.mxu0 %v14567_v15  ;;  %v14618_v15 = vld [vmem:[%s19021_s1 + $0x478] sm:$0xff]  }
  0x6d   :  { %13058 = vmatpush3.bf16.msra.mxu1 %v14568_v16  ;;  %13037 = vmatprep.subr.bf16.mxu0 %v14569_v17  ;;  %v14619_v16 = vld [vmem:[%s19021_s1 + $0x4f8] sm:$0xff]   ;;  %v189_v17 = vcombine.high %v181_v13, %v181_v13 }
  0x6e   :  { %13059 = vmatprep.subr.bf16.mxu1 %v14570_v18  ;;  %v188_v18 = vrot.slane %v174_v14, %v15688_v41  ;;  %v14665_v14 = vld [vmem:[%s19021_s1 + $0x6d0] sm:$0xff]  }
  0x70   :  { %13038 = vmatpush3.bf16.msra.mxu0 %v14571_v19  ;;  %v14620_v19 = vld [vmem:[%s19021_s1 + $0x438] sm:$0xff]  }
  0x71   :  { %13060 = vmatpush3.bf16.msra.mxu1 %v14572_v20  ;;  %13039 = vmatprep.subr.bf16.mxu0 %v14573_v21  ;;  %v14621_v20 = vld [vmem:[%s19021_s1 + $0x4b8] sm:$0xff]   ;;  %v795_v21 = vpack.c.bf16 %v189_v17, %v189_v17 }
  0x72   :  { %13061 = vmatprep.subr.bf16.mxu1 %v14574_v22  ;;  %v190_v22 = vcombine.high %v188_v18, %v188_v18  ;;  %v14668_v17 = vld [vmem:[%s19021_s1 + $0x658] sm:$0xff]  }
  0x74   :  { %13040 = vmatpush3.bf16.msra.mxu0 %v14575_v23  ;;  %v14623_v23 = vld [vmem:[%s19021_s1 + $0x540] sm:$0xff]  }
  0x75   :  { %13062 = vmatpush3.bf16.msra.mxu1 %v14576_v24  ;;  %13041 = vmatprep.subr.bf16.mxu0 %v14577_v25  ;;  %v797_v24 = vpack.c.bf16 %v190_v22, %v190_v22  ;;  %v14624_v25 = vld [vmem:[%s19021_s1 + $0x5c0] sm:$0xff]  }
  0x76   :  { %13063 = vmatprep.subr.bf16.mxu1 %v14578_v26  ;;  %v14625_v26 = vld [vmem:[%s19021_s1 + $0x500] sm:$0xff]  }
  0x77   :  { %v14673_v22 = vld [vmem:[%s19021_s1 + $0x6e0] sm:$0xff]  }
  0x78   :  { %13042 = vmatpush3.bf16.msra.mxu0 %v14579_v27  ;;  %v794_v27 = vpack.c.bf16 %v181_v13, %v181_v13  ;;  %v14664_v13 = vld [vmem:[%s19021_s1 + $0x650] sm:$0xff]  }
  0x79   :  { %13064 = vmatpush3.bf16.msra.mxu1 %v14580_v28  ;;  %13043 = vmatprep.subr.bf16.mxu0 %v14581_v29  ;;  %v796_v28 = vpack.c.bf16 %v188_v18, %v188_v18  ;;  %v14626_v29 = vld [vmem:[%s19021_s1 + $0x580] sm:$0xff]   ;;  %v14669_v18 = vld [vmem:[%s19021_s1 + $0x6d8] sm:$0xff]  }
  0x7a   :  { %13065 = vmatprep.subr.bf16.mxu1 %v14582_v30  ;;  %v14627_v30 = vld [vmem:[%s19021_s1 + $0x548] sm:$0xff]  }
  0x7c   :  { %13044 = vmatpush3.bf16.msra.mxu0 %v14583_v31  ;;  %v14628_v31 = vld [vmem:[%s19021_s1 + $0x5c8] sm:$0xff]  }
  0x7d   :  { %13066 = vmatpush3.bf16.msra.mxu1 %v14584_v33  ;;  %13045 = vmatprep.subr.bf16.mxu0 %v14585_v36  ;;  %v14630_v33 = vld [vmem:[%s19021_s1 + $0x588] sm:$0xff]   ;;  %v14633_v36 = vld [vmem:[%s19021_s1 + $0x510] sm:$0xff]  }
  0x7e   :  { %13067 = vmatprep.subr.bf16.mxu1 %v14586_v37  ;;  %v14634_v37 = vld [vmem:[%s19021_s1 + $0x590] sm:$0xff]  }
  0x80   :  { %13046 = vmatpush3.bf16.msra.mxu0 %v14587_v40  ;;  %v14637_v40 = vld [vmem:[%s19021_s1 + $0x518] sm:$0xff]  }
  0x81   :  { %13068 = vmatpush3.bf16.msra.mxu1 %v14588_v42  ;;  %13075 = vmatprep.subr.bf16.mxu0 %v14590_v45  ;;  %v14638_v42 = vld [vmem:[%s19021_s1 + $0x598] sm:$0xff]   ;;  %v14641_v45 = vld [vmem:[%s19021_s1 + $0x520] sm:$0xff]  }
  0x82   :  { %13097 = vmatprep.subr.bf16.mxu1 %v14591_v47  ;;  %v14643_v47 = vld [vmem:[%s19021_s1 + $0x568] sm:$0xff]  }
  0x83   :  { %9371 = vmatmul.mubr.bf16.vlgmr.msra.gmra.mrb[12].mxu0 %v790_v49  ;;  %v14645_v49 = vld [vmem:[%s19021_s1 + $0x528] sm:$0xff]  }
  0x84   :  { %9411 = vmatmul.mubr.bf16.vlgmr.msra.gmra.mrb[12].mxu1 %v792_v50  ;;  %13076 = vmatpush3.bf16.msra.mxu0 %v14592_v48  ;;  %v14644_v48 = vld [vmem:[%s19021_s1 + $0x5e8] sm:$0xff]  }
  0x85   :  { %13098 = vmatpush3.bf16.msra.mxu1 %v14593_v51  ;;  %13077 = vmatprep.subr.bf16.mxu0 %v14594_v52  ;;  %v14646_v50 = vld [vmem:[%s19021_s1 + $0x5a8] sm:$0xff]   ;;  %v14647_v51 = vld [vmem:[%s19021_s1 + $0x570] sm:$0xff]  }
  0x86   :  { %13099 = vmatprep.subr.bf16.mxu1 %v14595_v53  ;;  %9450 = vmatprep.mubr.bf16.mxu0 %v795_v21  ;;  %v14648_v52 = vld [vmem:[%s19021_s1 + $0x5f0] sm:$0xff]   ;;  %v14672_v21 = vld [vmem:[%s19021_s1 + $0x660] sm:$0xff]  }
  0x87   :  { %9490 = vmatprep.mubr.bf16.mxu1 %v797_v24  ;;  %v14649_v53 = vld [vmem:[%s19021_s1 + $0x530] sm:$0xff]   ;;  %v14675_v24 = vld [vmem:[%s19021_s1 + $0x6a0] sm:$0xff]  }
  0x88   :  { %13078 = vmatpush3.bf16.msra.mxu0 %v14596_v54  ;;  %v47_v54 = vld [vmem:[%s19020_s0 + $0x28] sm:$0xff] }
  0x89   :  { %13100 = vmatpush3.bf16.msra.mxu1 %v14597_v55  ;;  %13079 = vmatprep.subr.bf16.mxu0 %v14598_v56  ;;  %v14650_v55 = vld [vmem:[%s19021_s1 + $0x5b0] sm:$0xff]   ;;  %v198_v56 = vrot.slane %v47_v54, %v15688_v41 }
  0x8a   :  { %13101 = vmatprep.subr.bf16.mxu1 %v14599_v57  ;;  %v191_v57 = vcombine.high %v47_v54, %v47_v54  ;;  %v14695_v54 = vld [vmem:[%s19021_s1 + $0x708] sm:$0xff]  }
  0x8c   :  { %13080 = vmatpush3.bf16.msra.mxu0 %v14600_v58  ;;  %v14651_v58 = vld [vmem:[%s19021_s1 + $0x578] sm:$0xff]  }
  0x8d   :  { %13102 = vmatpush3.bf16.msra.mxu1 %v14601_v59  ;;  %13081 = vmatprep.subr.bf16.mxu0 %v14602_v60  ;;  %v14652_v59 = vld [vmem:[%s19021_s1 + $0x5f8] sm:$0xff]   ;;  %v206_v60 = vcombine.high %v198_v56, %v198_v56 }
  0x8e   :  { %13103 = vmatprep.subr.bf16.mxu1 %v14603_v61  ;;  %v205_v61 = vrot.slane %v191_v57, %v15688_v41  ;;  %v14698_v57 = vld [vmem:[%s19021_s1 + $0x7d0] sm:$0xff]  }
  0x90   :  { %13082 = vmatpush3.bf16.msra.mxu0 %v14604_v62  ;;  %v14653_v62 = vld [vmem:[%s19021_s1 + $0x538] sm:$0xff]  }
  0x91   :  { %13104 = vmatpush3.bf16.msra.mxu1 %v14605_v63  ;;  %13083 = vmatprep.subr.bf16.mxu0 %v14606_v0  ;;  %v14654_v63 = vld [vmem:[%s19021_s1 + $0x5b8] sm:$0xff]   ;;  %v799_v0 = vpack.c.bf16 %v206_v60, %v206_v60 }
  0x92   :  { %13105 = vmatprep.subr.bf16.mxu1 %v14607_v1  ;;  %v207_v1 = vcombine.high %v205_v61, %v205_v61  ;;  %v14701_v60 = vld [vmem:[%s19021_s1 + $0x758] sm:$0xff]  }
  0x94   :  { %13084 = vmatpush3.bf16.msra.mxu0 %v14608_v2  ;;  %v14656_v2 = vld [vmem:[%s19021_s1 + $0x640] sm:$0xff]  }
  0x95   :  { %13106 = vmatpush3.bf16.msra.mxu1 %v14609_v3  ;;  %13085 = vmatprep.subr.bf16.mxu0 %v14610_v4  ;;  %v801_v3 = vpack.c.bf16 %v207_v1, %v207_v1  ;;  %v14657_v4 = vld [vmem:[%s19021_s1 + $0x6c0] sm:$0xff]  }
  0x96   :  { %13107 = vmatprep.subr.bf16.mxu1 %v14611_v5  ;;  %v14658_v5 = vld [vmem:[%s19021_s1 + $0x600] sm:$0xff]  }
  0x97   :  { %v14706_v1 = vld [vmem:[%s19021_s1 + $0x7e0] sm:$0xff]  }
  0x98   :  { %13086 = vmatpush3.bf16.msra.mxu0 %v14612_v6  ;;  %v798_v6 = vpack.c.bf16 %v198_v56, %v198_v56  ;;  %v14697_v56 = vld [vmem:[%s19021_s1 + $0x750] sm:$0xff]  }
  0x99   :  { %13108 = vmatpush3.bf16.msra.mxu1 %v14613_v7  ;;  %13087 = vmatprep.subr.bf16.mxu0 %v14614_v8  ;;  %v800_v7 = vpack.c.bf16 %v205_v61, %v205_v61  ;;  %v14659_v8 = vld [vmem:[%s19021_s1 + $0x680] sm:$0xff]   ;;  %v14702_v61 = vld [vmem:[%s19021_s1 + $0x7d8] sm:$0xff]  }
  0x9a   :  { %13109 = vmatprep.subr.bf16.mxu1 %v14615_v9  ;;  %v14660_v9 = vld [vmem:[%s19021_s1 + $0x648] sm:$0xff]  }
  0x9c   :  { %13088 = vmatpush3.bf16.msra.mxu0 %v14616_v10  ;;  %v14661_v10 = vld [vmem:[%s19021_s1 + $0x6c8] sm:$0xff]  }
  0x9d   :  { %13110 = vmatpush3.bf16.msra.mxu1 %v14617_v12  ;;  %13089 = vmatprep.subr.bf16.mxu0 %v14618_v15  ;;  %v14663_v12 = vld [vmem:[%s19021_s1 + $0x688] sm:$0xff]   ;;  %v14666_v15 = vld [vmem:[%s19021_s1 + $0x610] sm:$0xff]  }
  0x9e   :  { %13111 = vmatprep.subr.bf16.mxu1 %v14619_v16  ;;  %v14667_v16 = vld [vmem:[%s19021_s1 + $0x690] sm:$0xff]  }
  0xa0   :  { %13090 = vmatpush3.bf16.msra.mxu0 %v14620_v19  ;;  %v14670_v19 = vld [vmem:[%s19021_s1 + $0x618] sm:$0xff]  }
  0xa1   :  { %13112 = vmatpush3.bf16.msra.mxu1 %v14621_v20  ;;  %13119 = vmatprep.subr.bf16.mxu0 %v14623_v23  ;;  %v14671_v20 = vld [vmem:[%s19021_s1 + $0x698] sm:$0xff]   ;;  %v14674_v23 = vld [vmem:[%s19021_s1 + $0x620] sm:$0xff]  }
  0xa2   :  { %13141 = vmatprep.subr.bf16.mxu1 %v14624_v25  ;;  %v14676_v25 = vld [vmem:[%s19021_s1 + $0x668] sm:$0xff]  }
  0xa3   :  { %9451 = vmatmul.mubr.bf16.vlgmr.msra.gmra.mrb[16].mxu0 %v794_v27  ;;  %v14678_v27 = vld [vmem:[%s19021_s1 + $0x628] sm:$0xff]  }
  0xa4   :  { %9491 = vmatmul.mubr.bf16.vlgmr.msra.gmra.mrb[16].mxu1 %v796_v28  ;;  %13120 = vmatpush3.bf16.msra.mxu0 %v14625_v26  ;;  %v14677_v26 = vld [vmem:[%s19021_s1 + $0x6e8] sm:$0xff]  }
  0xa5   :  { %13142 = vmatpush3.bf16.msra.mxu1 %v14626_v29  ;;  %13121 = vmatprep.subr.bf16.mxu0 %v14627_v30  ;;  %v14679_v28 = vld [vmem:[%s19021_s1 + $0x6a8] sm:$0xff]   ;;  %v14680_v29 = vld [vmem:[%s19021_s1 + $0x670] sm:$0xff]  }
  0xa6   :  { %13143 = vmatprep.subr.bf16.mxu1 %v14628_v31  ;;  %9530 = vmatprep.mubr.bf16.mxu0 %v799_v0  ;;  %v14681_v30 = vld [vmem:[%s19021_s1 + $0x6f0] sm:$0xff]   ;;  %v14705_v0 = vld [vmem:[%s19021_s1 + $0x760] sm:$0xff]  }
  0xa7   :  { %9570 = vmatprep.mubr.bf16.mxu1 %v801_v3  ;;  %v14682_v31 = vld [vmem:[%s19021_s1 + $0x630] sm:$0xff]   ;;  %v14708_v3 = vld [vmem:[%s19021_s1 + $0x7a0] sm:$0xff]  }
  0xa8   :  { %13122 = vmatpush3.bf16.msra.mxu0 %v14629_v32  ;;  %v14683_v32 = vld [vmem:[%s19021_s1 + $0x6b0] sm:$0xff]  }
  0xa9   :  { %13144 = vmatpush3.bf16.msra.mxu1 %v14630_v33  ;;  %13123 = vmatprep.subr.bf16.mxu0 %v14631_v34  ;;  %v48_v33 = vld [vmem:[%s19020_s0 + $0x30] sm:$0xff]  ;;  %v14684_v34 = vld [vmem:[%s19021_s1 + $0x678] sm:$0xff]  }
  0xaa   :  { %13145 = vmatprep.subr.bf16.mxu1 %v14632_v35  ;;  %v215_v35 = vrot.slane %v48_v33, %v15688_v41 }
  0xac   :  { %13124 = vmatpush3.bf16.msra.mxu0 %v14633_v36  ;;  %v208_v36 = vcombine.high %v48_v33, %v48_v33  ;;  %v14722_v33 = vld [vmem:[%s19021_s1 + $0x840] sm:$0xff]  }
  0xad   :  { %13146 = vmatpush3.bf16.msra.mxu1 %v14634_v37  ;;  %13125 = vmatprep.subr.bf16.mxu0 %v14635_v38  ;;  %v14685_v37 = vld [vmem:[%s19021_s1 + $0x6f8] sm:$0xff]  }
  0xae   :  { %13147 = vmatprep.subr.bf16.mxu1 %v14636_v39  ;;  %v14686_v38 = vld [vmem:[%s19021_s1 + $0x638] sm:$0xff]   ;;  %v223_v39 = vcombine.high %v215_v35, %v215_v35 }
  0xb0   :  { %13126 = vmatpush3.bf16.msra.mxu0 %v14637_v40  ;;  %v222_v40 = vrot.slane %v208_v36, %v15688_v41  ;;  %v14724_v36 = vld [vmem:[%s19021_s1 + $0x800] sm:$0xff]  }
  0xb1   :  { %13148 = vmatpush3.bf16.msra.mxu1 %v14638_v42  ;;  %13127 = vmatprep.subr.bf16.mxu0 %v14639_v43  ;;  %v14687_v42 = vld [vmem:[%s19021_s1 + $0x6b8] sm:$0xff]   ;;  %v803_v43 = vpack.c.bf16 %v223_v39, %v223_v39 }
  0xb2   :  { %13149 = vmatprep.subr.bf16.mxu1 %v14640_v44  ;;  %v224_v44 = vcombine.high %v222_v40, %v222_v40 }
  0xb4   :  { %13128 = vmatpush3.bf16.msra.mxu0 %v14641_v45  ;;  %v14689_v45 = vld [vmem:[%s19021_s1 + $0x740] sm:$0xff]  }
  0xb5   :  { %13150 = vmatpush3.bf16.msra.mxu1 %v14642_v46  ;;  %13129 = vmatprep.subr.bf16.mxu0 %v14643_v47  ;;  %v14690_v46 = vld [vmem:[%s19021_s1 + $0x7c0] sm:$0xff]   ;;  %v805_v47 = vpack.c.bf16 %v224_v44, %v224_v44  ;;  %v14728_v44 = vld [vmem:[%s19021_s1 + $0x808] sm:$0xff]  }
  0xb6   :  { %13151 = vmatprep.subr.bf16.mxu1 %v14644_v48  ;;  %v14691_v48 = vld [vmem:[%s19021_s1 + $0x700] sm:$0xff]  }
  0xb8   :  { %13130 = vmatpush3.bf16.msra.mxu0 %v14645_v49  ;;  %v802_v49 = vpack.c.bf16 %v215_v35, %v215_v35  ;;  %v14723_v35 = vld [vmem:[%s19021_s1 + $0x8c0] sm:$0xff]  }
  0xb9   :  { %13152 = vmatpush3.bf16.msra.mxu1 %v14646_v50  ;;  %13131 = vmatprep.subr.bf16.mxu0 %v14647_v51  ;;  %v804_v50 = vpack.c.bf16 %v222_v40, %v222_v40  ;;  %v14692_v51 = vld [vmem:[%s19021_s1 + $0x780] sm:$0xff]  }
  0xba   :  { %13153 = vmatprep.subr.bf16.mxu1 %v14648_v52  ;;  %v14693_v52 = vld [vmem:[%s19021_s1 + $0x748] sm:$0xff]   ;;  %v14725_v40 = vld [vmem:[%s19021_s1 + $0x880] sm:$0xff]  }
  0xbc   :  { %13132 = vmatpush3.bf16.msra.mxu0 %v14649_v53  ;;  %v14694_v53 = vld [vmem:[%s19021_s1 + $0x7c8] sm:$0xff]  }
  0xbd   :  { %13154 = vmatpush3.bf16.msra.mxu1 %v14650_v55  ;;  %13133 = vmatprep.subr.bf16.mxu0 %v14651_v58  ;;  %v14696_v55 = vld [vmem:[%s19021_s1 + $0x788] sm:$0xff]   ;;  %v14699_v58 = vld [vmem:[%s19021_s1 + $0x710] sm:$0xff]  }
  0xbe   :  { %13155 = vmatprep.subr.bf16.mxu1 %v14652_v59  ;;  %v14700_v59 = vld [vmem:[%s19021_s1 + $0x790] sm:$0xff]  }
  0xc0   :  { %13134 = vmatpush3.bf16.msra.mxu0 %v14653_v62  ;;  %v14703_v62 = vld [vmem:[%s19021_s1 + $0x718] sm:$0xff]  }
  0xc1   :  { %13156 = vmatpush3.bf16.msra.mxu1 %v14654_v63  ;;  %13163 = vmatprep.subr.bf16.mxu0 %v14656_v2  ;;  %v14704_v63 = vld [vmem:[%s19021_s1 + $0x798] sm:$0xff]   ;;  %v14707_v2 = vld [vmem:[%s19021_s1 + $0x720] sm:$0xff]  }
  0xc2   :  { %13185 = vmatprep.subr.bf16.mxu1 %v14657_v4  ;;  %v14709_v4 = vld [vmem:[%s19021_s1 + $0x768] sm:$0xff]  }
  0xc3   :  { %9531 = vmatmul.mubr.bf16.vlgmr.msra.gmra.mrb[20].mxu0 %v798_v6  ;;  %v14711_v6 = vld [vmem:[%s19021_s1 + $0x728] sm:$0xff]  }
  0xc4   :  { %9571 = vmatmul.mubr.bf16.vlgmr.msra.gmra.mrb[20].mxu1 %v800_v7  ;;  %13164 = vmatpush3.bf16.msra.mxu0 %v14658_v5  ;;  %v14710_v5 = vld [vmem:[%s19021_s1 + $0x7e8] sm:$0xff]  }
  0xc5   :  { %13186 = vmatpush3.bf16.msra.mxu1 %v14659_v8  ;;  %13165 = vmatprep.subr.bf16.mxu0 %v14660_v9  ;;  %v14712_v7 = vld [vmem:[%s19021_s1 + $0x7a8] sm:$0xff]   ;;  %v14713_v8 = vld [vmem:[%s19021_s1 + $0x770] sm:$0xff]  }
  0xc6   :  { %13187 = vmatprep.subr.bf16.mxu1 %v14661_v10  ;;  %9610 = vmatprep.mubr.bf16.mxu0 %v803_v43  ;;  %v14714_v9 = vld [vmem:[%s19021_s1 + $0x7f0] sm:$0xff]   ;;  %v14727_v43 = vld [vmem:[%s19021_s1 + $0x8c8] sm:$0xff]  }
  0xc7   :  { %9650 = vmatprep.mubr.bf16.mxu1 %v805_v47  ;;  %v14731_v47 = vld [vmem:[%s19021_s1 + $0x8d0] sm:$0xff]  }
  0xc8   :  { %13166 = vmatpush3.bf16.msra.mxu0 %v14662_v11 }
  0xc9   :  { %13188 = vmatpush3.bf16.msra.mxu1 %v14663_v12  ;;  %13167 = vmatprep.subr.bf16.mxu0 %v14664_v13  ;;  %v14715_v12 = vld [vmem:[%s19021_s1 + $0x730] sm:$0xff]  }
  0xca   :  { %13189 = vmatprep.subr.bf16.mxu1 %v14665_v14  ;;  %v14716_v13 = vld [vmem:[%s19021_s1 + $0x7b0] sm:$0xff]  }
  0xcc   :  { %13168 = vmatpush3.bf16.msra.mxu0 %v14666_v15 }
  0xcd   :  { %13190 = vmatpush3.bf16.msra.mxu1 %v14667_v16  ;;  %13169 = vmatprep.subr.bf16.mxu0 %v14668_v17  ;;  %v14717_v16 = vld [vmem:[%s19021_s1 + $0x778] sm:$0xff]  }
  0xce   :  { %13191 = vmatprep.subr.bf16.mxu1 %v14669_v18  ;;  %v14718_v17 = vld [vmem:[%s19021_s1 + $0x7f8] sm:$0xff]  }
  0xcf   :  { %v49_v18 = vld [vmem:[%s19020_s0 + $0x38] sm:$0xff] }
  0xd0   :  { %13170 = vmatpush3.bf16.msra.mxu0 %v14670_v19 }
  0xd1   :  { %13192 = vmatpush3.bf16.msra.mxu1 %v14671_v20  ;;  %13171 = vmatprep.subr.bf16.mxu0 %v14672_v21 }
  0xd2   :  { %13193 = vmatprep.subr.bf16.mxu1 %v14673_v22 }
  0xd4   :  { %13172 = vmatpush3.bf16.msra.mxu0 %v14674_v23  ;;  %v232_v23 = vrot.slane %v49_v18, %v15688_v41 }
  0xd5   :  { %13194 = vmatpush3.bf16.msra.mxu1 %v14675_v24  ;;  %13173 = vmatprep.subr.bf16.mxu0 %v14676_v25 }
  0xd6   :  { %13195 = vmatprep.subr.bf16.mxu1 %v14677_v26  ;;  %v225_v26 = vcombine.high %v49_v18, %v49_v18  ;;  %v14752_v18 = vld [vmem:[%s19021_s1 + $0x838] sm:$0xff]  }
  0xd8   :  { %13174 = vmatpush3.bf16.msra.mxu0 %v14678_v27 }
  0xd9   :  { %13196 = vmatpush3.bf16.msra.mxu1 %v14679_v28  ;;  %13175 = vmatprep.subr.bf16.mxu0 %v14680_v29  ;;  %v14719_v28 = vld [vmem:[%s19021_s1 + $0x738] sm:$0xff]   ;;  %v240_v29 = vcombine.high %v232_v23, %v232_v23 }
  0xda   :  { %13197 = vmatprep.subr.bf16.mxu1 %v14681_v30  ;;  %v14720_v30 = vld [vmem:[%s19021_s1 + $0x7b8] sm:$0xff]  }
  0xdc   :  { %13176 = vmatpush3.bf16.msra.mxu0 %v14682_v31  ;;  %v239_v31 = vrot.slane %v225_v26, %v15688_v41  ;;  %v14756_v26 = vld [vmem:[%s19021_s1 + $0x9c0] sm:$0xff]  }
  0xdd   :  { %13198 = vmatpush3.bf16.msra.mxu1 %v14683_v32  ;;  %13177 = vmatprep.subr.bf16.mxu0 %v14684_v34  ;;  %v807_v32 = vpack.c.bf16 %v240_v29, %v240_v29 }
  0xde   :  { %13199 = vmatprep.subr.bf16.mxu1 %v14685_v37  ;;  %v241_v34 = vcombine.high %v239_v31, %v239_v31  ;;  %v808_v39 = vpack.c.bf16 %v239_v31, %v239_v31  ;;  %v14758_v31 = vld [vmem:[%s19021_s1 + $0x980] sm:$0xff]  }
  0xe0   :  { %13178 = vmatpush3.bf16.msra.mxu0 %v14686_v38  ;;  %v809_v37 = vpack.c.bf16 %v241_v34, %v241_v34  ;;  %v806_v38 = vpack.c.bf16 %v232_v23, %v232_v23  ;;  %v14755_v23 = vld [vmem:[%s19021_s1 + $0x940] sm:$0xff]   ;;  %v14761_v34 = vld [vmem:[%s19021_s1 + $0x908] sm:$0xff]  }
  0xe1   :  { %13200 = vmatpush3.bf16.msra.mxu1 %v14687_v42  ;;  %13207 = vmatprep.subr.bf16.mxu0 %v14689_v45  ;;  %v14726_v42 = vld [vmem:[%s19021_s1 + $0x848] sm:$0xff]  }
  0xe2   :  { %13229 = vmatprep.subr.bf16.mxu1 %v14690_v46  ;;  %v14729_v45 = vld [vmem:[%s19021_s1 + $0x888] sm:$0xff]   ;;  %v14730_v46 = vld [vmem:[%s19021_s1 + $0x850] sm:$0xff]  }
  0xe3   :  { %9611 = vmatmul.mubr.bf16.vlgmr.msra.gmra.mrb[24].mxu0 %v802_v49  ;;  %v14733_v49 = vld [vmem:[%s19021_s1 + $0x890] sm:$0xff]  }
  0xe4   :  { %9651 = vmatmul.mubr.bf16.vlgmr.msra.gmra.mrb[24].mxu1 %v804_v50  ;;  %13208 = vmatpush3.bf16.msra.mxu0 %v14691_v48  ;;  %v14732_v48 = vld [vmem:[%s19021_s1 + $0x810] sm:$0xff]   ;;  %v14734_v50 = vld [vmem:[%s19021_s1 + $0x858] sm:$0xff]  }
  0xe5   :  { %13230 = vmatpush3.bf16.msra.mxu1 %v14692_v51  ;;  %13209 = vmatprep.subr.bf16.mxu0 %v14693_v52  ;;  %v14735_v51 = vld [vmem:[%s19021_s1 + $0x8d8] sm:$0xff]  }
  0xe6   :  { %13231 = vmatprep.subr.bf16.mxu1 %v14694_v53  ;;  %9690 = vmatprep.mubr.bf16.mxu0 %v807_v32  ;;  %v14736_v52 = vld [vmem:[%s19021_s1 + $0x818] sm:$0xff]   ;;  %v14759_v32 = vld [vmem:[%s19021_s1 + $0x948] sm:$0xff]  }
  0xe7   :  { %9730 = vmatprep.mubr.bf16.mxu1 %v809_v37  ;;  %v14737_v53 = vld [vmem:[%s19021_s1 + $0x898] sm:$0xff]   ;;  %v14764_v37 = vld [vmem:[%s19021_s1 + $0x9d0] sm:$0xff]  }
  0xe8   :  { %13210 = vmatpush3.bf16.msra.mxu0 %v14695_v54  ;;  %v14738_v54 = vld [vmem:[%s19021_s1 + $0x860] sm:$0xff]  }
  0xe9   :  { %13232 = vmatpush3.bf16.msra.mxu1 %v14696_v55  ;;  %13211 = vmatprep.subr.bf16.mxu0 %v14697_v56  ;;  %v14739_v55 = vld [vmem:[%s19021_s1 + $0x8e0] sm:$0xff]  }
  0xea   :  { %13233 = vmatprep.subr.bf16.mxu1 %v14698_v57  ;;  %v14740_v56 = vld [vmem:[%s19021_s1 + $0x820] sm:$0xff]  }
  0xeb   :  { %v14741_v57 = vld [vmem:[%s19021_s1 + $0x8a0] sm:$0xff]  }
  0xec   :  { %13212 = vmatpush3.bf16.msra.mxu0 %v14699_v58  ;;  %v14742_v58 = vld [vmem:[%s19021_s1 + $0x868] sm:$0xff]  }
  0xed   :  { %13234 = vmatpush3.bf16.msra.mxu1 %v14700_v59  ;;  %13213 = vmatprep.subr.bf16.mxu0 %v14701_v60  ;;  %v14743_v59 = vld [vmem:[%s19021_s1 + $0x8e8] sm:$0xff]  }
  0xee   :  { %13235 = vmatprep.subr.bf16.mxu1 %v14702_v61  ;;  %v14744_v60 = vld [vmem:[%s19021_s1 + $0x828] sm:$0xff]  }
  0xef   :  { %v14745_v61 = vld [vmem:[%s19021_s1 + $0x8a8] sm:$0xff]  }
  0xf0   :  { %13214 = vmatpush3.bf16.msra.mxu0 %v14703_v62  ;;  %v14746_v62 = vld [vmem:[%s19021_s1 + $0x870] sm:$0xff]  }
  0xf1   :  { %13236 = vmatpush3.bf16.msra.mxu1 %v14704_v63  ;;  %13215 = vmatprep.subr.bf16.mxu0 %v14705_v0  ;;  %v14747_v63 = vld [vmem:[%s19021_s1 + $0x8f0] sm:$0xff]  }
  0xf2   :  { %13237 = vmatprep.subr.bf16.mxu1 %v14706_v1 }
  0xf4   :  { %13216 = vmatpush3.bf16.msra.mxu0 %v14707_v2  ;;  %v14748_v2 = vld [vmem:[%s19021_s1 + $0x830] sm:$0xff]  }
  0xf5   :  { %13238 = vmatpush3.bf16.msra.mxu1 %v14708_v3  ;;  %13217 = vmatprep.subr.bf16.mxu0 %v14709_v4  ;;  %v14749_v3 = vld [vmem:[%s19021_s1 + $0x8b0] sm:$0xff]  }
  0xf6   :  { %13239 = vmatprep.subr.bf16.mxu1 %v14710_v5  ;;  %v12915_v10 = vpop.f32.mrb[0].mxu0 }
  0xf7   :  { %v12937_v11 = vpop.f32.mrb[0].mxu1  ;;  %v12916_v14 = vpop.f32.mrb[1].mxu0 }
  0xf8   :  { %v12938_v15 = vpop.f32.mrb[1].mxu1  ;;  %v12917_v19 = vadd.f32 %v12916_v14, %v12915_v10  ;;  %v12918_v21 = vpop.f32.mrb[2].mxu0  ;;  %13218 = vmatpush3.bf16.msra.mxu0 %v14711_v6  ;;  %v14750_v6 = vld [vmem:[%s19021_s1 + $0x878] sm:$0xff]  }
  0xf9   :  { %v12939_v20 = vadd.f32 %v12938_v15, %v12937_v11  ;;  %v12940_v22 = vpop.f32.mrb[2].mxu1  ;;  %13240 = vmatpush3.bf16.msra.mxu1 %v14712_v7  ;;  %v12919_v24 = vpop.f32.mrb[3].mxu0  ;;  %13219 = vmatprep.subr.bf16.mxu0 %v14713_v8  ;;  %v14751_v11 = vld [vmem:[%s19021_s1 + $0x8f8] sm:$0xff]  }
  0xfa   :  { %v12941_v25 = vpop.f32.mrb[3].mxu1  ;;  %13241 = vmatprep.subr.bf16.mxu1 %v14714_v9 }
  0xfb   :  { %v16386_v27 = vadd.f32 %v12939_v20, %v12917_v19  ;;  %v14753_v19 = vld [vmem:[%s19021_s1 + $0x8b8] sm:$0xff]  }
  0xfc   :  { %13220 = vmatpush3.bf16.msra.mxu0 %v14715_v12  ;;  %v50_v12 = vld [vmem:[%s19020_s0 + $0x40] sm:$0xff] }
  0xfd   :  { %13242 = vmatpush3.bf16.msra.mxu1 %v14716_v13  ;;  %13221 = vmatprep.subr.bf16.mxu0 %v14717_v16  ;;  %v249_v15 = vrot.slane %v50_v12, %v15688_v41  ;;  %v242_v16 = vcombine.high %v50_v12, %v50_v12 }
  0xfe   :  { %13243 = vmatprep.subr.bf16.mxu1 %v14718_v17 }
  0xff   :  { %v257_v20 = vcombine.high %v249_v15, %v249_v15  ;;  %v256_v21 = vrot.slane %v242_v16, %v15688_v41  ;;  %v810_v29 = vpack.c.bf16 %v249_v15, %v249_v15  ;;  %v14789_v15 = vld [vmem:[%s19021_s1 + $0xac0] sm:$0xff]  }
 0x100   :  { %13222 = vmatpush3.bf16.msra.mxu0 %v14719_v28 }
 0x101   :  { %13244 = vmatpush3.bf16.msra.mxu1 %v14720_v30  ;;  %13251 = vmatprep.subr.bf16.mxu0 %v14722_v33  ;;  %v811_v24 = vpack.c.bf16 %v257_v20, %v257_v20  ;;  %v258_v25 = vcombine.high %v256_v21, %v256_v21  ;;  %v812_v30 = vpack.c.bf16 %v256_v21, %v256_v21  ;;  %v14760_v33 = vld [vmem:[%s19021_s1 + $0x9c8] sm:$0xff]   ;;  %v14791_v21 = vld [vmem:[%s19021_s1 + $0xa80] sm:$0xff]  }
 0x102   :  { %13273 = vmatprep.subr.bf16.mxu1 %v14723_v35  ;;  %v14762_v35 = vld [vmem:[%s19021_s1 + $0x988] sm:$0xff]  }
 0x103   :  { %9691 = vmatmul.mubr.bf16.vlgmr.msra.gmra.mrb[28].mxu0 %v806_v38  ;;  %v813_v28 = vpack.c.bf16 %v258_v25, %v258_v25  ;;  %v14765_v38 = vld [vmem:[%s19021_s1 + $0x910] sm:$0xff]   ;;  %v14794_v25 = vld [vmem:[%s19021_s1 + $0xa08] sm:$0xff]  }
 0x104   :  { %9731 = vmatmul.mubr.bf16.vlgmr.msra.gmra.mrb[28].mxu1 %v808_v39  ;;  %13252 = vmatpush3.bf16.msra.mxu0 %v14724_v36  ;;  %v14763_v36 = vld [vmem:[%s19021_s1 + $0x950] sm:$0xff]  }
 0x105   :  { %13274 = vmatpush3.bf16.msra.mxu1 %v14725_v40  ;;  %13253 = vmatprep.subr.bf16.mxu0 %v14726_v42  ;;  %v14766_v39 = vld [vmem:[%s19021_s1 + $0x990] sm:$0xff]   ;;  %v14767_v40 = vld [vmem:[%s19021_s1 + $0x958] sm:$0xff]  }
 0x106   :  { %13275 = vmatprep.subr.bf16.mxu1 %v14727_v43  ;;  %9770 = vmatprep.mubr.bf16.mxu0 %v811_v24  ;;  %v14768_v42 = vld [vmem:[%s19021_s1 + $0x9d8] sm:$0xff]   ;;  %v14793_v24 = vld [vmem:[%s19021_s1 + $0xac8] sm:$0xff]  }
 0x107   :  { %9810 = vmatprep.mubr.bf16.mxu1 %v813_v28  ;;  %v14769_v43 = vld [vmem:[%s19021_s1 + $0x918] sm:$0xff]   ;;  %v14797_v28 = vld [vmem:[%s19021_s1 + $0xad0] sm:$0xff]  }
 0x108   :  { %13254 = vmatpush3.bf16.msra.mxu0 %v14728_v44  ;;  %v14770_v44 = vld [vmem:[%s19021_s1 + $0x998] sm:$0xff]  }
 0x109   :  { %13276 = vmatpush3.bf16.msra.mxu1 %v14729_v45  ;;  %13255 = vmatprep.subr.bf16.mxu0 %v14730_v46  ;;  %v14771_v45 = vld [vmem:[%s19021_s1 + $0x960] sm:$0xff]  }
 0x10a   :  { %13277 = vmatprep.subr.bf16.mxu1 %v14731_v47  ;;  %v14772_v46 = vld [vmem:[%s19021_s1 + $0x9e0] sm:$0xff]  }
 0x10b   :  { %v14773_v47 = vld [vmem:[%s19021_s1 + $0x920] sm:$0xff]  }
 0x10c   :  { %13256 = vmatpush3.bf16.msra.mxu0 %v14732_v48  ;;  %v14774_v48 = vld [vmem:[%s19021_s1 + $0x9a0] sm:$0xff]  }
 0x10d   :  { %13278 = vmatpush3.bf16.msra.mxu1 %v14733_v49  ;;  %13257 = vmatprep.subr.bf16.mxu0 %v14734_v50  ;;  %v14775_v49 = vld [vmem:[%s19021_s1 + $0x968] sm:$0xff]  }
 0x10e   :  { %13279 = vmatprep.subr.bf16.mxu1 %v14735_v51  ;;  %v14776_v50 = vld [vmem:[%s19021_s1 + $0x9e8] sm:$0xff]  }
 0x10f   :  { %v14777_v51 = vld [vmem:[%s19021_s1 + $0x928] sm:$0xff]  }
 0x110   :  { %13258 = vmatpush3.bf16.msra.mxu0 %v14736_v52  ;;  %v14778_v52 = vld [vmem:[%s19021_s1 + $0x9a8] sm:$0xff]  }
 0x111   :  { %13280 = vmatpush3.bf16.msra.mxu1 %v14737_v53  ;;  %13259 = vmatprep.subr.bf16.mxu0 %v14738_v54  ;;  %v14779_v53 = vld [vmem:[%s19021_s1 + $0x970] sm:$0xff]  }
 0x112   :  { %13281 = vmatprep.subr.bf16.mxu1 %v14739_v55  ;;  %v14780_v54 = vld [vmem:[%s19021_s1 + $0x9f0] sm:$0xff]  }
 0x114   :  { %13260 = vmatpush3.bf16.msra.mxu0 %v14740_v56 }
 0x115   :  { %13282 = vmatpush3.bf16.msra.mxu1 %v14741_v57  ;;  %13261 = vmatprep.subr.bf16.mxu0 %v14742_v58  ;;  %v14781_v57 = vld [vmem:[%s19021_s1 + $0x930] sm:$0xff]  }
 0x116   :  { %13283 = vmatprep.subr.bf16.mxu1 %v14743_v59  ;;  %v12959_v0 = vpop.f32.mrb[4].mxu0  ;;  %v14782_v58 = vld [vmem:[%s19021_s1 + $0x9b0] sm:$0xff]  }
 0x117   :  { %v12981_v1 = vpop.f32.mrb[4].mxu1  ;;  %v12960_v4 = vpop.f32.mrb[5].mxu0 }
 0x118   :  { %v12982_v5 = vpop.f32.mrb[5].mxu1  ;;  %v12961_v7 = vadd.f32 %v12960_v4, %v12959_v0  ;;  %v12962_v9 = vpop.f32.mrb[6].mxu0  ;;  %13262 = vmatpush3.bf16.msra.mxu0 %v14744_v60 }
 0x119   :  { %v12983_v8 = vadd.f32 %v12982_v5, %v12981_v1  ;;  %v12984_v10 = vpop.f32.mrb[6].mxu1  ;;  %13284 = vmatpush3.bf16.msra.mxu1 %v14745_v61  ;;  %v12963_v13 = vpop.f32.mrb[7].mxu0  ;;  %13263 = vmatprep.subr.bf16.mxu0 %v14746_v62  ;;  %v14783_v1 = vld [vmem:[%s19021_s1 + $0x978] sm:$0xff]  }
 0x11a   :  { %v12985_v14 = vpop.f32.mrb[7].mxu1  ;;  %13285 = vmatprep.subr.bf16.mxu1 %v14747_v63  ;;  %v9213_v17 = vadd.f32 %v12961_v7, %v16386_v27  ;;  %v14757_v27 = vld [vmem:[%s19021_s1 + $0x900] sm:$0xff]   ;;  %v14785_v7 = vld [vmem:[%s19021_s1 + $0x938] sm:$0xff]  }
 0x11b   :  { %v14788_v14 = vld [vmem:[%s19021_s1 + $0xa40] sm:$0xff]  }
 0x11c   :  { %v16497_v22 = vadd.f32 %v12983_v8, %v9213_v17  ;;  %13264 = vmatpush3.bf16.msra.mxu0 %v14748_v2  ;;  %v14784_v2 = vld [vmem:[%s19021_s1 + $0x9f8] sm:$0xff]  }
 0x11d   :  { %13286 = vmatpush3.bf16.msra.mxu1 %v14749_v3  ;;  %13265 = vmatprep.subr.bf16.mxu0 %v14750_v6  ;;  %v51_v6 = vld [vmem:[%s19020_s0 + $0x48] sm:$0xff] }
 0x11e   :  { %13287 = vmatprep.subr.bf16.mxu1 %v14751_v11  ;;  %v266_v8 = vrot.slane %v51_v6, %v15688_v41  ;;  %v259_v9 = vcombine.high %v51_v6, %v51_v6  ;;  %v14786_v11 = vld [vmem:[%s19021_s1 + $0x9b8] sm:$0xff]   ;;  %v14822_v6 = vld [vmem:[%s19021_s1 + $0xbc0] sm:$0xff]  }
 0x120   :  { %13266 = vmatpush3.bf16.msra.mxu0 %v14752_v18  ;;  %v274_v12 = vcombine.high %v266_v8, %v266_v8  ;;  %v273_v13 = vrot.slane %v259_v9, %v15688_v41  ;;  %v814_v18 = vpack.c.bf16 %v266_v8, %v266_v8  ;;  %v14823_v8 = vld [vmem:[%s19021_s1 + $0xb00] sm:$0xff]  }
 0x121   :  { %13288 = vmatpush3.bf16.msra.mxu1 %v14753_v19  ;;  %13295 = vmatprep.subr.bf16.mxu0 %v14755_v23  ;;  %v14790_v19 = vld [vmem:[%s19021_s1 + $0xa00] sm:$0xff]   ;;  %v14792_v23 = vld [vmem:[%s19021_s1 + $0xa48] sm:$0xff]  }
 0x122   :  { %13317 = vmatprep.subr.bf16.mxu1 %v14756_v26  ;;  %v815_v16 = vpack.c.bf16 %v274_v12, %v274_v12  ;;  %v275_v17 = vcombine.high %v273_v13, %v273_v13  ;;  %v816_v20 = vpack.c.bf16 %v273_v13, %v273_v13  ;;  %v14795_v26 = vld [vmem:[%s19021_s1 + $0xa88] sm:$0xff]  }
 0x123   :  { %9771 = vmatmul.mubr.bf16.vlgmr.msra.gmra.mrb[32].mxu0 %v810_v29  ;;  %v14798_v29 = vld [vmem:[%s19021_s1 + $0xa10] sm:$0xff]   ;;  %v14825_v13 = vld [vmem:[%s19021_s1 + $0xb48] sm:$0xff]  }
 0x124   :  { %9811 = vmatmul.mubr.bf16.vlgmr.msra.gmra.mrb[32].mxu1 %v812_v30  ;;  %13296 = vmatpush3.bf16.msra.mxu0 %v14757_v27  ;;  %v14796_v27 = vld [vmem:[%s19021_s1 + $0xa50] sm:$0xff]  }
 0x125   :  { %13318 = vmatpush3.bf16.msra.mxu1 %v14758_v31  ;;  %13297 = vmatprep.subr.bf16.mxu0 %v14759_v32  ;;  %v14799_v30 = vld [vmem:[%s19021_s1 + $0xa90] sm:$0xff]   ;;  %v14800_v31 = vld [vmem:[%s19021_s1 + $0xa58] sm:$0xff]  }
 0x126   :  { %13319 = vmatprep.subr.bf16.mxu1 %v14760_v33  ;;  %9850 = vmatprep.mubr.bf16.mxu0 %v815_v16  ;;  %v14801_v32 = vld [vmem:[%s19021_s1 + $0xad8] sm:$0xff]   ;;  %v14827_v16 = vld [vmem:[%s19021_s1 + $0xb08] sm:$0xff]  }
 0x127   :  { %v14802_v33 = vld [vmem:[%s19021_s1 + $0xa18] sm:$0xff]  }
 0x128   :  { %13298 = vmatpush3.bf16.msra.mxu0 %v14761_v34  ;;  %v14803_v34 = vld [vmem:[%s19021_s1 + $0xa98] sm:$0xff]  }
 0x129   :  { %13320 = vmatpush3.bf16.msra.mxu1 %v14762_v35  ;;  %13299 = vmatprep.subr.bf16.mxu0 %v14763_v36  ;;  %v14804_v35 = vld [vmem:[%s19021_s1 + $0xa60] sm:$0xff]  }
 0x12a   :  { %13321 = vmatprep.subr.bf16.mxu1 %v14764_v37  ;;  %v14805_v36 = vld [vmem:[%s19021_s1 + $0xae0] sm:$0xff]  }
 0x12b   :  { %v14806_v37 = vld [vmem:[%s19021_s1 + $0xa20] sm:$0xff]  }
 0x12c   :  { %13300 = vmatpush3.bf16.msra.mxu0 %v14765_v38  ;;  %v14807_v38 = vld [vmem:[%s19021_s1 + $0xaa0] sm:$0xff]  }
 0x12d   :  { %13322 = vmatpush3.bf16.msra.mxu1 %v14766_v39  ;;  %13301 = vmatprep.subr.bf16.mxu0 %v14767_v40  ;;  %v14808_v39 = vld [vmem:[%s19021_s1 + $0xa68] sm:$0xff]  }
 0x12e   :  { %13323 = vmatprep.subr.bf16.mxu1 %v14768_v42  ;;  %v14809_v40 = vld [vmem:[%s19021_s1 + $0xae8] sm:$0xff]  }
 0x12f   :  { %v14810_v42 = vld [vmem:[%s19021_s1 + $0xa28] sm:$0xff]  }
 0x130   :  { %13302 = vmatpush3.bf16.msra.mxu0 %v14769_v43  ;;  %v14811_v43 = vld [vmem:[%s19021_s1 + $0xaa8] sm:$0xff]  }
 0x131   :  { %13324 = vmatpush3.bf16.msra.mxu1 %v14770_v44  ;;  %13303 = vmatprep.subr.bf16.mxu0 %v14771_v45  ;;  %v14812_v44 = vld [vmem:[%s19021_s1 + $0xa70] sm:$0xff]  }
 0x132   :  { %13325 = vmatprep.subr.bf16.mxu1 %v14772_v46 }
 0x134   :  { %13304 = vmatpush3.bf16.msra.mxu0 %v14773_v47  ;;  %v14813_v47 = vld [vmem:[%s19021_s1 + $0xaf0] sm:$0xff]  }
 0x135   :  { %13326 = vmatpush3.bf16.msra.mxu1 %v14774_v48  ;;  %13305 = vmatprep.subr.bf16.mxu0 %v14775_v49  ;;  %v14814_v48 = vld [vmem:[%s19021_s1 + $0xa30] sm:$0xff]  }
 0x136   :  { %13327 = vmatprep.subr.bf16.mxu1 %v14776_v50  ;;  %v13003_v55 = vpop.f32.mrb[8].mxu0 }
 0x137   :  { %v13025_v56 = vpop.f32.mrb[8].mxu1  ;;  %v13004_v59 = vpop.f32.mrb[9].mxu0 }
 0x138   :  { %v13026_v60 = vpop.f32.mrb[9].mxu1  ;;  %v13005_v61 = vadd.f32 %v13004_v59, %v13003_v55  ;;  %v13006_v63 = vpop.f32.mrb[10].mxu0  ;;  %13306 = vmatpush3.bf16.msra.mxu0 %v14777_v51  ;;  %v14815_v51 = vld [vmem:[%s19021_s1 + $0xab0] sm:$0xff]  }
 0x139   :  { %v13027_v62 = vadd.f32 %v13026_v60, %v13025_v56  ;;  %v13028_v0 = vpop.f32.mrb[10].mxu1  ;;  %13328 = vmatpush3.bf16.msra.mxu1 %v14778_v52  ;;  %v13007_v3 = vpop.f32.mrb[11].mxu0  ;;  %13307 = vmatprep.subr.bf16.mxu0 %v14779_v53  ;;  %v14816_v56 = vld [vmem:[%s19021_s1 + $0xa78] sm:$0xff]  }
 0x13a   :  { %v13029_v4 = vpop.f32.mrb[11].mxu1  ;;  %13329 = vmatprep.subr.bf16.mxu1 %v14780_v54  ;;  %v9293_v5 = vadd.f32 %v13005_v61, %v16497_v22  ;;  %v817_v22 = vpack.c.bf16 %v275_v17, %v275_v17  ;;  %v14818_v61 = vld [vmem:[%s19021_s1 + $0xa38] sm:$0xff]   ;;  %v14821_v3 = vld [vmem:[%s19021_s1 + $0xb40] sm:$0xff]   ;;  %v14828_v17 = vld [vmem:[%s19021_s1 + $0xb88] sm:$0xff]  }
 0x13b   :  { %v14819_v0 = vld [vmem:[%s19021_s1 + $0xab8] sm:$0xff]  }
 0x13c   :  { %v16597_v10 = vadd.f32 %v13027_v62, %v9293_v5  ;;  %13308 = vmatpush3.bf16.msra.mxu0 %v14781_v57  ;;  %9890 = vmatprep.mubr.bf16.mxu1 %v817_v22  ;;  %v14817_v57 = vld [vmem:[%s19021_s1 + $0xaf8] sm:$0xff]   ;;  %v52_v62 = vld [vmem:[%s19020_s0 + $0x50] sm:$0xff] }
 0x13d   :  { %13330 = vmatpush3.bf16.msra.mxu1 %v14782_v58  ;;  %13309 = vmatprep.subr.bf16.mxu0 %v14783_v1  ;;  %v283_v1 = vrot.slane %v52_v62, %v15688_v41  ;;  %v14833_v22 = vld [vmem:[%s19021_s1 + $0xb58] sm:$0xff]  }
 0x13e   :  { %13331 = vmatprep.subr.bf16.mxu1 %v14784_v2  ;;  %v276_v2 = vcombine.high %v52_v62, %v52_v62 }
 0x13f   :  { %v291_v4 = vcombine.high %v283_v1, %v283_v1 }
 0x140   :  { %13310 = vmatpush3.bf16.msra.mxu0 %v14785_v7  ;;  %v290_v5 = vrot.slane %v276_v2, %v15688_v41  ;;  %v818_v7 = vpack.c.bf16 %v283_v1, %v283_v1  ;;  %v14856_v1 = vld [vmem:[%s19021_s1 + $0xc00] sm:$0xff]  }
 0x141   :  { %13332 = vmatpush3.bf16.msra.mxu1 %v14786_v11  ;;  %13339 = vmatprep.subr.bf16.mxu0 %v14788_v14  ;;  %v819_v9 = vpack.c.bf16 %v291_v4, %v291_v4  ;;  %v14824_v11 = vld [vmem:[%s19021_s1 + $0xb80] sm:$0xff]  }
 0x142   :  { %13361 = vmatprep.subr.bf16.mxu1 %v14789_v15  ;;  %v820_v12 = vpack.c.bf16 %v290_v5, %v290_v5  ;;  %v14826_v15 = vld [vmem:[%s19021_s1 + $0xbc8] sm:$0xff]  }
 0x143   :  { %9851 = vmatmul.mubr.bf16.vlgmr.msra.gmra.mrb[36].mxu0 %v814_v18  ;;  %v14829_v18 = vld [vmem:[%s19021_s1 + $0xb50] sm:$0xff]  }
 0x144   :  { %9891 = vmatmul.mubr.bf16.vlgmr.msra.gmra.mrb[36].mxu1 %v816_v20  ;;  %13340 = vmatpush3.bf16.msra.mxu0 %v14790_v19  ;;  %v14830_v19 = vld [vmem:[%s19021_s1 + $0xbd0] sm:$0xff]  }
 0x145   :  { %13362 = vmatpush3.bf16.msra.mxu1 %v14791_v21  ;;  %13341 = vmatprep.subr.bf16.mxu0 %v14792_v23  ;;  %v14831_v20 = vld [vmem:[%s19021_s1 + $0xb10] sm:$0xff]   ;;  %v14834_v23 = vld [vmem:[%s19021_s1 + $0xbd8] sm:$0xff]  }
 0x146   :  { %13363 = vmatprep.subr.bf16.mxu1 %v14793_v24  ;;  %9930 = vmatprep.mubr.bf16.mxu0 %v819_v9  ;;  %v14832_v21 = vld [vmem:[%s19021_s1 + $0xb90] sm:$0xff]   ;;  %v14835_v24 = vld [vmem:[%s19021_s1 + $0xb18] sm:$0xff]   ;;  %v14861_v9 = vld [vmem:[%s19021_s1 + $0xc88] sm:$0xff]  }
 0x148   :  { %13342 = vmatpush3.bf16.msra.mxu0 %v14794_v25  ;;  %v14836_v25 = vld [vmem:[%s19021_s1 + $0xb98] sm:$0xff]  }
 0x149   :  { %13364 = vmatpush3.bf16.msra.mxu1 %v14795_v26  ;;  %13343 = vmatprep.subr.bf16.mxu0 %v14796_v27  ;;  %v14837_v26 = vld [vmem:[%s19021_s1 + $0xb60] sm:$0xff]  }
 0x14a   :  { %13365 = vmatprep.subr.bf16.mxu1 %v14797_v28  ;;  %v14838_v27 = vld [vmem:[%s19021_s1 + $0xbe0] sm:$0xff]  }
 0x14b   :  { %v14839_v28 = vld [vmem:[%s19021_s1 + $0xb20] sm:$0xff]  }
 0x14c   :  { %13344 = vmatpush3.bf16.msra.mxu0 %v14798_v29  ;;  %v14840_v29 = vld [vmem:[%s19021_s1 + $0xba0] sm:$0xff]  }
 0x14d   :  { %13366 = vmatpush3.bf16.msra.mxu1 %v14799_v30  ;;  %13345 = vmatprep.subr.bf16.mxu0 %v14800_v31  ;;  %v14841_v30 = vld [vmem:[%s19021_s1 + $0xb68] sm:$0xff]  }
 0x14e   :  { %13367 = vmatprep.subr.bf16.mxu1 %v14801_v32  ;;  %v14842_v31 = vld [vmem:[%s19021_s1 + $0xbe8] sm:$0xff]  }
 0x14f   :  { %v14843_v32 = vld [vmem:[%s19021_s1 + $0xb28] sm:$0xff]  }
 0x150   :  { %13346 = vmatpush3.bf16.msra.mxu0 %v14802_v33  ;;  %v14844_v33 = vld [vmem:[%s19021_s1 + $0xba8] sm:$0xff]  }
 0x151   :  { %13368 = vmatpush3.bf16.msra.mxu1 %v14803_v34  ;;  %13347 = vmatprep.subr.bf16.mxu0 %v14804_v35  ;;  %v14845_v34 = vld [vmem:[%s19021_s1 + $0xb70] sm:$0xff]  }
 0x152   :  { %13369 = vmatprep.subr.bf16.mxu1 %v14805_v36 }
 0x154   :  { %13348 = vmatpush3.bf16.msra.mxu0 %v14806_v37  ;;  %v14846_v37 = vld [vmem:[%s19021_s1 + $0xbf0] sm:$0xff]  }
 0x155   :  { %13370 = vmatpush3.bf16.msra.mxu1 %v14807_v38  ;;  %13349 = vmatprep.subr.bf16.mxu0 %v14808_v39  ;;  %v14847_v38 = vld [vmem:[%s19021_s1 + $0xb30] sm:$0xff]  }
 0x156   :  { %v13047_v45 = vpop.f32.mrb[12].mxu0  ;;  %13371 = vmatprep.subr.bf16.mxu1 %v14809_v40 }
 0x157   :  { %v13069_v46 = vpop.f32.mrb[12].mxu1  ;;  %v13048_v49 = vpop.f32.mrb[13].mxu0 }
 0x158   :  { %v13070_v50 = vpop.f32.mrb[13].mxu1  ;;  %v13049_v52 = vadd.f32 %v13048_v49, %v13047_v45  ;;  %v13050_v54 = vpop.f32.mrb[14].mxu0  ;;  %13350 = vmatpush3.bf16.msra.mxu0 %v14810_v42 }
 0x159   :  { %v13071_v53 = vadd.f32 %v13070_v50, %v13069_v46  ;;  %v13072_v55 = vpop.f32.mrb[14].mxu1  ;;  %13372 = vmatpush3.bf16.msra.mxu1 %v14811_v43  ;;  %v13051_v58 = vpop.f32.mrb[15].mxu0  ;;  %13351 = vmatprep.subr.bf16.mxu0 %v14812_v44  ;;  %v14848_v46 = vld [vmem:[%s19021_s1 + $0xbb0] sm:$0xff]   ;;  %v53_v54 = vld [vmem:[%s19020_s0 + $0x58] sm:$0xff] }
 0x15a   :  { %v13073_v59 = vpop.f32.mrb[15].mxu1  ;;  %v9373_v60 = vadd.f32 %v13049_v52, %v16597_v10  ;;  %13373 = vmatprep.subr.bf16.mxu1 %v14813_v47  ;;  %v292_v10 = vcombine.high %v290_v5, %v290_v5  ;;  %v14849_v47 = vld [vmem:[%s19021_s1 + $0xb78] sm:$0xff]   ;;  %v300_v55 = vrot.slane %v53_v54, %v15688_v41  ;;  %v14857_v5 = vld [vmem:[%s19021_s1 + $0xc80] sm:$0xff]  }
 0x15b   :  { %v14851_v52 = vld [vmem:[%s19021_s1 + $0xb38] sm:$0xff]  }
 0x15c   :  { %v16700_v63 = vadd.f32 %v13071_v53, %v9373_v60  ;;  %13352 = vmatpush3.bf16.msra.mxu0 %v14814_v48  ;;  %v821_v14 = vpack.c.bf16 %v292_v10, %v292_v10  ;;  %v14852_v58 = vld [vmem:[%s19021_s1 + $0xbb8] sm:$0xff]   ;;  %v308_v59 = vcombine.high %v300_v55, %v300_v55  ;;  %v822_v62 = vpack.c.bf16 %v300_v55, %v300_v55  ;;  %v14863_v10 = vld [vmem:[%s19021_s1 + $0xcd0] sm:$0xff]  }
 0x15d   :  { %13374 = vmatpush3.bf16.msra.mxu1 %v14815_v51  ;;  %13353 = vmatprep.subr.bf16.mxu0 %v14816_v56  ;;  %v14850_v51 = vld [vmem:[%s19021_s1 + $0xbf8] sm:$0xff]   ;;  %v293_v56 = vcombine.high %v53_v54, %v53_v54  ;;  %v14889_v54 = vld [vmem:[%s19021_s1 + $0xd00] sm:$0xff]  }
 0x15e   :  { %13375 = vmatprep.subr.bf16.mxu1 %v14817_v57  ;;  %9970 = vmatprep.mubr.bf16.mxu1 %v821_v14  ;;  %v14854_v57 = vld [vmem:[%s19021_s1 + $0xc40] sm:$0xff]   ;;  %v14867_v14 = vld [vmem:[%s19021_s1 + $0xcd8] sm:$0xff]  }
 0x15f   :  { %v307_v60 = vrot.slane %v293_v56, %v15688_v41 }
 0x160   :  { %13354 = vmatpush3.bf16.msra.mxu0 %v14818_v61  ;;  %v14855_v61 = vld [vmem:[%s19021_s1 + $0xcc0] sm:$0xff]  }
 0x161   :  { %13376 = vmatpush3.bf16.msra.mxu1 %v14819_v0  ;;  %13383 = vmatprep.subr.bf16.mxu0 %v14821_v3  ;;  %v309_v0 = vcombine.high %v307_v60, %v307_v60  ;;  %v824_v2 = vpack.c.bf16 %v307_v60, %v307_v60  ;;  %v14858_v3 = vld [vmem:[%s19021_s1 + $0xc48] sm:$0xff]  }
 0x162   :  { %13405 = vmatprep.subr.bf16.mxu1 %v14822_v6  ;;  %v14859_v6 = vld [vmem:[%s19021_s1 + $0xcc8] sm:$0xff]  }
 0x163   :  { %9931 = vmatmul.mubr.bf16.vlgmr.msra.gmra.mrb[40].mxu0 %v818_v7  ;;  %v825_v4 = vpack.c.bf16 %v309_v0, %v309_v0  ;;  %v14860_v7 = vld [vmem:[%s19021_s1 + $0xc08] sm:$0xff]   ;;  %v14895_v0 = vld [vmem:[%s19021_s1 + $0xd50] sm:$0xff]  }
 0x164   :  { %13384 = vmatpush3.bf16.msra.mxu0 %v14823_v8  ;;  %9971 = vmatmul.mubr.bf16.vlgmr.msra.gmra.mrb[40].mxu1 %v820_v12  ;;  %v14862_v8 = vld [vmem:[%s19021_s1 + $0xc50] sm:$0xff]   ;;  %v14866_v12 = vld [vmem:[%s19021_s1 + $0xc58] sm:$0xff]  }
 0x165   :  { %13385 = vmatprep.subr.bf16.mxu0 %v14825_v13  ;;  %13406 = vmatpush3.bf16.msra.mxu1 %v14824_v11  ;;  %v14864_v11 = vld [vmem:[%s19021_s1 + $0xc10] sm:$0xff]  }
 0x166   :  { %13407 = vmatprep.subr.bf16.mxu1 %v14826_v15  ;;  %10050 = vmatprep.mubr.bf16.mxu1 %v825_v4  ;;  %v14865_v13 = vld [vmem:[%s19021_s1 + $0xc90] sm:$0xff]   ;;  %v14868_v15 = vld [vmem:[%s19021_s1 + $0xc18] sm:$0xff]  }
 0x167   :  { %v14899_v4 = vld [vmem:[%s19021_s1 + $0xd58] sm:$0xff]  }
 0x168   :  { %13386 = vmatpush3.bf16.msra.mxu0 %v14827_v16  ;;  %v14870_v16 = vld [vmem:[%s19021_s1 + $0xc60] sm:$0xff]  }
 0x169   :  { %13387 = vmatprep.subr.bf16.mxu0 %v14829_v18  ;;  %13408 = vmatpush3.bf16.msra.mxu1 %v14828_v17  ;;  %v14869_v17 = vld [vmem:[%s19021_s1 + $0xc98] sm:$0xff]   ;;  %v14871_v18 = vld [vmem:[%s19021_s1 + $0xce0] sm:$0xff]  }
 0x16a   :  { %13409 = vmatprep.subr.bf16.mxu1 %v14830_v19  ;;  %v14872_v19 = vld [vmem:[%s19021_s1 + $0xc20] sm:$0xff]  }
 0x16c   :  { %13388 = vmatpush3.bf16.msra.mxu0 %v14831_v20  ;;  %v14874_v20 = vld [vmem:[%s19021_s1 + $0xc68] sm:$0xff]  }
 0x16d   :  { %13389 = vmatprep.subr.bf16.mxu0 %v14833_v22  ;;  %13410 = vmatpush3.bf16.msra.mxu1 %v14832_v21  ;;  %v14873_v21 = vld [vmem:[%s19021_s1 + $0xca0] sm:$0xff]   ;;  %v14875_v22 = vld [vmem:[%s19021_s1 + $0xce8] sm:$0xff]  }
 0x16e   :  { %13411 = vmatprep.subr.bf16.mxu1 %v14834_v23  ;;  %v14876_v23 = vld [vmem:[%s19021_s1 + $0xc28] sm:$0xff]  }
 0x170   :  { %13390 = vmatpush3.bf16.msra.mxu0 %v14835_v24 }
 0x171   :  { %13391 = vmatprep.subr.bf16.mxu0 %v14837_v26  ;;  %13412 = vmatpush3.bf16.msra.mxu1 %v14836_v25  ;;  %v14877_v26 = vld [vmem:[%s19021_s1 + $0xca8] sm:$0xff]  }
 0x172   :  { %13413 = vmatprep.subr.bf16.mxu1 %v14838_v27  ;;  %v14878_v27 = vld [vmem:[%s19021_s1 + $0xc70] sm:$0xff]  }
 0x174   :  { %13392 = vmatpush3.bf16.msra.mxu0 %v14839_v28 }
 0x175   :  { %13393 = vmatprep.subr.bf16.mxu0 %v14841_v30  ;;  %13414 = vmatpush3.bf16.msra.mxu1 %v14840_v29 }
 0x176   :  { %v13091_v35 = vpop.f32.mrb[16].mxu0  ;;  %13415 = vmatprep.subr.bf16.mxu1 %v14842_v31 }
 0x177   :  { %v13113_v36 = vpop.f32.mrb[16].mxu1  ;;  %v13092_v39 = vpop.f32.mrb[17].mxu0 }
 0x178   :  { %v13114_v40 = vpop.f32.mrb[17].mxu1  ;;  %v13093_v42 = vadd.f32 %v13092_v39, %v13091_v35  ;;  %v13094_v44 = vpop.f32.mrb[18].mxu0  ;;  %13394 = vmatpush3.bf16.msra.mxu0 %v14843_v32  ;;  %v14880_v35 = vld [vmem:[%s19021_s1 + $0xc30] sm:$0xff]  }
 0x179   :  { %v13115_v43 = vadd.f32 %v13114_v40, %v13113_v36  ;;  %v13116_v45 = vpop.f32.mrb[18].mxu1  ;;  %v13095_v48 = vpop.f32.mrb[19].mxu0  ;;  %13395 = vmatprep.subr.bf16.mxu0 %v14845_v34  ;;  %13416 = vmatpush3.bf16.msra.mxu1 %v14844_v33  ;;  %v14879_v34 = vld [vmem:[%s19021_s1 + $0xcf0] sm:$0xff]   ;;  %v14882_v40 = vld [vmem:[%s19021_s1 + $0xc78] sm:$0xff]  }
 0x17a   :  { %v13117_v49 = vpop.f32.mrb[19].mxu1  ;;  %v9453_v50 = vadd.f32 %v13093_v42, %v16700_v63  ;;  %13417 = vmatprep.subr.bf16.mxu1 %v14846_v37  ;;  %v823_v63 = vpack.c.bf16 %v308_v59, %v308_v59  ;;  %v14883_v42 = vld [vmem:[%s19021_s1 + $0xcf8] sm:$0xff]   ;;  %v54_v45 = vld [vmem:[%s19020_s0 + $0x60] sm:$0xff]  ;;  %v14891_v59 = vld [vmem:[%s19021_s1 + $0xd48] sm:$0xff]  }
 0x17b   :  { %v14884_v44 = vld [vmem:[%s19021_s1 + $0xc38] sm:$0xff]   ;;  %v14887_v48 = vld [vmem:[%s19021_s1 + $0xd40] sm:$0xff]  }
 0x17c   :  { %v16801_v53 = vadd.f32 %v13115_v43, %v9453_v50  ;;  %13396 = vmatpush3.bf16.msra.mxu0 %v14847_v38  ;;  %10010 = vmatprep.mubr.bf16.mxu0 %v823_v63  ;;  %v14881_v38 = vld [vmem:[%s19021_s1 + $0xcb0] sm:$0xff]   ;;  %v14885_v49 = vld [vmem:[%s19021_s1 + $0xcb8] sm:$0xff]   ;;  %v14894_v63 = vld [vmem:[%s19021_s1 + $0xd88] sm:$0xff]  }
 0x17d   :  { %13397 = vmatprep.subr.bf16.mxu0 %v14849_v47  ;;  %13418 = vmatpush3.bf16.msra.mxu1 %v14848_v46  ;;  %v317_v46 = vrot.slane %v54_v45, %v15688_v41  ;;  %v310_v47 = vcombine.high %v54_v45, %v54_v45 }
 0x17e   :  { %13419 = vmatprep.subr.bf16.mxu1 %v14850_v51 }
 0x17f   :  { %v325_v50 = vcombine.high %v317_v46, %v317_v46  ;;  %v324_v51 = vrot.slane %v310_v47, %v15688_v41  ;;  %v14922_v47 = vld [vmem:[%s19021_s1 + $0xe00] sm:$0xff]  }
 0x180   :  { %13398 = vmatpush3.bf16.msra.mxu0 %v14851_v52  ;;  %v14888_v52 = vld [vmem:[%s19021_s1 + $0xdc0] sm:$0xff]  }
 0x181   :  { %13427 = vmatprep.subr.bf16.mxu0 %v14854_v57  ;;  %13420 = vmatpush3.bf16.msra.mxu1 %v14852_v58  ;;  %v827_v55 = vpack.c.bf16 %v325_v50, %v325_v50  ;;  %v326_v56 = vcombine.high %v324_v51, %v324_v51  ;;  %v14890_v57 = vld [vmem:[%s19021_s1 + $0xd80] sm:$0xff]   ;;  %v828_v58 = vpack.c.bf16 %v324_v51, %v324_v51 }
 0x182   :  { %13449 = vmatprep.subr.bf16.mxu1 %v14855_v61  ;;  %v14892_v61 = vld [vmem:[%s19021_s1 + $0xdc8] sm:$0xff]   ;;  %v14923_v51 = vld [vmem:[%s19021_s1 + $0xe80] sm:$0xff]  }
 0x183   :  { %10011 = vmatmul.mubr.bf16.vlgmr.msra.gmra.mrb[44].mxu0 %v822_v62  ;;  %v829_v60 = vpack.c.bf16 %v326_v56, %v326_v56  ;;  %v14893_v62 = vld [vmem:[%s19021_s1 + $0xd08] sm:$0xff]   ;;  %v14929_v56 = vld [vmem:[%s19021_s1 + $0xed0] sm:$0xff]  }
 0x184   :  { %13428 = vmatpush3.bf16.msra.mxu0 %v14856_v1  ;;  %10051 = vmatmul.mubr.bf16.vlgmr.msra.gmra.mrb[44].mxu1 %v824_v2  ;;  %v14896_v1 = vld [vmem:[%s19021_s1 + $0xdd0] sm:$0xff]  }
 0x185   :  { %13429 = vmatprep.subr.bf16.mxu0 %v14858_v3  ;;  %13450 = vmatpush3.bf16.msra.mxu1 %v14857_v5  ;;  %v14897_v2 = vld [vmem:[%s19021_s1 + $0xd10] sm:$0xff]   ;;  %v14900_v5 = vld [vmem:[%s19021_s1 + $0xdd8] sm:$0xff]  }
 0x186   :  { %13451 = vmatprep.subr.bf16.mxu1 %v14859_v6  ;;  %10090 = vmatprep.mubr.bf16.mxu0 %v827_v55  ;;  %v14898_v3 = vld [vmem:[%s19021_s1 + $0xd90] sm:$0xff]   ;;  %v14901_v6 = vld [vmem:[%s19021_s1 + $0xd18] sm:$0xff]   ;;  %v14927_v55 = vld [vmem:[%s19021_s1 + $0xe88] sm:$0xff]  }
 0x187   :  { %10130 = vmatprep.mubr.bf16.mxu1 %v829_v60  ;;  %v14933_v60 = vld [vmem:[%s19021_s1 + $0xed8] sm:$0xff]  }
 0x188   :  { %13430 = vmatpush3.bf16.msra.mxu0 %v14860_v7  ;;  %v14902_v7 = vld [vmem:[%s19021_s1 + $0xd98] sm:$0xff]  }
 0x189   :  { %13431 = vmatprep.subr.bf16.mxu0 %v14862_v8  ;;  %13452 = vmatpush3.bf16.msra.mxu1 %v14861_v9  ;;  %v14903_v8 = vld [vmem:[%s19021_s1 + $0xd60] sm:$0xff]  }
 0x18a   :  { %13453 = vmatprep.subr.bf16.mxu1 %v14863_v10  ;;  %v14904_v9 = vld [vmem:[%s19021_s1 + $0xde0] sm:$0xff]  }
 0x18b   :  { %v14905_v10 = vld [vmem:[%s19021_s1 + $0xd20] sm:$0xff]  }
 0x18c   :  { %13432 = vmatpush3.bf16.msra.mxu0 %v14864_v11  ;;  %v14906_v11 = vld [vmem:[%s19021_s1 + $0xda0] sm:$0xff]  }
 0x18d   :  { %13433 = vmatprep.subr.bf16.mxu0 %v14866_v12  ;;  %13454 = vmatpush3.bf16.msra.mxu1 %v14865_v13  ;;  %v14907_v12 = vld [vmem:[%s19021_s1 + $0xd68] sm:$0xff]  }
 0x18e   :  { %13455 = vmatprep.subr.bf16.mxu1 %v14867_v14  ;;  %v14908_v13 = vld [vmem:[%s19021_s1 + $0xde8] sm:$0xff]  }
 0x18f   :  { %v14909_v14 = vld [vmem:[%s19021_s1 + $0xd28] sm:$0xff]  }
 0x190   :  { %13434 = vmatpush3.bf16.msra.mxu0 %v14868_v15 }
 0x191   :  { %13435 = vmatprep.subr.bf16.mxu0 %v14870_v16  ;;  %13456 = vmatpush3.bf16.msra.mxu1 %v14869_v17  ;;  %v14910_v17 = vld [vmem:[%s19021_s1 + $0xda8] sm:$0xff]  }
 0x192   :  { %13457 = vmatprep.subr.bf16.mxu1 %v14871_v18  ;;  %v14911_v18 = vld [vmem:[%s19021_s1 + $0xd70] sm:$0xff]  }
 0x194   :  { %13436 = vmatpush3.bf16.msra.mxu0 %v14872_v19 }
 0x195   :  { %13437 = vmatprep.subr.bf16.mxu0 %v14874_v20  ;;  %13458 = vmatpush3.bf16.msra.mxu1 %v14873_v21 }
 0x196   :  { %v13135_v24 = vpop.f32.mrb[20].mxu0  ;;  %13459 = vmatprep.subr.bf16.mxu1 %v14875_v22 }
 0x197   :  { %v13157_v25 = vpop.f32.mrb[20].mxu1  ;;  %v13136_v28 = vpop.f32.mrb[21].mxu0 }
 0x198   :  { %v13158_v29 = vpop.f32.mrb[21].mxu1  ;;  %v13137_v30 = vadd.f32 %v13136_v28, %v13135_v24  ;;  %v13138_v32 = vpop.f32.mrb[22].mxu0  ;;  %13438 = vmatpush3.bf16.msra.mxu0 %v14876_v23 }
 0x199   :  { %v13159_v31 = vadd.f32 %v13158_v29, %v13157_v25  ;;  %v13160_v33 = vpop.f32.mrb[22].mxu1  ;;  %v13139_v36 = vpop.f32.mrb[23].mxu0  ;;  %13439 = vmatprep.subr.bf16.mxu0 %v14878_v27  ;;  %13460 = vmatpush3.bf16.msra.mxu1 %v14877_v26  ;;  %v14912_v25 = vld [vmem:[%s19021_s1 + $0xdf0] sm:$0xff]  }
 0x19a   :  { %v13161_v37 = vpop.f32.mrb[23].mxu1  ;;  %v9533_v39 = vadd.f32 %v13137_v30, %v16801_v53  ;;  %13461 = vmatprep.subr.bf16.mxu1 %v14879_v34  ;;  %v826_v53 = vpack.c.bf16 %v317_v46, %v317_v46  ;;  %v14913_v26 = vld [vmem:[%s19021_s1 + $0xd30] sm:$0xff]   ;;  %v14916_v33 = vld [vmem:[%s19021_s1 + $0xdf8] sm:$0xff]  }
 0x19b   :  { %v14914_v30 = vld [vmem:[%s19021_s1 + $0xdb0] sm:$0xff]   ;;  %v14917_v34 = vld [vmem:[%s19021_s1 + $0xd38] sm:$0xff]  }
 0x19c   :  { %v16902_v43 = vadd.f32 %v13159_v31, %v9533_v39  ;;  %13440 = vmatpush3.bf16.msra.mxu0 %v14880_v35  ;;  %v14915_v31 = vld [vmem:[%s19021_s1 + $0xd78] sm:$0xff]   ;;  %v55_v35 = vld [vmem:[%s19020_s0 + $0x68] sm:$0xff] }
 0x19d   :  { %13441 = vmatprep.subr.bf16.mxu0 %v14882_v40  ;;  %13462 = vmatpush3.bf16.msra.mxu1 %v14881_v38  ;;  %v334_v36 = vrot.slane %v55_v35, %v15688_v41  ;;  %v327_v37 = vcombine.high %v55_v35, %v55_v35  ;;  %v14920_v38 = vld [vmem:[%s19021_s1 + $0xe40] sm:$0xff]   ;;  %v14918_v39 = vld [vmem:[%s19021_s1 + $0xdb8] sm:$0xff]  }
 0x19e   :  { %13463 = vmatprep.subr.bf16.mxu1 %v14883_v42  ;;  %v14955_v35 = vld [vmem:[%s19021_s1 + $0xf00] sm:$0xff]  }
 0x19f   :  { %v342_v40 = vcombine.high %v334_v36, %v334_v36  ;;  %v341_v42 = vrot.slane %v327_v37, %v15688_v41 }
 0x1a0   :  { %13442 = vmatpush3.bf16.msra.mxu0 %v14884_v44  ;;  %v830_v44 = vpack.c.bf16 %v334_v36, %v334_v36 }
 0x1a1   :  { %13471 = vmatprep.subr.bf16.mxu0 %v14887_v48  ;;  %13464 = vmatpush3.bf16.msra.mxu1 %v14885_v49  ;;  %v831_v45 = vpack.c.bf16 %v342_v40, %v342_v40  ;;  %v343_v46 = vcombine.high %v341_v42, %v341_v42  ;;  %v832_v48 = vpack.c.bf16 %v341_v42, %v341_v42  ;;  %v14924_v49 = vld [vmem:[%s19021_s1 + $0xe48] sm:$0xff]  }
 0x1a2   :  { %13493 = vmatprep.subr.bf16.mxu1 %v14888_v52  ;;  %v14925_v52 = vld [vmem:[%s19021_s1 + $0xec8] sm:$0xff]  }
 0x1a3   :  { %10091 = vmatmul.mubr.bf16.vlgmr.msra.gmra.mrb[48].mxu0 %v826_v53  ;;  %v833_v50 = vpack.c.bf16 %v343_v46, %v343_v46  ;;  %v14926_v53 = vld [vmem:[%s19021_s1 + $0xe08] sm:$0xff]   ;;  %v14961_v46 = vld [vmem:[%s19021_s1 + $0xf50] sm:$0xff]  }
 0x1a4   :  { %13472 = vmatpush3.bf16.msra.mxu0 %v14889_v54  ;;  %10131 = vmatmul.mubr.bf16.vlgmr.msra.gmra.mrb[48].mxu1 %v828_v58  ;;  %v14928_v54 = vld [vmem:[%s19021_s1 + $0xe50] sm:$0xff]   ;;  %v14932_v58 = vld [vmem:[%s19021_s1 + $0xe58] sm:$0xff]   ;;  %v14957_v40 = vld [vmem:[%s19021_s1 + $0xf48] sm:$0xff]  }
 0x1a5   :  { %13473 = vmatprep.subr.bf16.mxu0 %v14891_v59  ;;  %13494 = vmatpush3.bf16.msra.mxu1 %v14890_v57  ;;  %v14930_v57 = vld [vmem:[%s19021_s1 + $0xe10] sm:$0xff]  }
 0x1a6   :  { %13495 = vmatprep.subr.bf16.mxu1 %v14892_v61  ;;  %10170 = vmatprep.mubr.bf16.mxu0 %v831_v45  ;;  %v14931_v59 = vld [vmem:[%s19021_s1 + $0xe90] sm:$0xff]   ;;  %v14934_v61 = vld [vmem:[%s19021_s1 + $0xe18] sm:$0xff]   ;;  %v14960_v45 = vld [vmem:[%s19021_s1 + $0xf88] sm:$0xff]  }
 0x1a7   :  { %10210 = vmatprep.mubr.bf16.mxu1 %v833_v50  ;;  %v14965_v50 = vld [vmem:[%s19021_s1 + $0xf58] sm:$0xff]  }
 0x1a8   :  { %13474 = vmatpush3.bf16.msra.mxu0 %v14893_v62  ;;  %v14936_v62 = vld [vmem:[%s19021_s1 + $0xe60] sm:$0xff]  }
 0x1a9   :  { %13475 = vmatprep.subr.bf16.mxu0 %v14895_v0  ;;  %13496 = vmatpush3.bf16.msra.mxu1 %v14894_v63  ;;  %v14935_v63 = vld [vmem:[%s19021_s1 + $0xe98] sm:$0xff]   ;;  %v14937_v0 = vld [vmem:[%s19021_s1 + $0xee0] sm:$0xff]  }
 0x1aa   :  { %13497 = vmatprep.subr.bf16.mxu1 %v14896_v1  ;;  %v14938_v1 = vld [vmem:[%s19021_s1 + $0xe20] sm:$0xff]  }
 0x1ac   :  { %13476 = vmatpush3.bf16.msra.mxu0 %v14897_v2  ;;  %v14940_v2 = vld [vmem:[%s19021_s1 + $0xe68] sm:$0xff]  }
 0x1ad   :  { %13477 = vmatprep.subr.bf16.mxu0 %v14899_v4  ;;  %13498 = vmatpush3.bf16.msra.mxu1 %v14898_v3  ;;  %v14939_v3 = vld [vmem:[%s19021_s1 + $0xea0] sm:$0xff]  }
 0x1ae   :  { %13499 = vmatprep.subr.bf16.mxu1 %v14900_v5 }
 0x1b0   :  { %13478 = vmatpush3.bf16.msra.mxu0 %v14901_v6  ;;  %v14941_v6 = vld [vmem:[%s19021_s1 + $0xee8] sm:$0xff]  }
 0x1b1   :  { %13479 = vmatprep.subr.bf16.mxu0 %v14903_v8  ;;  %13500 = vmatpush3.bf16.msra.mxu1 %v14902_v7  ;;  %v14942_v7 = vld [vmem:[%s19021_s1 + $0xe28] sm:$0xff]  }
 0x1b2   :  { %13501 = vmatprep.subr.bf16.mxu1 %v14904_v9 }
 0x1b4   :  { %13480 = vmatpush3.bf16.msra.mxu0 %v14905_v10  ;;  %v14943_v10 = vld [vmem:[%s19021_s1 + $0xea8] sm:$0xff]  }
 0x1b5   :  { %13481 = vmatprep.subr.bf16.mxu0 %v14907_v12  ;;  %13502 = vmatpush3.bf16.msra.mxu1 %v14906_v11 }
 0x1b6   :  { %v13179_v15 = vpop.f32.mrb[24].mxu0  ;;  %13503 = vmatprep.subr.bf16.mxu1 %v14908_v13 }
 0x1b7   :  { %v13201_v16 = vpop.f32.mrb[24].mxu1  ;;  %v13180_v19 = vpop.f32.mrb[25].mxu0 }
 0x1b8   :  { %v13202_v20 = vpop.f32.mrb[25].mxu1  ;;  %v13181_v21 = vadd.f32 %v13180_v19, %v13179_v15  ;;  %v13182_v23 = vpop.f32.mrb[26].mxu0  ;;  %13482 = vmatpush3.bf16.msra.mxu0 %v14909_v14  ;;  %v14944_v15 = vld [vmem:[%s19021_s1 + $0xe70] sm:$0xff]  }
 0x1b9   :  { %v13203_v22 = vadd.f32 %v13202_v20, %v13201_v16  ;;  %v13204_v24 = vpop.f32.mrb[26].mxu1  ;;  %v13183_v27 = vpop.f32.mrb[27].mxu0  ;;  %13483 = vmatprep.subr.bf16.mxu0 %v14911_v18  ;;  %13504 = vmatpush3.bf16.msra.mxu1 %v14910_v17  ;;  %v14945_v16 = vld [vmem:[%s19021_s1 + $0xef0] sm:$0xff]   ;;  %v14948_v23 = vld [vmem:[%s19021_s1 + $0xe78] sm:$0xff]  }
 0x1ba   :  { %v13205_v28 = vpop.f32.mrb[27].mxu1  ;;  %v9613_v29 = vadd.f32 %v13181_v21, %v16902_v43  ;;  %13505 = vmatprep.subr.bf16.mxu1 %v14912_v25  ;;  %v14921_v43 = vld [vmem:[%s19021_s1 + $0xec0] sm:$0xff]   ;;  %v14946_v20 = vld [vmem:[%s19021_s1 + $0xe30] sm:$0xff]   ;;  %v14949_v24 = vld [vmem:[%s19021_s1 + $0xef8] sm:$0xff]  }
 0x1bb   :  { %v14947_v21 = vld [vmem:[%s19021_s1 + $0xeb0] sm:$0xff]   ;;  %v14950_v25 = vld [vmem:[%s19021_s1 + $0xe38] sm:$0xff]  }
 0x1bc   :  { %v17003_v32 = vadd.f32 %v13203_v22, %v9613_v29  ;;  %13484 = vmatpush3.bf16.msra.mxu0 %v14913_v26  ;;  %v56_v26 = vld [vmem:[%s19020_s0 + $0x70] sm:$0xff]  ;;  %v14953_v29 = vld [vmem:[%s19021_s1 + $0xf40] sm:$0xff]  }
 0x1bd   :  { %13485 = vmatprep.subr.bf16.mxu0 %v14915_v31  ;;  %13506 = vmatpush3.bf16.msra.mxu1 %v14914_v30  ;;  %v351_v27 = vrot.slane %v56_v26, %v15688_v41  ;;  %v344_v28 = vcombine.high %v56_v26, %v56_v26  ;;  %v14951_v30 = vld [vmem:[%s19021_s1 + $0xeb8] sm:$0xff]   ;;  %v14988_v26 = vld [vmem:[%s19021_s1 + $0x1000] sm:$0xff]  }
 0x1be   :  { %13507 = vmatprep.subr.bf16.mxu1 %v14916_v33  ;;  %v14954_v33 = vld [vmem:[%s19021_s1 + $0xfc0] sm:$0xff]  }
 0x1bf   :  { %v359_v31 = vcombine.high %v351_v27, %v351_v27 }
 0x1c0   :  { %13486 = vmatpush3.bf16.msra.mxu0 %v14917_v34  ;;  %v834_v34 = vpack.c.bf16 %v351_v27, %v351_v27 }
 0x1c1   :  { %13515 = vmatprep.subr.bf16.mxu0 %v14920_v38  ;;  %13508 = vmatpush3.bf16.msra.mxu1 %v14918_v39  ;;  %v835_v36 = vpack.c.bf16 %v359_v31, %v359_v31  ;;  %v14956_v38 = vld [vmem:[%s19021_s1 + $0xf80] sm:$0xff]   ;;  %v14990_v31 = vld [vmem:[%s19021_s1 + $0x1048] sm:$0xff]  }
 0x1c2   :  { %13537 = vmatprep.subr.bf16.mxu1 %v14921_v43  ;;  %v14958_v43 = vld [vmem:[%s19021_s1 + $0xfc8] sm:$0xff]  }
 0x1c3   :  { %10171 = vmatmul.mubr.bf16.vlgmr.msra.gmra.mrb[52].mxu0 %v830_v44  ;;  %v14959_v44 = vld [vmem:[%s19021_s1 + $0xf08] sm:$0xff]  }
 0x1c4   :  { %13516 = vmatpush3.bf16.msra.mxu0 %v14922_v47  ;;  %10211 = vmatmul.mubr.bf16.vlgmr.msra.gmra.mrb[52].mxu1 %v832_v48  ;;  %v14962_v47 = vld [vmem:[%s19021_s1 + $0xfd0] sm:$0xff]  }
 0x1c5   :  { %13517 = vmatprep.subr.bf16.mxu0 %v14924_v49  ;;  %13538 = vmatpush3.bf16.msra.mxu1 %v14923_v51  ;;  %v14963_v48 = vld [vmem:[%s19021_s1 + $0xf10] sm:$0xff]   ;;  %v14966_v51 = vld [vmem:[%s19021_s1 + $0xfd8] sm:$0xff]  }
 0x1c6   :  { %13539 = vmatprep.subr.bf16.mxu1 %v14925_v52  ;;  %10250 = vmatprep.mubr.bf16.mxu0 %v835_v36  ;;  %v14964_v49 = vld [vmem:[%s19021_s1 + $0xf90] sm:$0xff]   ;;  %v14967_v52 = vld [vmem:[%s19021_s1 + $0xf18] sm:$0xff]  }
 0x1c7   :  { %v14994_v36 = vld [vmem:[%s19021_s1 + $0x1050] sm:$0xff]  }
 0x1c8   :  { %13518 = vmatpush3.bf16.msra.mxu0 %v14926_v53  ;;  %v14968_v53 = vld [vmem:[%s19021_s1 + $0xf98] sm:$0xff]  }
 0x1c9   :  { %13519 = vmatprep.subr.bf16.mxu0 %v14928_v54  ;;  %13540 = vmatpush3.bf16.msra.mxu1 %v14927_v55  ;;  %v14969_v54 = vld [vmem:[%s19021_s1 + $0xf60] sm:$0xff]  }
 0x1ca   :  { %13541 = vmatprep.subr.bf16.mxu1 %v14929_v56  ;;  %v14970_v55 = vld [vmem:[%s19021_s1 + $0xfe0] sm:$0xff]  }
 0x1cb   :  { %v14971_v56 = vld [vmem:[%s19021_s1 + $0xf20] sm:$0xff]  }
 0x1cc   :  { %13520 = vmatpush3.bf16.msra.mxu0 %v14930_v57  ;;  %v14972_v57 = vld [vmem:[%s19021_s1 + $0xfa0] sm:$0xff]  }
 0x1cd   :  { %13521 = vmatprep.subr.bf16.mxu0 %v14932_v58  ;;  %13542 = vmatpush3.bf16.msra.mxu1 %v14931_v59  ;;  %v14973_v58 = vld [vmem:[%s19021_s1 + $0xf68] sm:$0xff]  }
 0x1ce   :  { %13543 = vmatprep.subr.bf16.mxu1 %v14933_v60 }
 0x1d0   :  { %13522 = vmatpush3.bf16.msra.mxu0 %v14934_v61  ;;  %v14974_v61 = vld [vmem:[%s19021_s1 + $0xfe8] sm:$0xff]  }
 0x1d1   :  { %13523 = vmatprep.subr.bf16.mxu0 %v14936_v62  ;;  %13544 = vmatpush3.bf16.msra.mxu1 %v14935_v63  ;;  %v14975_v62 = vld [vmem:[%s19021_s1 + $0xf28] sm:$0xff]  }
 0x1d2   :  { %13545 = vmatprep.subr.bf16.mxu1 %v14937_v0 }
 0x1d4   :  { %13524 = vmatpush3.bf16.msra.mxu0 %v14938_v1 }
 0x1d5   :  { %13525 = vmatprep.subr.bf16.mxu0 %v14940_v2  ;;  %13546 = vmatpush3.bf16.msra.mxu1 %v14939_v3 }
 0x1d6   :  { %v13223_v4 = vpop.f32.mrb[28].mxu0  ;;  %13547 = vmatprep.subr.bf16.mxu1 %v14941_v6  ;;  %v14977_v6 = vld [vmem:[%s19021_s1 + $0xf70] sm:$0xff]  }
 0x1d7   :  { %v13245_v5 = vpop.f32.mrb[28].mxu1  ;;  %v13224_v8 = vpop.f32.mrb[29].mxu0 }
 0x1d8   :  { %v13246_v9 = vpop.f32.mrb[29].mxu1  ;;  %v13225_v11 = vadd.f32 %v13224_v8, %v13223_v4  ;;  %v13226_v13 = vpop.f32.mrb[30].mxu0  ;;  %13526 = vmatpush3.bf16.msra.mxu0 %v14942_v7 }
 0x1d9   :  { %v13247_v12 = vadd.f32 %v13246_v9, %v13245_v5  ;;  %v13248_v14 = vpop.f32.mrb[30].mxu1  ;;  %v13227_v17 = vpop.f32.mrb[31].mxu0  ;;  %13527 = vmatprep.subr.bf16.mxu0 %v14944_v15  ;;  %13548 = vmatpush3.bf16.msra.mxu1 %v14943_v10  ;;  %v14976_v5 = vld [vmem:[%s19021_s1 + $0xfa8] sm:$0xff]   ;;  %v14978_v10 = vld [vmem:[%s19021_s1 + $0xff0] sm:$0xff]   ;;  %v14982_v15 = vld [vmem:[%s19021_s1 + $0xff8] sm:$0xff]  }
 0x1da   :  { %v13249_v18 = vpop.f32.mrb[31].mxu1  ;;  %v9693_v19 = vadd.f32 %v13225_v11, %v17003_v32  ;;  %13549 = vmatprep.subr.bf16.mxu1 %v14945_v16  ;;  %v358_v32 = vrot.slane %v344_v28, %v15688_v41  ;;  %v14979_v11 = vld [vmem:[%s19021_s1 + $0xf30] sm:$0xff]   ;;  %v14981_v14 = vld [vmem:[%s19021_s1 + $0xf78] sm:$0xff]  }
 0x1db   :  { %v14980_v13 = vld [vmem:[%s19021_s1 + $0xfb0] sm:$0xff]   ;;  %v14983_v16 = vld [vmem:[%s19021_s1 + $0xf38] sm:$0xff]  }
 0x1dc   :  { %v17104_v22 = vadd.f32 %v13247_v12, %v9693_v19  ;;  %13528 = vmatpush3.bf16.msra.mxu0 %v14946_v20  ;;  %v360_v37 = vcombine.high %v358_v32, %v358_v32  ;;  %v836_v39 = vpack.c.bf16 %v358_v32, %v358_v32  ;;  %v57_v17 = vld [vmem:[%s19020_s0 + $0x78] sm:$0xff]  ;;  %v14986_v20 = vld [vmem:[%s19021_s1 + $0x1040] sm:$0xff]  }
 0x1dd   :  { %13529 = vmatprep.subr.bf16.mxu0 %v14948_v23  ;;  %13550 = vmatpush3.bf16.msra.mxu1 %v14947_v21  ;;  %v368_v18 = vrot.slane %v57_v17, %v15688_v41  ;;  %v361_v19 = vcombine.high %v57_v17, %v57_v17  ;;  %v14984_v21 = vld [vmem:[%s19021_s1 + $0xfb8] sm:$0xff]   ;;  %v15021_v17 = vld [vmem:[%s19021_s1 + $0x1100] sm:$0xff]  }
 0x1de   :  { %13551 = vmatprep.subr.bf16.mxu1 %v14949_v24  ;;  %v837_v42 = vpack.c.bf16 %v360_v37, %v360_v37  ;;  %v14987_v24 = vld [vmem:[%s19021_s1 + $0x10c0] sm:$0xff]   ;;  %v14995_v37 = vld [vmem:[%s19021_s1 + $0x10d0] sm:$0xff]  }
 0x1df   :  { %v375_v23 = vrot.slane %v361_v19, %v15688_v41 }
 0x1e0   :  { %13530 = vmatpush3.bf16.msra.mxu0 %v14950_v25  ;;  %10290 = vmatprep.mubr.bf16.mxu1 %v837_v42  ;;  %v838_v25 = vpack.c.bf16 %v368_v18, %v368_v18  ;;  %v14999_v42 = vld [vmem:[%s19021_s1 + $0x10d8] sm:$0xff]  }
 0x1e1   :  { %13559 = vmatprep.subr.bf16.mxu0 %v14953_v29  ;;  %13552 = vmatpush3.bf16.msra.mxu1 %v14951_v30  ;;  %v377_v28 = vcombine.high %v375_v23, %v375_v23  ;;  %v14989_v29 = vld [vmem:[%s19021_s1 + $0x1080] sm:$0xff]   ;;  %v840_v30 = vpack.c.bf16 %v375_v23, %v375_v23 }
 0x1e2   :  { %13581 = vmatprep.subr.bf16.mxu1 %v14954_v33  ;;  %v14991_v33 = vld [vmem:[%s19021_s1 + $0x10c8] sm:$0xff]  }
 0x1e3   :  { %10251 = vmatmul.mubr.bf16.vlgmr.msra.gmra.mrb[56].mxu0 %v834_v34  ;;  %v841_v32 = vpack.c.bf16 %v377_v28, %v377_v28  ;;  %v14992_v34 = vld [vmem:[%s19021_s1 + $0x1008] sm:$0xff]   ;;  %v15028_v28 = vld [vmem:[%s19021_s1 + $0x11d0] sm:$0xff]  }
 0x1e4   :  { %13560 = vmatpush3.bf16.msra.mxu0 %v14955_v35  ;;  %10291 = vmatmul.mubr.bf16.vlgmr.msra.gmra.mrb[56].mxu1 %v836_v39  ;;  %v14993_v35 = vld [vmem:[%s19021_s1 + $0x1088] sm:$0xff]   ;;  %v14997_v39 = vld [vmem:[%s19021_s1 + $0x1090] sm:$0xff]  }
 0x1e5   :  { %13561 = vmatprep.subr.bf16.mxu0 %v14957_v40  ;;  %13582 = vmatpush3.bf16.msra.mxu1 %v14956_v38  ;;  %v14996_v38 = vld [vmem:[%s19021_s1 + $0x1010] sm:$0xff]   ;;  %v14998_v40 = vld [vmem:[%s19021_s1 + $0x1058] sm:$0xff]  }
 0x1e6   :  { %13583 = vmatprep.subr.bf16.mxu1 %v14958_v43  ;;  %10370 = vmatprep.mubr.bf16.mxu1 %v841_v32  ;;  %v15000_v43 = vld [vmem:[%s19021_s1 + $0x1018] sm:$0xff]  }
 0x1e7   :  { %v15032_v32 = vld [vmem:[%s19021_s1 + $0x11d8] sm:$0xff]  }
 0x1e8   :  { %13562 = vmatpush3.bf16.msra.mxu0 %v14959_v44  ;;  %v15001_v44 = vld [vmem:[%s19021_s1 + $0x1098] sm:$0xff]  }
 0x1e9   :  { %13563 = vmatprep.subr.bf16.mxu0 %v14961_v46  ;;  %13584 = vmatpush3.bf16.msra.mxu1 %v14960_v45  ;;  %v15002_v45 = vld [vmem:[%s19021_s1 + $0x1060] sm:$0xff]  }
 0x1ea   :  { %13585 = vmatprep.subr.bf16.mxu1 %v14962_v47  ;;  %v15003_v46 = vld [vmem:[%s19021_s1 + $0x10e0] sm:$0xff]  }
 0x1eb   :  { %v15004_v47 = vld [vmem:[%s19021_s1 + $0x1020] sm:$0xff]  }
 0x1ec   :  { %13564 = vmatpush3.bf16.msra.mxu0 %v14963_v48  ;;  %v15005_v48 = vld [vmem:[%s19021_s1 + $0x10a0] sm:$0xff]  }
 0x1ed   :  { %13565 = vmatprep.subr.bf16.mxu0 %v14965_v50  ;;  %13586 = vmatpush3.bf16.msra.mxu1 %v14964_v49  ;;  %v15006_v50 = vld [vmem:[%s19021_s1 + $0x1068] sm:$0xff]  }
 0x1ee   :  { %13587 = vmatprep.subr.bf16.mxu1 %v14966_v51 }
 0x1f0   :  { %13566 = vmatpush3.bf16.msra.mxu0 %v14967_v52 }
 0x1f1   :  { %13567 = vmatprep.subr.bf16.mxu0 %v14969_v54  ;;  %13588 = vmatpush3.bf16.msra.mxu1 %v14968_v53  ;;  %v15007_v53 = vld [vmem:[%s19021_s1 + $0x10e8] sm:$0xff]  }
 0x1f2   :  { %13589 = vmatprep.subr.bf16.mxu1 %v14970_v55  ;;  %v15008_v54 = vld [vmem:[%s19021_s1 + $0x1028] sm:$0xff]  }
 0x1f4   :  { %13568 = vmatpush3.bf16.msra.mxu0 %v14971_v56 }
 0x1f5   :  { %13569 = vmatprep.subr.bf16.mxu0 %v14973_v58  ;;  %13590 = vmatpush3.bf16.msra.mxu1 %v14972_v57 }
 0x1f6   :  { %v13267_v59 = vpop.f32.mrb[32].mxu0  ;;  %13591 = vmatprep.subr.bf16.mxu1 %v14974_v61 }
 0x1f7   :  { %v13289_v60 = vpop.f32.mrb[32].mxu1  ;;  %v13268_v63 = vpop.f32.mrb[33].mxu0 }
 0x1f8   :  { %v13290_v0 = vpop.f32.mrb[33].mxu1  ;;  %v13269_v1 = vadd.f32 %v13268_v63, %v13267_v59  ;;  %v13270_v3 = vpop.f32.mrb[34].mxu0  ;;  %13570 = vmatpush3.bf16.msra.mxu0 %v14975_v62  ;;  %v15010_v62 = vld [vmem:[%s19021_s1 + $0x1070] sm:$0xff]  }
 0x1f9   :  { %v13291_v2 = vadd.f32 %v13290_v0, %v13289_v60  ;;  %v13292_v4 = vpop.f32.mrb[34].mxu1  ;;  %v13271_v7 = vpop.f32.mrb[35].mxu0  ;;  %13571 = vmatprep.subr.bf16.mxu0 %v14977_v6  ;;  %13592 = vmatpush3.bf16.msra.mxu1 %v14976_v5  ;;  %v15009_v60 = vld [vmem:[%s19021_s1 + $0x10a8] sm:$0xff]   ;;  %v15012_v3 = vld [vmem:[%s19021_s1 + $0x1030] sm:$0xff]   ;;  %v15014_v5 = vld [vmem:[%s19021_s1 + $0x1078] sm:$0xff]  }
 0x1fa   :  { %v13293_v8 = vpop.f32.mrb[35].mxu1  ;;  %v9773_v9 = vadd.f32 %v13269_v1, %v17104_v22  ;;  %13593 = vmatprep.subr.bf16.mxu1 %v14978_v10  ;;  %v376_v22 = vcombine.high %v368_v18, %v368_v18  ;;  %v15011_v1 = vld [vmem:[%s19021_s1 + $0x10f0] sm:$0xff]   ;;  %v15015_v6 = vld [vmem:[%s19021_s1 + $0x10f8] sm:$0xff]  }
 0x1fb   :  { %v15013_v4 = vld [vmem:[%s19021_s1 + $0x10b0] sm:$0xff]   ;;  %v15016_v7 = vld [vmem:[%s19021_s1 + $0x1038] sm:$0xff]   ;;  %v58_v8 = vld [vmem:[%s19020_s0 + $0x80] sm:$0xff] }
 0x1fc   :  { %v17205_v12 = vadd.f32 %v13291_v2, %v9773_v9  ;;  %13572 = vmatpush3.bf16.msra.mxu0 %v14979_v11  ;;  %v839_v27 = vpack.c.bf16 %v376_v22, %v376_v22  ;;  %v15017_v9 = vld [vmem:[%s19021_s1 + $0x10b8] sm:$0xff]   ;;  %v385_v10 = vrot.slane %v58_v8, %v15688_v41  ;;  %v378_v11 = vcombine.high %v58_v8, %v58_v8  ;;  %v15023_v22 = vld [vmem:[%s19021_s1 + $0x1148] sm:$0xff]  }
 0x1fd   :  { %13573 = vmatprep.subr.bf16.mxu0 %v14981_v14  ;;  %13594 = vmatpush3.bf16.msra.mxu1 %v14980_v13 }
 0x1fe   :  { %13595 = vmatprep.subr.bf16.mxu1 %v14982_v15  ;;  %10330 = vmatprep.mubr.bf16.mxu0 %v839_v27  ;;  %v393_v13 = vcombine.high %v385_v10, %v385_v10  ;;  %v392_v14 = vrot.slane %v378_v11, %v15688_v41  ;;  %v15020_v15 = vld [vmem:[%s19021_s1 + $0x11c0] sm:$0xff]   ;;  %v15027_v27 = vld [vmem:[%s19021_s1 + $0x1150] sm:$0xff]  }
 0x200   :  { %13574 = vmatpush3.bf16.msra.mxu0 %v14983_v16  ;;  %v842_v16 = vpack.c.bf16 %v385_v10, %v385_v10  ;;  %v843_v18 = vpack.c.bf16 %v393_v13, %v393_v13  ;;  %v394_v19 = vcombine.high %v392_v14, %v392_v14  ;;  %v15054_v10 = vld [vmem:[%s19021_s1 + $0x1200] sm:$0xff]  }
 0x201   :  { %13603 = vmatprep.subr.bf16.mxu0 %v14986_v20  ;;  %13596 = vmatpush3.bf16.msra.mxu1 %v14984_v21  ;;  %v15022_v20 = vld [vmem:[%s19021_s1 + $0x1180] sm:$0xff]   ;;  %v844_v21 = vpack.c.bf16 %v392_v14, %v392_v14 }
 0x202   :  { %13625 = vmatprep.subr.bf16.mxu1 %v14987_v24  ;;  %v845_v23 = vpack.c.bf16 %v394_v19, %v394_v19  ;;  %v15024_v24 = vld [vmem:[%s19021_s1 + $0x11c8] sm:$0xff]   ;;  %v15055_v14 = vld [vmem:[%s19021_s1 + $0x1280] sm:$0xff]   ;;  %v15061_v19 = vld [vmem:[%s19021_s1 + $0x12d0] sm:$0xff]  }
 0x203   :  { %10331 = vmatmul.mubr.bf16.vlgmr.msra.gmra.mrb[60].mxu0 %v838_v25  ;;  %v15025_v25 = vld [vmem:[%s19021_s1 + $0x1108] sm:$0xff]  }
 0x204   :  { %13604 = vmatpush3.bf16.msra.mxu0 %v14988_v26  ;;  %10371 = vmatmul.mubr.bf16.vlgmr.msra.gmra.mrb[60].mxu1 %v840_v30  ;;  %v15026_v26 = vld [vmem:[%s19021_s1 + $0x1188] sm:$0xff]   ;;  %v15030_v30 = vld [vmem:[%s19021_s1 + $0x1190] sm:$0xff]  }
 0x205   :  { %13605 = vmatprep.subr.bf16.mxu0 %v14990_v31  ;;  %13626 = vmatpush3.bf16.msra.mxu1 %v14989_v29  ;;  %v15029_v29 = vld [vmem:[%s19021_s1 + $0x1110] sm:$0xff]   ;;  %v15031_v31 = vld [vmem:[%s19021_s1 + $0x1158] sm:$0xff]  }
 0x206   :  { %13627 = vmatprep.subr.bf16.mxu1 %v14991_v33  ;;  %10410 = vmatprep.mubr.bf16.mxu0 %v843_v18  ;;  %v15033_v33 = vld [vmem:[%s19021_s1 + $0x1118] sm:$0xff]   ;;  %v15059_v18 = vld [vmem:[%s19021_s1 + $0x1288] sm:$0xff]  }
 0x207   :  { %10450 = vmatprep.mubr.bf16.mxu1 %v845_v23  ;;  %v15065_v23 = vld [vmem:[%s19021_s1 + $0x12d8] sm:$0xff]  }
 0x208   :  { %13606 = vmatpush3.bf16.msra.mxu0 %v14992_v34  ;;  %v15034_v34 = vld [vmem:[%s19021_s1 + $0x1198] sm:$0xff]  }
 0x209   :  { %13607 = vmatprep.subr.bf16.mxu0 %v14994_v36  ;;  %13628 = vmatpush3.bf16.msra.mxu1 %v14993_v35  ;;  %v15035_v35 = vld [vmem:[%s19021_s1 + $0x1160] sm:$0xff]  }
 0x20a   :  { %13629 = vmatprep.subr.bf16.mxu1 %v14995_v37  ;;  %v15036_v36 = vld [vmem:[%s19021_s1 + $0x11e0] sm:$0xff]  }
 0x20b   :  { %v15037_v37 = vld [vmem:[%s19021_s1 + $0x1120] sm:$0xff]  }
 0x20c   :  { %13608 = vmatpush3.bf16.msra.mxu0 %v14996_v38  ;;  %v15038_v38 = vld [vmem:[%s19021_s1 + $0x11a0] sm:$0xff]  }
 0x20d   :  { %13609 = vmatprep.subr.bf16.mxu0 %v14998_v40  ;;  %13630 = vmatpush3.bf16.msra.mxu1 %v14997_v39  ;;  %v15039_v40 = vld [vmem:[%s19021_s1 + $0x1168] sm:$0xff]  }
 0x20e   :  { %13631 = vmatprep.subr.bf16.mxu1 %v14999_v42 }
 0x210   :  { %13610 = vmatpush3.bf16.msra.mxu0 %v15000_v43  ;;  %v15040_v43 = vld [vmem:[%s19021_s1 + $0x11e8] sm:$0xff]  }
 0x211   :  { %13611 = vmatprep.subr.bf16.mxu0 %v15002_v45  ;;  %13632 = vmatpush3.bf16.msra.mxu1 %v15001_v44 }
 0x212   :  { %13633 = vmatprep.subr.bf16.mxu1 %v15003_v46 }
 0x214   :  { %13612 = vmatpush3.bf16.msra.mxu0 %v15004_v47 }
 0x215   :  { %13613 = vmatprep.subr.bf16.mxu0 %v15006_v50  ;;  %13634 = vmatpush3.bf16.msra.mxu1 %v15005_v48  ;;  %v15041_v48 = vld [vmem:[%s19021_s1 + $0x1128] sm:$0xff]  }
 0x216   :  { %v13311_v49 = vpop.f32.mrb[36].mxu0  ;;  %13635 = vmatprep.subr.bf16.mxu1 %v15007_v53 }
 0x217   :  { %v13333_v51 = vpop.f32.mrb[36].mxu1  ;;  %v13312_v52 = vpop.f32.mrb[37].mxu0 }
 0x218   :  { %v13313_v55 = vadd.f32 %v13312_v52, %v13311_v49  ;;  %v13334_v56 = vpop.f32.mrb[37].mxu1  ;;  %v13314_v57 = vpop.f32.mrb[38].mxu0  ;;  %13614 = vmatpush3.bf16.msra.mxu0 %v15008_v54  ;;  %v15042_v49 = vld [vmem:[%s19021_s1 + $0x11a8] sm:$0xff]   ;;  %v15043_v54 = vld [vmem:[%s19021_s1 + $0x1170] sm:$0xff]  }
 0x219   :  { %v13335_v58 = vadd.f32 %v13334_v56, %v13333_v51  ;;  %v13336_v59 = vpop.f32.mrb[38].mxu1  ;;  %v13315_v61 = vpop.f32.mrb[39].mxu0  ;;  %13615 = vmatprep.subr.bf16.mxu0 %v15010_v62  ;;  %13636 = vmatpush3.bf16.msra.mxu1 %v15009_v60  ;;  %v15044_v56 = vld [vmem:[%s19021_s1 + $0x11f0] sm:$0xff]   ;;  %v15049_v62 = vld [vmem:[%s19021_s1 + $0x1138] sm:$0xff]  }
 0x21a   :  { %v9853_v63 = vadd.f32 %v13313_v55, %v17205_v12  ;;  %v13337_v0 = vpop.f32.mrb[39].mxu1  ;;  %13637 = vmatprep.subr.bf16.mxu1 %v15011_v1  ;;  %v15019_v12 = vld [vmem:[%s19021_s1 + $0x1140] sm:$0xff]   ;;  %v15047_v59 = vld [vmem:[%s19021_s1 + $0x1178] sm:$0xff]   ;;  %v15046_v60 = vld [vmem:[%s19021_s1 + $0x11b0] sm:$0xff]  }
 0x21b   :  { %v15048_v61 = vld [vmem:[%s19021_s1 + $0x11f8] sm:$0xff]  }
 0x21c   :  { %v17306_v2 = vadd.f32 %v13335_v58, %v9853_v63  ;;  %13616 = vmatpush3.bf16.msra.mxu0 %v15012_v3  ;;  %v15045_v58 = vld [vmem:[%s19021_s1 + $0x1130] sm:$0xff]   ;;  %v59_v63 = vld [vmem:[%s19020_s0 + $0x88] sm:$0xff]  ;;  %v15050_v3 = vld [vmem:[%s19021_s1 + $0x11b8] sm:$0xff]  }
 0x21d   :  { %13617 = vmatprep.subr.bf16.mxu0 %v15014_v5  ;;  %13638 = vmatpush3.bf16.msra.mxu1 %v15013_v4  ;;  %v402_v0 = vrot.slane %v59_v63, %v15688_v41  ;;  %v395_v1 = vcombine.high %v59_v63, %v59_v63 }
 0x21e   :  { %13639 = vmatprep.subr.bf16.mxu1 %v15015_v6  ;;  %v15053_v6 = vld [vmem:[%s19021_s1 + $0x12c0] sm:$0xff]  }
 0x21f   :  { %v410_v4 = vcombine.high %v402_v0, %v402_v0  ;;  %v409_v5 = vrot.slane %v395_v1, %v15688_v41  ;;  %v15087_v1 = vld [vmem:[%s19021_s1 + $0x1300] sm:$0xff]  }
 0x220   :  { %13618 = vmatpush3.bf16.msra.mxu0 %v15016_v7  ;;  %v846_v7 = vpack.c.bf16 %v402_v0, %v402_v0 }
 0x221   :  { %13647 = vmatprep.subr.bf16.mxu0 %v15019_v12  ;;  %13640 = vmatpush3.bf16.msra.mxu1 %v15017_v9  ;;  %v847_v8 = vpack.c.bf16 %v410_v4, %v410_v4  ;;  %v411_v9 = vcombine.high %v409_v5, %v409_v5  ;;  %v848_v11 = vpack.c.bf16 %v409_v5, %v409_v5  ;;  %v15056_v12 = vld [vmem:[%s19021_s1 + $0x1248] sm:$0xff]   ;;  %v15088_v5 = vld [vmem:[%s19021_s1 + $0x1380] sm:$0xff]  }
 0x222   :  { %13669 = vmatprep.subr.bf16.mxu1 %v15020_v15  ;;  %v15057_v15 = vld [vmem:[%s19021_s1 + $0x12c8] sm:$0xff]  }
 0x223   :  { %10411 = vmatmul.mubr.bf16.vlgmr.msra.gmra.mrb[64].mxu0 %v842_v16  ;;  %v849_v13 = vpack.c.bf16 %v411_v9, %v411_v9  ;;  %v15058_v16 = vld [vmem:[%s19021_s1 + $0x1208] sm:$0xff]  }
 0x224   :  { %13648 = vmatpush3.bf16.msra.mxu0 %v15021_v17  ;;  %10451 = vmatmul.mubr.bf16.vlgmr.msra.gmra.mrb[64].mxu1 %v844_v21  ;;  %v15060_v17 = vld [vmem:[%s19021_s1 + $0x1250] sm:$0xff]   ;;  %v15064_v21 = vld [vmem:[%s19021_s1 + $0x1258] sm:$0xff]   ;;  %v15092_v9 = vld [vmem:[%s19021_s1 + $0x1388] sm:$0xff]  }
 0x225   :  { %13649 = vmatprep.subr.bf16.mxu0 %v15023_v22  ;;  %13670 = vmatpush3.bf16.msra.mxu1 %v15022_v20  ;;  %v15062_v20 = vld [vmem:[%s19021_s1 + $0x1210] sm:$0xff]  }
 0x226   :  { %13671 = vmatprep.subr.bf16.mxu1 %v15024_v24  ;;  %10490 = vmatprep.mubr.bf16.mxu0 %v847_v8  ;;  %v15063_v22 = vld [vmem:[%s19021_s1 + $0x1290] sm:$0xff]   ;;  %v15066_v24 = vld [vmem:[%s19021_s1 + $0x1218] sm:$0xff]  }
 0x227   :  { %10530 = vmatprep.mubr.bf16.mxu1 %v849_v13  ;;  %v15093_v8 = vld [vmem:[%s19021_s1 + $0x1350] sm:$0xff]  }
 0x228   :  { %13650 = vmatpush3.bf16.msra.mxu0 %v15025_v25  ;;  %v15068_v25 = vld [vmem:[%s19021_s1 + $0x1260] sm:$0xff]   ;;  %v15096_v13 = vld [vmem:[%s19021_s1 + $0x1390] sm:$0xff]  }
 0x229   :  { %13651 = vmatprep.subr.bf16.mxu0 %v15027_v27  ;;  %13672 = vmatpush3.bf16.msra.mxu1 %v15026_v26  ;;  %v15067_v26 = vld [vmem:[%s19021_s1 + $0x1298] sm:$0xff]   ;;  %v15069_v27 = vld [vmem:[%s19021_s1 + $0x12e0] sm:$0xff]  }
 0x22a   :  { %13673 = vmatprep.subr.bf16.mxu1 %v15028_v28  ;;  %v15070_v28 = vld [vmem:[%s19021_s1 + $0x1220] sm:$0xff]  }
 0x22c   :  { %13652 = vmatpush3.bf16.msra.mxu0 %v15029_v29 }
 0x22d   :  { %13653 = vmatprep.subr.bf16.mxu0 %v15031_v31  ;;  %13674 = vmatpush3.bf16.msra.mxu1 %v15030_v30  ;;  %v15072_v30 = vld [vmem:[%s19021_s1 + $0x1268] sm:$0xff]   ;;  %v15071_v31 = vld [vmem:[%s19021_s1 + $0x12a0] sm:$0xff]  }
 0x22e   :  { %13675 = vmatprep.subr.bf16.mxu1 %v15032_v32 }
 0x230   :  { %13654 = vmatpush3.bf16.msra.mxu0 %v15033_v33 }
 0x231   :  { %13655 = vmatprep.subr.bf16.mxu0 %v15035_v35  ;;  %13676 = vmatpush3.bf16.msra.mxu1 %v15034_v34  ;;  %v15073_v35 = vld [vmem:[%s19021_s1 + $0x12e8] sm:$0xff]  }
 0x232   :  { %13677 = vmatprep.subr.bf16.mxu1 %v15036_v36 }
 0x234   :  { %13656 = vmatpush3.bf16.msra.mxu0 %v15037_v37  ;;  %v15074_v37 = vld [vmem:[%s19021_s1 + $0x1228] sm:$0xff]  }
 0x235   :  { %13657 = vmatprep.subr.bf16.mxu0 %v15039_v40  ;;  %13678 = vmatpush3.bf16.msra.mxu1 %v15038_v38 }
 0x236   :  { %v13355_v39 = vpop.f32.mrb[40].mxu0  ;;  %13679 = vmatprep.subr.bf16.mxu1 %v15040_v43 }
 0x237   :  { %v13356_v42 = vpop.f32.mrb[41].mxu0  ;;  %v13377_v44 = vpop.f32.mrb[40].mxu1 }
 0x238   :  { %v13357_v45 = vadd.f32 %v13356_v42, %v13355_v39  ;;  %v13358_v46 = vpop.f32.mrb[42].mxu0  ;;  %v13378_v47 = vpop.f32.mrb[41].mxu1  ;;  %13658 = vmatpush3.bf16.msra.mxu0 %v15041_v48  ;;  %v15075_v39 = vld [vmem:[%s19021_s1 + $0x12a8] sm:$0xff]  }
 0x239   :  { %v13359_v50 = vpop.f32.mrb[43].mxu0  ;;  %v13379_v52 = vadd.f32 %v13378_v47, %v13377_v44  ;;  %v13380_v53 = vpop.f32.mrb[42].mxu1  ;;  %13659 = vmatprep.subr.bf16.mxu0 %v15043_v54  ;;  %13680 = vmatpush3.bf16.msra.mxu1 %v15042_v49  ;;  %v15077_v47 = vld [vmem:[%s19021_s1 + $0x12f0] sm:$0xff]  }
 0x23a   :  { %v9933_v51 = vadd.f32 %v13357_v45, %v17306_v2  ;;  %v13381_v55 = vpop.f32.mrb[43].mxu1  ;;  %13681 = vmatprep.subr.bf16.mxu1 %v15044_v56  ;;  %v15052_v2 = vld [vmem:[%s19021_s1 + $0x1240] sm:$0xff]   ;;  %v15076_v45 = vld [vmem:[%s19021_s1 + $0x1270] sm:$0xff]   ;;  %v15082_v53 = vld [vmem:[%s19021_s1 + $0x1238] sm:$0xff]  }
 0x23b   :  { %v15078_v49 = vld [vmem:[%s19021_s1 + $0x1230] sm:$0xff]  }
 0x23c   :  { %v17410_v57 = vadd.f32 %v13379_v52, %v9933_v51  ;;  %13660 = vmatpush3.bf16.msra.mxu0 %v15045_v58  ;;  %v15079_v50 = vld [vmem:[%s19021_s1 + $0x12b0] sm:$0xff]   ;;  %v15080_v51 = vld [vmem:[%s19021_s1 + $0x1278] sm:$0xff]  }
 0x23d   :  { %13661 = vmatprep.subr.bf16.mxu0 %v15047_v59  ;;  %13682 = vmatpush3.bf16.msra.mxu1 %v15046_v60  ;;  %v15081_v52 = vld [vmem:[%s19021_s1 + $0x12f8] sm:$0xff]   ;;  %v60_v54 = vld [vmem:[%s19020_s0 + $0x90] sm:$0xff] }
 0x23e   :  { %13683 = vmatprep.subr.bf16.mxu1 %v15048_v61  ;;  %v419_v55 = vrot.slane %v60_v54, %v15688_v41  ;;  %v412_v56 = vcombine.high %v60_v54, %v60_v54  ;;  %v15083_v58 = vld [vmem:[%s19021_s1 + $0x12b8] sm:$0xff]   ;;  %v15086_v61 = vld [vmem:[%s19021_s1 + $0x13c0] sm:$0xff]  }
 0x23f   :  { %v15120_v54 = vld [vmem:[%s19021_s1 + $0x1400] sm:$0xff]  }
 0x240   :  { %13662 = vmatpush3.bf16.msra.mxu0 %v15049_v62  ;;  %v427_v59 = vcombine.high %v419_v55, %v419_v55  ;;  %v426_v60 = vrot.slane %v412_v56, %v15688_v41  ;;  %v850_v62 = vpack.c.bf16 %v419_v55, %v419_v55 }
 0x241   :  { %13691 = vmatprep.subr.bf16.mxu0 %v15052_v2  ;;  %13684 = vmatpush3.bf16.msra.mxu1 %v15050_v3  ;;  %v15089_v3 = vld [vmem:[%s19021_s1 + $0x1348] sm:$0xff]  }
 0x242   :  { %13713 = vmatprep.subr.bf16.mxu1 %v15053_v6  ;;  %v851_v63 = vpack.c.bf16 %v427_v59, %v427_v59  ;;  %v428_v0 = vcombine.high %v426_v60, %v426_v60  ;;  %v852_v2 = vpack.c.bf16 %v426_v60, %v426_v60  ;;  %v15090_v6 = vld [vmem:[%s19021_s1 + $0x13c8] sm:$0xff]  }
 0x243   :  { %10491 = vmatmul.mubr.bf16.vlgmr.msra.gmra.mrb[68].mxu0 %v846_v7  ;;  %v15091_v7 = vld [vmem:[%s19021_s1 + $0x1308] sm:$0xff]  }
 0x244   :  { %13692 = vmatpush3.bf16.msra.mxu0 %v15054_v10  ;;  %10531 = vmatmul.mubr.bf16.vlgmr.msra.gmra.mrb[68].mxu1 %v848_v11  ;;  %v853_v4 = vpack.c.bf16 %v428_v0, %v428_v0  ;;  %v15094_v10 = vld [vmem:[%s19021_s1 + $0x13d0] sm:$0xff]   ;;  %v15122_v59 = vld [vmem:[%s19021_s1 + $0x1448] sm:$0xff]  }
 0x245   :  { %13693 = vmatprep.subr.bf16.mxu0 %v15056_v12  ;;  %13714 = vmatpush3.bf16.msra.mxu1 %v15055_v14  ;;  %v15095_v11 = vld [vmem:[%s19021_s1 + $0x1310] sm:$0xff]   ;;  %v15097_v12 = vld [vmem:[%s19021_s1 + $0x1358] sm:$0xff]  }
 0x246   :  { %13715 = vmatprep.subr.bf16.mxu1 %v15057_v15  ;;  %10570 = vmatprep.mubr.bf16.mxu0 %v851_v63  ;;  %v15098_v14 = vld [vmem:[%s19021_s1 + $0x13d8] sm:$0xff]   ;;  %v15125_v63 = vld [vmem:[%s19021_s1 + $0x1488] sm:$0xff]   ;;  %v15126_v0 = vld [vmem:[%s19021_s1 + $0x1450] sm:$0xff]  }
 0x247   :  { %10610 = vmatprep.mubr.bf16.mxu1 %v853_v4  ;;  %v15099_v15 = vld [vmem:[%s19021_s1 + $0x1318] sm:$0xff]  }
 0x248   :  { %13694 = vmatpush3.bf16.msra.mxu0 %v15058_v16  ;;  %v15101_v16 = vld [vmem:[%s19021_s1 + $0x1360] sm:$0xff]   ;;  %v15130_v4 = vld [vmem:[%s19021_s1 + $0x1458] sm:$0xff]  }
 0x249   :  { %13695 = vmatprep.subr.bf16.mxu0 %v15060_v17  ;;  %13716 = vmatpush3.bf16.msra.mxu1 %v15059_v18  ;;  %v15100_v17 = vld [vmem:[%s19021_s1 + $0x1398] sm:$0xff]   ;;  %v15102_v18 = vld [vmem:[%s19021_s1 + $0x13e0] sm:$0xff]  }
 0x24a   :  { %13717 = vmatprep.subr.bf16.mxu1 %v15061_v19  ;;  %v15103_v19 = vld [vmem:[%s19021_s1 + $0x1320] sm:$0xff]  }
 0x24c   :  { %13696 = vmatpush3.bf16.msra.mxu0 %v15062_v20 }
 0x24d   :  { %13697 = vmatprep.subr.bf16.mxu0 %v15064_v21  ;;  %13718 = vmatpush3.bf16.msra.mxu1 %v15063_v22  ;;  %v15105_v21 = vld [vmem:[%s19021_s1 + $0x1368] sm:$0xff]   ;;  %v15104_v22 = vld [vmem:[%s19021_s1 + $0x13a0] sm:$0xff]  }
 0x24e   :  { %13719 = vmatprep.subr.bf16.mxu1 %v15065_v23 }
 0x250   :  { %13698 = vmatpush3.bf16.msra.mxu0 %v15066_v24 }
 0x251   :  { %13699 = vmatprep.subr.bf16.mxu0 %v15068_v25  ;;  %13720 = vmatpush3.bf16.msra.mxu1 %v15067_v26  ;;  %v15106_v26 = vld [vmem:[%s19021_s1 + $0x13e8] sm:$0xff]  }
 0x252   :  { %13721 = vmatprep.subr.bf16.mxu1 %v15069_v27 }
 0x254   :  { %13700 = vmatpush3.bf16.msra.mxu0 %v15070_v28  ;;  %v15107_v28 = vld [vmem:[%s19021_s1 + $0x1328] sm:$0xff]  }
 0x255   :  { %13701 = vmatprep.subr.bf16.mxu0 %v15072_v30  ;;  %13722 = vmatpush3.bf16.msra.mxu1 %v15071_v31  ;;  %v15108_v30 = vld [vmem:[%s19021_s1 + $0x13a8] sm:$0xff]  }
 0x256   :  { %v13399_v29 = vpop.f32.mrb[44].mxu0  ;;  %13723 = vmatprep.subr.bf16.mxu1 %v15073_v35  ;;  %v15109_v35 = vld [vmem:[%s19021_s1 + $0x1370] sm:$0xff]  }
 0x257   :  { %v13400_v32 = vpop.f32.mrb[45].mxu0  ;;  %v13421_v33 = vpop.f32.mrb[44].mxu1 }
 0x258   :  { %v13401_v34 = vadd.f32 %v13400_v32, %v13399_v29  ;;  %v13402_v36 = vpop.f32.mrb[46].mxu0  ;;  %v13422_v38 = vpop.f32.mrb[45].mxu1  ;;  %13702 = vmatpush3.bf16.msra.mxu0 %v15074_v37  ;;  %v15110_v37 = vld [vmem:[%s19021_s1 + $0x13f0] sm:$0xff]  }
 0x259   :  { %v13403_v40 = vpop.f32.mrb[47].mxu0  ;;  %v13423_v43 = vadd.f32 %v13422_v38, %v13421_v33  ;;  %v13424_v44 = vpop.f32.mrb[46].mxu1  ;;  %13703 = vmatprep.subr.bf16.mxu0 %v15076_v45  ;;  %13724 = vmatpush3.bf16.msra.mxu1 %v15075_v39  ;;  %v15111_v39 = vld [vmem:[%s19021_s1 + $0x1330] sm:$0xff]   ;;  %v61_v45 = vld [vmem:[%s19020_s0 + $0x98] sm:$0xff] }
 0x25a   :  { %v10013_v42 = vadd.f32 %v13401_v34, %v17410_v57  ;;  %v13425_v46 = vpop.f32.mrb[47].mxu1  ;;  %13725 = vmatprep.subr.bf16.mxu1 %v15077_v47  ;;  %v15085_v57 = vld [vmem:[%s19021_s1 + $0x1340] sm:$0xff]   ;;  %v15112_v40 = vld [vmem:[%s19021_s1 + $0x13b0] sm:$0xff]   ;;  %v15115_v44 = vld [vmem:[%s19021_s1 + $0x1338] sm:$0xff]   ;;  %v436_v47 = vrot.slane %v61_v45, %v15688_v41 }
 0x25b   :  { %v15116_v46 = vld [vmem:[%s19021_s1 + $0x13b8] sm:$0xff]  }
 0x25c   :  { %v17514_v48 = vadd.f32 %v13423_v43, %v10013_v42  ;;  %13704 = vmatpush3.bf16.msra.mxu0 %v15078_v49  ;;  %v15113_v42 = vld [vmem:[%s19021_s1 + $0x1378] sm:$0xff]   ;;  %v15118_v49 = vld [vmem:[%s19021_s1 + $0x1440] sm:$0xff]  }
 0x25d   :  { %13705 = vmatprep.subr.bf16.mxu0 %v15080_v51  ;;  %13726 = vmatpush3.bf16.msra.mxu1 %v15079_v50  ;;  %v15114_v43 = vld [vmem:[%s19021_s1 + $0x13f8] sm:$0xff]   ;;  %v444_v50 = vcombine.high %v436_v47, %v436_v47 }
 0x25e   :  { %13727 = vmatprep.subr.bf16.mxu1 %v15081_v52  ;;  %v15119_v52 = vld [vmem:[%s19021_s1 + $0x14c0] sm:$0xff]  }
 0x25f   :  { %v855_v55 = vpack.c.bf16 %v444_v50, %v444_v50  ;;  %v15155_v50 = vld [vmem:[%s19021_s1 + $0x1548] sm:$0xff]  }
 0x260   :  { %13706 = vmatpush3.bf16.msra.mxu0 %v15082_v53  ;;  %v854_v53 = vpack.c.bf16 %v436_v47, %v436_v47 }
 0x261   :  { %13735 = vmatprep.subr.bf16.mxu0 %v15085_v57  ;;  %13728 = vmatpush3.bf16.msra.mxu1 %v15083_v58  ;;  %v15121_v57 = vld [vmem:[%s19021_s1 + $0x1480] sm:$0xff]  }
 0x262   :  { %13757 = vmatprep.subr.bf16.mxu1 %v15086_v61  ;;  %v15123_v61 = vld [vmem:[%s19021_s1 + $0x14c8] sm:$0xff]  }
 0x263   :  { %10571 = vmatmul.mubr.bf16.vlgmr.msra.gmra.mrb[72].mxu0 %v850_v62  ;;  %v15124_v62 = vld [vmem:[%s19021_s1 + $0x1408] sm:$0xff]  }
 0x264   :  { %13736 = vmatpush3.bf16.msra.mxu0 %v15087_v1  ;;  %10611 = vmatmul.mubr.bf16.vlgmr.msra.gmra.mrb[72].mxu1 %v852_v2  ;;  %v15127_v1 = vld [vmem:[%s19021_s1 + $0x14d0] sm:$0xff]  }
 0x265   :  { %13737 = vmatprep.subr.bf16.mxu0 %v15089_v3  ;;  %13758 = vmatpush3.bf16.msra.mxu1 %v15088_v5  ;;  %v15128_v2 = vld [vmem:[%s19021_s1 + $0x1410] sm:$0xff]   ;;  %v15131_v5 = vld [vmem:[%s19021_s1 + $0x14d8] sm:$0xff]  }
 0x266   :  { %13759 = vmatprep.subr.bf16.mxu1 %v15090_v6  ;;  %10650 = vmatprep.mubr.bf16.mxu0 %v855_v55  ;;  %v15129_v3 = vld [vmem:[%s19021_s1 + $0x1490] sm:$0xff]   ;;  %v15132_v6 = vld [vmem:[%s19021_s1 + $0x1418] sm:$0xff]  }
 0x267   :  { %v15159_v55 = vld [vmem:[%s19021_s1 + $0x1550] sm:$0xff]  }
 0x268   :  { %13738 = vmatpush3.bf16.msra.mxu0 %v15091_v7  ;;  %v15133_v7 = vld [vmem:[%s19021_s1 + $0x1498] sm:$0xff]  }
 0x269   :  { %13739 = vmatprep.subr.bf16.mxu0 %v15093_v8  ;;  %13760 = vmatpush3.bf16.msra.mxu1 %v15092_v9  ;;  %v15134_v8 = vld [vmem:[%s19021_s1 + $0x1460] sm:$0xff]  }
 0x26a   :  { %13761 = vmatprep.subr.bf16.mxu1 %v15094_v10  ;;  %v15135_v9 = vld [vmem:[%s19021_s1 + $0x14e0] sm:$0xff]  }
 0x26b   :  { %v15136_v10 = vld [vmem:[%s19021_s1 + $0x1420] sm:$0xff]  }
 0x26c   :  { %13740 = vmatpush3.bf16.msra.mxu0 %v15095_v11  ;;  %v15137_v11 = vld [vmem:[%s19021_s1 + $0x14a0] sm:$0xff]  }
 0x26d   :  { %13741 = vmatprep.subr.bf16.mxu0 %v15097_v12  ;;  %13762 = vmatpush3.bf16.msra.mxu1 %v15096_v13  ;;  %v15138_v12 = vld [vmem:[%s19021_s1 + $0x1468] sm:$0xff]  }
 0x26e   :  { %13763 = vmatprep.subr.bf16.mxu1 %v15098_v14  ;;  %v15139_v14 = vld [vmem:[%s19021_s1 + $0x14e8] sm:$0xff]  }
 0x270   :  { %13742 = vmatpush3.bf16.msra.mxu0 %v15099_v15 }
 0x271   :  { %13743 = vmatprep.subr.bf16.mxu0 %v15101_v16  ;;  %13764 = vmatpush3.bf16.msra.mxu1 %v15100_v17  ;;  %v15140_v16 = vld [vmem:[%s19021_s1 + $0x1428] sm:$0xff]  }
 0x272   :  { %13765 = vmatprep.subr.bf16.mxu1 %v15102_v18 }
 0x274   :  { %13744 = vmatpush3.bf16.msra.mxu0 %v15103_v19 }
 0x275   :  { %13745 = vmatprep.subr.bf16.mxu0 %v15105_v21  ;;  %13766 = vmatpush3.bf16.msra.mxu1 %v15104_v22  ;;  %v15141_v21 = vld [vmem:[%s19021_s1 + $0x14a8] sm:$0xff]  }
 0x276   :  { %v13443_v20 = vpop.f32.mrb[48].mxu0  ;;  %13767 = vmatprep.subr.bf16.mxu1 %v15106_v26 }
 0x277   :  { %v13444_v23 = vpop.f32.mrb[49].mxu0  ;;  %v13465_v24 = vpop.f32.mrb[48].mxu1 }
 0x278   :  { %v13445_v25 = vadd.f32 %v13444_v23, %v13443_v20  ;;  %v13446_v27 = vpop.f32.mrb[50].mxu0  ;;  %v13466_v29 = vpop.f32.mrb[49].mxu1  ;;  %13746 = vmatpush3.bf16.msra.mxu0 %v15107_v28  ;;  %v15142_v23 = vld [vmem:[%s19021_s1 + $0x1470] sm:$0xff]  }
 0x279   :  { %v13447_v31 = vpop.f32.mrb[51].mxu0  ;;  %v13467_v33 = vadd.f32 %v13466_v29, %v13465_v24  ;;  %v13468_v34 = vpop.f32.mrb[50].mxu1  ;;  %13747 = vmatprep.subr.bf16.mxu0 %v15109_v35  ;;  %13768 = vmatpush3.bf16.msra.mxu1 %v15108_v30  ;;  %v15143_v27 = vld [vmem:[%s19021_s1 + $0x14f0] sm:$0xff]   ;;  %v62_v35 = vld [vmem:[%s19020_s0 + $0xa0] sm:$0xff] }
 0x27a   :  { %v10093_v32 = vadd.f32 %v13445_v25, %v17514_v48  ;;  %v13469_v36 = vpop.f32.mrb[51].mxu1  ;;  %13769 = vmatprep.subr.bf16.mxu1 %v15110_v37  ;;  %v429_v48 = vcombine.high %v61_v45, %v61_v45  ;;  %v15144_v29 = vld [vmem:[%s19021_s1 + $0x1430] sm:$0xff]   ;;  %v15146_v31 = vld [vmem:[%s19021_s1 + $0x1478] sm:$0xff]   ;;  %v446_v37 = vcombine.high %v62_v35, %v62_v35  ;;  %v15153_v45 = vld [vmem:[%s19021_s1 + $0x1500] sm:$0xff]  }
 0x27b   :  { %v15148_v34 = vld [vmem:[%s19021_s1 + $0x1438] sm:$0xff]   ;;  %v453_v36 = vrot.slane %v62_v35, %v15688_v41  ;;  %v15186_v35 = vld [vmem:[%s19021_s1 + $0x1600] sm:$0xff]  }
 0x27c   :  { %v17618_v38 = vadd.f32 %v13467_v33, %v10093_v32  ;;  %13748 = vmatpush3.bf16.msra.mxu0 %v15111_v39  ;;  %v443_v51 = vrot.slane %v429_v48, %v15688_v41  ;;  %v15145_v32 = vld [vmem:[%s19021_s1 + $0x14b0] sm:$0xff]   ;;  %v15147_v33 = vld [vmem:[%s19021_s1 + $0x14f8] sm:$0xff]   ;;  %v15154_v48 = vld [vmem:[%s19021_s1 + $0x1580] sm:$0xff]  }
 0x27d   :  { %13749 = vmatprep.subr.bf16.mxu0 %v15113_v42  ;;  %13770 = vmatpush3.bf16.msra.mxu1 %v15112_v40  ;;  %v15149_v39 = vld [vmem:[%s19021_s1 + $0x14b8] sm:$0xff]   ;;  %v461_v40 = vcombine.high %v453_v36, %v453_v36  ;;  %v460_v42 = vrot.slane %v446_v37, %v15688_v41 }
 0x27e   :  { %13771 = vmatprep.subr.bf16.mxu1 %v15114_v43  ;;  %v445_v56 = vcombine.high %v443_v51, %v443_v51  ;;  %v856_v58 = vpack.c.bf16 %v443_v51, %v443_v51  ;;  %v15152_v43 = vld [vmem:[%s19021_s1 + $0x15c0] sm:$0xff]  }
 0x27f   :  { %v462_v47 = vcombine.high %v460_v42, %v460_v42 }
 0x280   :  { %13750 = vmatpush3.bf16.msra.mxu0 %v15115_v44  ;;  %v857_v60 = vpack.c.bf16 %v445_v56, %v445_v56  ;;  %v858_v44 = vpack.c.bf16 %v453_v36, %v453_v36  ;;  %v15160_v56 = vld [vmem:[%s19021_s1 + $0x15d0] sm:$0xff]  }
 0x281   :  { %13779 = vmatprep.subr.bf16.mxu0 %v15118_v49  ;;  %13772 = vmatpush3.bf16.msra.mxu1 %v15116_v46  ;;  %v859_v46 = vpack.c.bf16 %v461_v40, %v461_v40  ;;  %v860_v49 = vpack.c.bf16 %v460_v42, %v460_v42  ;;  %v861_v51 = vpack.c.bf16 %v462_v47, %v462_v47  ;;  %v15188_v40 = vld [vmem:[%s19021_s1 + $0x1648] sm:$0xff]   ;;  %v15193_v47 = vld [vmem:[%s19021_s1 + $0x16d0] sm:$0xff]  }
 0x282   :  { %13801 = vmatprep.subr.bf16.mxu1 %v15119_v52  ;;  %10690 = vmatprep.mubr.bf16.mxu1 %v857_v60  ;;  %v15156_v52 = vld [vmem:[%s19021_s1 + $0x15c8] sm:$0xff]   ;;  %v15164_v60 = vld [vmem:[%s19021_s1 + $0x15d8] sm:$0xff]  }
 0x283   :  { %10651 = vmatmul.mubr.bf16.vlgmr.msra.gmra.mrb[76].mxu0 %v854_v53  ;;  %v15157_v53 = vld [vmem:[%s19021_s1 + $0x1508] sm:$0xff]  }
 0x284   :  { %13780 = vmatpush3.bf16.msra.mxu0 %v15120_v54  ;;  %10691 = vmatmul.mubr.bf16.vlgmr.msra.gmra.mrb[76].mxu1 %v856_v58  ;;  %v15158_v54 = vld [vmem:[%s19021_s1 + $0x1588] sm:$0xff]   ;;  %v15162_v58 = vld [vmem:[%s19021_s1 + $0x1590] sm:$0xff]  }
 0x285   :  { %13781 = vmatprep.subr.bf16.mxu0 %v15122_v59  ;;  %13802 = vmatpush3.bf16.msra.mxu1 %v15121_v57  ;;  %v15161_v57 = vld [vmem:[%s19021_s1 + $0x1510] sm:$0xff]   ;;  %v15163_v59 = vld [vmem:[%s19021_s1 + $0x1558] sm:$0xff]  }
 0x286   :  { %13803 = vmatprep.subr.bf16.mxu1 %v15123_v61  ;;  %10730 = vmatprep.mubr.bf16.mxu0 %v859_v46  ;;  %v15165_v61 = vld [vmem:[%s19021_s1 + $0x1518] sm:$0xff]   ;;  %v15192_v46 = vld [vmem:[%s19021_s1 + $0x1650] sm:$0xff]  }
 0x287   :  { %10770 = vmatprep.mubr.bf16.mxu1 %v861_v51  ;;  %v15197_v51 = vld [vmem:[%s19021_s1 + $0x16d8] sm:$0xff]  }
 0x288   :  { %13782 = vmatpush3.bf16.msra.mxu0 %v15124_v62  ;;  %v15166_v62 = vld [vmem:[%s19021_s1 + $0x1598] sm:$0xff]  }
 0x289   :  { %13783 = vmatprep.subr.bf16.mxu0 %v15126_v0  ;;  %13804 = vmatpush3.bf16.msra.mxu1 %v15125_v63  ;;  %v15167_v63 = vld [vmem:[%s19021_s1 + $0x1560] sm:$0xff]  }
 0x28a   :  { %13805 = vmatprep.subr.bf16.mxu1 %v15127_v1  ;;  %v15168_v0 = vld [vmem:[%s19021_s1 + $0x15e0] sm:$0xff]  }
 0x28b   :  { %v15169_v1 = vld [vmem:[%s19021_s1 + $0x1520] sm:$0xff]  }
 0x28c   :  { %13784 = vmatpush3.bf16.msra.mxu0 %v15128_v2  ;;  %v15170_v2 = vld [vmem:[%s19021_s1 + $0x15a0] sm:$0xff]  }
 0x28d   :  { %13785 = vmatprep.subr.bf16.mxu0 %v15130_v4  ;;  %13806 = vmatpush3.bf16.msra.mxu1 %v15129_v3  ;;  %v15171_v3 = vld [vmem:[%s19021_s1 + $0x1568] sm:$0xff]  }
 0x28e   :  { %13807 = vmatprep.subr.bf16.mxu1 %v15131_v5  ;;  %v15172_v5 = vld [vmem:[%s19021_s1 + $0x15e8] sm:$0xff]  }
 0x290   :  { %13786 = vmatpush3.bf16.msra.mxu0 %v15132_v6 }
 0x291   :  { %13787 = vmatprep.subr.bf16.mxu0 %v15134_v8  ;;  %13808 = vmatpush3.bf16.msra.mxu1 %v15133_v7  ;;  %v15173_v7 = vld [vmem:[%s19021_s1 + $0x1528] sm:$0xff]  }
 0x292   :  { %13809 = vmatprep.subr.bf16.mxu1 %v15135_v9 }
 0x294   :  { %13788 = vmatpush3.bf16.msra.mxu0 %v15136_v10 }
 0x295   :  { %13789 = vmatprep.subr.bf16.mxu0 %v15138_v12  ;;  %13810 = vmatpush3.bf16.msra.mxu1 %v15137_v11  ;;  %v15174_v11 = vld [vmem:[%s19021_s1 + $0x15a8] sm:$0xff]   ;;  %v15175_v12 = vld [vmem:[%s19021_s1 + $0x1570] sm:$0xff]  }
 0x296   :  { %v13487_v13 = vpop.f32.mrb[52].mxu0  ;;  %13811 = vmatprep.subr.bf16.mxu1 %v15139_v14 }
 0x297   :  { %v13488_v15 = vpop.f32.mrb[53].mxu0  ;;  %v13509_v17 = vpop.f32.mrb[52].mxu1 }
 0x298   :  { %v13489_v18 = vadd.f32 %v13488_v15, %v13487_v13  ;;  %v13490_v19 = vpop.f32.mrb[54].mxu0  ;;  %v13510_v20 = vpop.f32.mrb[53].mxu1  ;;  %13790 = vmatpush3.bf16.msra.mxu0 %v15140_v16 }
 0x299   :  { %v13491_v22 = vpop.f32.mrb[55].mxu0  ;;  %v13511_v25 = vadd.f32 %v13510_v20, %v13509_v17  ;;  %v13512_v26 = vpop.f32.mrb[54].mxu1  ;;  %13791 = vmatprep.subr.bf16.mxu0 %v15142_v23  ;;  %13812 = vmatpush3.bf16.msra.mxu1 %v15141_v21  ;;  %v15177_v20 = vld [vmem:[%s19021_s1 + $0x1530] sm:$0xff]   ;;  %v15179_v23 = vld [vmem:[%s19021_s1 + $0x1578] sm:$0xff]  }
 0x29a   :  { %v10173_v24 = vadd.f32 %v13489_v18, %v17618_v38  ;;  %v13513_v28 = vpop.f32.mrb[55].mxu1  ;;  %13813 = vmatprep.subr.bf16.mxu1 %v15143_v27  ;;  %v15151_v38 = vld [vmem:[%s19021_s1 + $0x1540] sm:$0xff]   ;;  %v15176_v18 = vld [vmem:[%s19021_s1 + $0x15f0] sm:$0xff]   ;;  %v63_v26 = vld [vmem:[%s19020_s0 + $0xa8] sm:$0xff] }
 0x29b   :  { %v15178_v22 = vld [vmem:[%s19021_s1 + $0x15b0] sm:$0xff]   ;;  %v470_v27 = vrot.slane %v63_v26, %v15688_v41  ;;  %v463_v28 = vcombine.high %v63_v26, %v63_v26  ;;  %v15219_v26 = vld [vmem:[%s19021_s1 + $0x1700] sm:$0xff]  }
 0x29c   :  { %v17725_v30 = vadd.f32 %v13511_v25, %v10173_v24  ;;  %13792 = vmatpush3.bf16.msra.mxu0 %v15144_v29  ;;  %v15180_v24 = vld [vmem:[%s19021_s1 + $0x15f8] sm:$0xff]   ;;  %v15184_v29 = vld [vmem:[%s19021_s1 + $0x1640] sm:$0xff]  }
 0x29d   :  { %13793 = vmatprep.subr.bf16.mxu0 %v15146_v31  ;;  %13814 = vmatpush3.bf16.msra.mxu1 %v15145_v32  ;;  %v15181_v25 = vld [vmem:[%s19021_s1 + $0x1538] sm:$0xff]   ;;  %v478_v31 = vcombine.high %v470_v27, %v470_v27  ;;  %v477_v32 = vrot.slane %v463_v28, %v15688_v41 }
 0x29e   :  { %13815 = vmatprep.subr.bf16.mxu1 %v15147_v33  ;;  %v15185_v33 = vld [vmem:[%s19021_s1 + $0x16c0] sm:$0xff]  }
 0x29f   :  { %v863_v36 = vpack.c.bf16 %v478_v31, %v478_v31  ;;  %v479_v37 = vcombine.high %v477_v32, %v477_v32  ;;  %v15221_v31 = vld [vmem:[%s19021_s1 + $0x1748] sm:$0xff]  }
 0x2a0   :  { %13794 = vmatpush3.bf16.msra.mxu0 %v15148_v34  ;;  %v862_v34 = vpack.c.bf16 %v470_v27, %v470_v27 }
 0x2a1   :  { %13823 = vmatprep.subr.bf16.mxu0 %v15151_v38  ;;  %13816 = vmatpush3.bf16.msra.mxu1 %v15149_v39  ;;  %v15187_v38 = vld [vmem:[%s19021_s1 + $0x1680] sm:$0xff]   ;;  %v864_v39 = vpack.c.bf16 %v477_v32, %v477_v32  ;;  %v865_v42 = vpack.c.bf16 %v479_v37, %v479_v37  ;;  %v15226_v37 = vld [vmem:[%s19021_s1 + $0x17d0] sm:$0xff]  }
 0x2a2   :  { %13845 = vmatprep.subr.bf16.mxu1 %v15152_v43  ;;  %v15189_v43 = vld [vmem:[%s19021_s1 + $0x16c8] sm:$0xff]  }
 0x2a3   :  { %10731 = vmatmul.mubr.bf16.vlgmr.msra.gmra.mrb[80].mxu0 %v858_v44  ;;  %v15190_v44 = vld [vmem:[%s19021_s1 + $0x1608] sm:$0xff]  }
 0x2a4   :  { %13824 = vmatpush3.bf16.msra.mxu0 %v15153_v45  ;;  %10771 = vmatmul.mubr.bf16.vlgmr.msra.gmra.mrb[80].mxu1 %v860_v49  ;;  %v15191_v45 = vld [vmem:[%s19021_s1 + $0x1688] sm:$0xff]   ;;  %v15195_v49 = vld [vmem:[%s19021_s1 + $0x1690] sm:$0xff]  }
 0x2a5   :  { %13825 = vmatprep.subr.bf16.mxu0 %v15155_v50  ;;  %13846 = vmatpush3.bf16.msra.mxu1 %v15154_v48  ;;  %v15194_v48 = vld [vmem:[%s19021_s1 + $0x1610] sm:$0xff]   ;;  %v15196_v50 = vld [vmem:[%s19021_s1 + $0x1658] sm:$0xff]  }
 0x2a6   :  { %13847 = vmatprep.subr.bf16.mxu1 %v15156_v52  ;;  %10810 = vmatprep.mubr.bf16.mxu0 %v863_v36  ;;  %v15198_v52 = vld [vmem:[%s19021_s1 + $0x1618] sm:$0xff]   ;;  %v15225_v36 = vld [vmem:[%s19021_s1 + $0x1750] sm:$0xff]  }
 0x2a7   :  { %10850 = vmatprep.mubr.bf16.mxu1 %v865_v42  ;;  %v15230_v42 = vld [vmem:[%s19021_s1 + $0x17d8] sm:$0xff]  }
 0x2a8   :  { %13826 = vmatpush3.bf16.msra.mxu0 %v15157_v53  ;;  %v15199_v53 = vld [vmem:[%s19021_s1 + $0x1698] sm:$0xff]  }
 0x2a9   :  { %13827 = vmatprep.subr.bf16.mxu0 %v15159_v55  ;;  %13848 = vmatpush3.bf16.msra.mxu1 %v15158_v54  ;;  %v15200_v54 = vld [vmem:[%s19021_s1 + $0x1660] sm:$0xff]  }
 0x2aa   :  { %13849 = vmatprep.subr.bf16.mxu1 %v15160_v56  ;;  %v15201_v55 = vld [vmem:[%s19021_s1 + $0x16e0] sm:$0xff]  }
 0x2ab   :  { %v15202_v56 = vld [vmem:[%s19021_s1 + $0x1620] sm:$0xff]  }
 0x2ac   :  { %13828 = vmatpush3.bf16.msra.mxu0 %v15161_v57  ;;  %v15203_v57 = vld [vmem:[%s19021_s1 + $0x16a0] sm:$0xff]  }
 0x2ad   :  { %13829 = vmatprep.subr.bf16.mxu0 %v15163_v59  ;;  %13850 = vmatpush3.bf16.msra.mxu1 %v15162_v58  ;;  %v15204_v58 = vld [vmem:[%s19021_s1 + $0x1668] sm:$0xff]  }
 0x2ae   :  { %13851 = vmatprep.subr.bf16.mxu1 %v15164_v60  ;;  %v15205_v60 = vld [vmem:[%s19021_s1 + $0x16e8] sm:$0xff]  }
 0x2b0   :  { %13830 = vmatpush3.bf16.msra.mxu0 %v15165_v61 }
 0x2b1   :  { %13831 = vmatprep.subr.bf16.mxu0 %v15167_v63  ;;  %13852 = vmatpush3.bf16.msra.mxu1 %v15166_v62  ;;  %v15206_v62 = vld [vmem:[%s19021_s1 + $0x1628] sm:$0xff]  }
 0x2b2   :  { %13853 = vmatprep.subr.bf16.mxu1 %v15168_v0 }
 0x2b4   :  { %13832 = vmatpush3.bf16.msra.mxu0 %v15169_v1 }
 0x2b5   :  { %13833 = vmatprep.subr.bf16.mxu0 %v15171_v3  ;;  %13854 = vmatpush3.bf16.msra.mxu1 %v15170_v2  ;;  %v15207_v2 = vld [vmem:[%s19021_s1 + $0x16a8] sm:$0xff]   ;;  %v15208_v3 = vld [vmem:[%s19021_s1 + $0x1670] sm:$0xff]  }
 0x2b6   :  { %v13531_v4 = vpop.f32.mrb[56].mxu0  ;;  %13855 = vmatprep.subr.bf16.mxu1 %v15172_v5 }
 0x2b7   :  { %v13532_v6 = vpop.f32.mrb[57].mxu0  ;;  %v13553_v8 = vpop.f32.mrb[56].mxu1 }
 0x2b8   :  { %v13533_v9 = vadd.f32 %v13532_v6, %v13531_v4  ;;  %v13534_v10 = vpop.f32.mrb[58].mxu0  ;;  %v13554_v13 = vpop.f32.mrb[57].mxu1  ;;  %13834 = vmatpush3.bf16.msra.mxu0 %v15173_v7 }
 0x2b9   :  { %v13535_v14 = vpop.f32.mrb[59].mxu0  ;;  %v13555_v16 = vadd.f32 %v13554_v13, %v13553_v8  ;;  %v13556_v17 = vpop.f32.mrb[58].mxu1  ;;  %13835 = vmatprep.subr.bf16.mxu0 %v15175_v12  ;;  %13856 = vmatpush3.bf16.msra.mxu1 %v15174_v11  ;;  %v15210_v11 = vld [vmem:[%s19021_s1 + $0x1630] sm:$0xff]  }
 0x2ba   :  { %v10253_v15 = vadd.f32 %v13533_v9, %v17725_v30  ;;  %v13557_v19 = vpop.f32.mrb[59].mxu1  ;;  %13857 = vmatprep.subr.bf16.mxu1 %v15176_v18  ;;  %v15182_v30 = vld [vmem:[%s19021_s1 + $0x15b8] sm:$0xff]   ;;  %v15209_v9 = vld [vmem:[%s19021_s1 + $0x16f0] sm:$0xff]  }
 0x2bb   :  { %v15211_v13 = vld [vmem:[%s19021_s1 + $0x16b0] sm:$0xff]   ;;  %v15212_v14 = vld [vmem:[%s19021_s1 + $0x1678] sm:$0xff]  }
 0x2bc   :  { %v17829_v21 = vadd.f32 %v13555_v16, %v10253_v15  ;;  %13836 = vmatpush3.bf16.msra.mxu0 %v15177_v20  ;;  %v15213_v15 = vld [vmem:[%s19021_s1 + $0x16f8] sm:$0xff]   ;;  %v64_v17 = vld [vmem:[%s19020_s0 + $0xb0] sm:$0xff] }
 0x2bd   :  { %13837 = vmatprep.subr.bf16.mxu0 %v15179_v23  ;;  %13858 = vmatpush3.bf16.msra.mxu1 %v15178_v22  ;;  %v15214_v16 = vld [vmem:[%s19021_s1 + $0x1638] sm:$0xff]   ;;  %v487_v19 = vrot.slane %v64_v17, %v15688_v41  ;;  %v480_v20 = vcombine.high %v64_v17, %v64_v17  ;;  %v15252_v17 = vld [vmem:[%s19021_s1 + $0x1800] sm:$0xff]  }
 0x2be   :  { %13859 = vmatprep.subr.bf16.mxu1 %v15180_v24  ;;  %v15215_v18 = vld [vmem:[%s19021_s1 + $0x16b8] sm:$0xff]   ;;  %v15218_v24 = vld [vmem:[%s19021_s1 + $0x17c0] sm:$0xff]  }
 0x2bf   :  { %v495_v22 = vcombine.high %v487_v19, %v487_v19  ;;  %v494_v23 = vrot.slane %v480_v20, %v15688_v41  ;;  %v15253_v20 = vld [vmem:[%s19021_s1 + $0x1880] sm:$0xff]  }
 0x2c0   :  { %13838 = vmatpush3.bf16.msra.mxu0 %v15181_v25  ;;  %v866_v25 = vpack.c.bf16 %v487_v19, %v487_v19 }
 0x2c1   :  { %13867 = vmatprep.subr.bf16.mxu0 %v15184_v29  ;;  %13860 = vmatpush3.bf16.msra.mxu1 %v15182_v30  ;;  %v867_v27 = vpack.c.bf16 %v495_v22, %v495_v22  ;;  %v496_v28 = vcombine.high %v494_v23, %v494_v23  ;;  %v15220_v29 = vld [vmem:[%s19021_s1 + $0x1780] sm:$0xff]   ;;  %v868_v30 = vpack.c.bf16 %v494_v23, %v494_v23  ;;  %v15254_v22 = vld [vmem:[%s19021_s1 + $0x1848] sm:$0xff]  }
 0x2c2   :  { %13889 = vmatprep.subr.bf16.mxu1 %v15185_v33  ;;  %v15222_v33 = vld [vmem:[%s19021_s1 + $0x17c8] sm:$0xff]  }
 0x2c3   :  { %10811 = vmatmul.mubr.bf16.vlgmr.msra.gmra.mrb[84].mxu0 %v862_v34  ;;  %v869_v32 = vpack.c.bf16 %v496_v28, %v496_v28  ;;  %v15223_v34 = vld [vmem:[%s19021_s1 + $0x1708] sm:$0xff]   ;;  %v15259_v28 = vld [vmem:[%s19021_s1 + $0x18d0] sm:$0xff]  }
 0x2c4   :  { %13868 = vmatpush3.bf16.msra.mxu0 %v15186_v35  ;;  %10851 = vmatmul.mubr.bf16.vlgmr.msra.gmra.mrb[84].mxu1 %v864_v39  ;;  %v15224_v35 = vld [vmem:[%s19021_s1 + $0x1788] sm:$0xff]   ;;  %v15228_v39 = vld [vmem:[%s19021_s1 + $0x1790] sm:$0xff]  }
 0x2c5   :  { %13869 = vmatprep.subr.bf16.mxu0 %v15188_v40  ;;  %13890 = vmatpush3.bf16.msra.mxu1 %v15187_v38  ;;  %v15227_v38 = vld [vmem:[%s19021_s1 + $0x1710] sm:$0xff]   ;;  %v15229_v40 = vld [vmem:[%s19021_s1 + $0x1758] sm:$0xff]  }
 0x2c6   :  { %13891 = vmatprep.subr.bf16.mxu1 %v15189_v43  ;;  %10890 = vmatprep.mubr.bf16.mxu0 %v867_v27  ;;  %v15231_v43 = vld [vmem:[%s19021_s1 + $0x1718] sm:$0xff]   ;;  %v15258_v27 = vld [vmem:[%s19021_s1 + $0x1850] sm:$0xff]  }
 0x2c7   :  { %10930 = vmatprep.mubr.bf16.mxu1 %v869_v32  ;;  %v15263_v32 = vld [vmem:[%s19021_s1 + $0x18d8] sm:$0xff]  }
 0x2c8   :  { %13870 = vmatpush3.bf16.msra.mxu0 %v15190_v44  ;;  %v15232_v44 = vld [vmem:[%s19021_s1 + $0x1798] sm:$0xff]  }
 0x2c9   :  { %13871 = vmatprep.subr.bf16.mxu0 %v15192_v46  ;;  %13892 = vmatpush3.bf16.msra.mxu1 %v15191_v45  ;;  %v15233_v45 = vld [vmem:[%s19021_s1 + $0x1760] sm:$0xff]  }
 0x2ca   :  { %13893 = vmatprep.subr.bf16.mxu1 %v15193_v47  ;;  %v15234_v46 = vld [vmem:[%s19021_s1 + $0x17e0] sm:$0xff]  }
 0x2cb   :  { %v15235_v47 = vld [vmem:[%s19021_s1 + $0x1720] sm:$0xff]  }
 0x2cc   :  { %13872 = vmatpush3.bf16.msra.mxu0 %v15194_v48  ;;  %v15236_v48 = vld [vmem:[%s19021_s1 + $0x17a0] sm:$0xff]  }
 0x2cd   :  { %13873 = vmatprep.subr.bf16.mxu0 %v15196_v50  ;;  %13894 = vmatpush3.bf16.msra.mxu1 %v15195_v49  ;;  %v15237_v49 = vld [vmem:[%s19021_s1 + $0x1768] sm:$0xff]  }
 0x2ce   :  { %13895 = vmatprep.subr.bf16.mxu1 %v15197_v51  ;;  %v15238_v51 = vld [vmem:[%s19021_s1 + $0x17e8] sm:$0xff]  }
 0x2d0   :  { %13874 = vmatpush3.bf16.msra.mxu0 %v15198_v52 }
 0x2d1   :  { %13875 = vmatprep.subr.bf16.mxu0 %v15200_v54  ;;  %13896 = vmatpush3.bf16.msra.mxu1 %v15199_v53  ;;  %v15239_v53 = vld [vmem:[%s19021_s1 + $0x1728] sm:$0xff]  }
 0x2d2   :  { %13897 = vmatprep.subr.bf16.mxu1 %v15201_v55 }
 0x2d4   :  { %13876 = vmatpush3.bf16.msra.mxu0 %v15202_v56 }
 0x2d5   :  { %13877 = vmatprep.subr.bf16.mxu0 %v15204_v58  ;;  %13898 = vmatpush3.bf16.msra.mxu1 %v15203_v57  ;;  %v15240_v58 = vld [vmem:[%s19021_s1 + $0x17a8] sm:$0xff]  }
 0x2d6   :  { %v13575_v59 = vpop.f32.mrb[60].mxu0  ;;  %13899 = vmatprep.subr.bf16.mxu1 %v15205_v60  ;;  %v15241_v60 = vld [vmem:[%s19021_s1 + $0x1770] sm:$0xff]  }
 0x2d7   :  { %v13576_v61 = vpop.f32.mrb[61].mxu0  ;;  %v13597_v63 = vpop.f32.mrb[60].mxu1 }
 0x2d8   :  { %v13577_v0 = vadd.f32 %v13576_v61, %v13575_v59  ;;  %v13578_v1 = vpop.f32.mrb[62].mxu0  ;;  %v13598_v4 = vpop.f32.mrb[61].mxu1  ;;  %13878 = vmatpush3.bf16.msra.mxu0 %v15206_v62 }
 0x2d9   :  { %v13579_v5 = vpop.f32.mrb[63].mxu0  ;;  %v13599_v7 = vadd.f32 %v13598_v4, %v13597_v63  ;;  %v13600_v8 = vpop.f32.mrb[62].mxu1  ;;  %13879 = vmatprep.subr.bf16.mxu0 %v15208_v3  ;;  %13900 = vmatpush3.bf16.msra.mxu1 %v15207_v2  ;;  %v15243_v2 = vld [vmem:[%s19021_s1 + $0x1730] sm:$0xff]   ;;  %v15245_v4 = vld [vmem:[%s19021_s1 + $0x1778] sm:$0xff]  }
 0x2da   :  { %v10333_v6 = vadd.f32 %v13577_v0, %v17829_v21  ;;  %v13601_v10 = vpop.f32.mrb[63].mxu1  ;;  %13901 = vmatprep.subr.bf16.mxu1 %v15209_v9  ;;  %v15217_v21 = vld [vmem:[%s19021_s1 + $0x1740] sm:$0xff]   ;;  %v15242_v0 = vld [vmem:[%s19021_s1 + $0x17f0] sm:$0xff]   ;;  %v65_v8 = vld [vmem:[%s19020_s0 + $0xb8] sm:$0xff] }
 0x2db   :  { %v15244_v5 = vld [vmem:[%s19021_s1 + $0x17b0] sm:$0xff]   ;;  %v504_v9 = vrot.slane %v65_v8, %v15688_v41  ;;  %v497_v10 = vcombine.high %v65_v8, %v65_v8  ;;  %v15285_v8 = vld [vmem:[%s19021_s1 + $0x1900] sm:$0xff]  }
 0x2dc   :  { %v17933_v12 = vadd.f32 %v13599_v7, %v10333_v6  ;;  %13880 = vmatpush3.bf16.msra.mxu0 %v15210_v11  ;;  %v15246_v6 = vld [vmem:[%s19021_s1 + $0x17f8] sm:$0xff]   ;;  %v15250_v11 = vld [vmem:[%s19021_s1 + $0x1840] sm:$0xff]  }
 0x2dd   :  { %13881 = vmatprep.subr.bf16.mxu0 %v15212_v14  ;;  %13902 = vmatpush3.bf16.msra.mxu1 %v15211_v13  ;;  %v15247_v7 = vld [vmem:[%s19021_s1 + $0x1738] sm:$0xff]   ;;  %v512_v13 = vcombine.high %v504_v9, %v504_v9  ;;  %v511_v14 = vrot.slane %v497_v10, %v15688_v41 }
 0x2de   :  { %13903 = vmatprep.subr.bf16.mxu1 %v15213_v15  ;;  %v15251_v15 = vld [vmem:[%s19021_s1 + $0x18c0] sm:$0xff]  }
 0x2df   :  { %v513_v19 = vcombine.high %v511_v14, %v511_v14 }
 0x2e0   :  { %13882 = vmatpush3.bf16.msra.mxu0 %v15214_v16  ;;  %v870_v16 = vpack.c.bf16 %v504_v9, %v504_v9 }
 0x2e1   :  { %13911 = vmatprep.subr.bf16.mxu0 %v15217_v21  ;;  %13904 = vmatpush3.bf16.msra.mxu1 %v15215_v18  ;;  %v871_v18 = vpack.c.bf16 %v512_v13, %v512_v13  ;;  %v872_v21 = vpack.c.bf16 %v511_v14, %v511_v14  ;;  %v873_v23 = vpack.c.bf16 %v513_v19, %v513_v19  ;;  %v15287_v13 = vld [vmem:[%s19021_s1 + $0x1948] sm:$0xff]   ;;  %v15292_v19 = vld [vmem:[%s19021_s1 + $0x19d0] sm:$0xff]  }
 0x2e2   :  { %13933 = vmatprep.subr.bf16.mxu1 %v15218_v24  ;;  %v15255_v24 = vld [vmem:[%s19021_s1 + $0x18c8] sm:$0xff]  }
 0x2e3   :  { %10891 = vmatmul.mubr.bf16.vlgmr.msra.gmra.mrb[88].mxu0 %v866_v25  ;;  %v15256_v25 = vld [vmem:[%s19021_s1 + $0x1808] sm:$0xff]  }
 0x2e4   :  { %13912 = vmatpush3.bf16.msra.mxu0 %v15219_v26  ;;  %10931 = vmatmul.mubr.bf16.vlgmr.msra.gmra.mrb[88].mxu1 %v868_v30  ;;  %v15257_v26 = vld [vmem:[%s19021_s1 + $0x1888] sm:$0xff]   ;;  %v15261_v30 = vld [vmem:[%s19021_s1 + $0x1890] sm:$0xff]  }
 0x2e5   :  { %13913 = vmatprep.subr.bf16.mxu0 %v15221_v31  ;;  %13934 = vmatpush3.bf16.msra.mxu1 %v15220_v29  ;;  %v15260_v29 = vld [vmem:[%s19021_s1 + $0x1810] sm:$0xff]   ;;  %v15262_v31 = vld [vmem:[%s19021_s1 + $0x1858] sm:$0xff]  }
 0x2e6   :  { %13935 = vmatprep.subr.bf16.mxu1 %v15222_v33  ;;  %10970 = vmatprep.mubr.bf16.mxu0 %v871_v18  ;;  %v15264_v33 = vld [vmem:[%s19021_s1 + $0x1818] sm:$0xff]   ;;  %v15291_v18 = vld [vmem:[%s19021_s1 + $0x1950] sm:$0xff]  }
 0x2e7   :  { %11010 = vmatprep.mubr.bf16.mxu1 %v873_v23  ;;  %v15296_v23 = vld [vmem:[%s19021_s1 + $0x19d8] sm:$0xff]  }
 0x2e8   :  { %13914 = vmatpush3.bf16.msra.mxu0 %v15223_v34  ;;  %v15265_v34 = vld [vmem:[%s19021_s1 + $0x1898] sm:$0xff]  }
 0x2e9   :  { %13915 = vmatprep.subr.bf16.mxu0 %v15225_v36  ;;  %13936 = vmatpush3.bf16.msra.mxu1 %v15224_v35  ;;  %v15266_v35 = vld [vmem:[%s19021_s1 + $0x1860] sm:$0xff]  }
 0x2ea   :  { %13937 = vmatprep.subr.bf16.mxu1 %v15226_v37  ;;  %v15267_v36 = vld [vmem:[%s19021_s1 + $0x18e0] sm:$0xff]  }
 0x2eb   :  { %v15268_v37 = vld [vmem:[%s19021_s1 + $0x1820] sm:$0xff]  }
 0x2ec   :  { %13916 = vmatpush3.bf16.msra.mxu0 %v15227_v38  ;;  %v15269_v38 = vld [vmem:[%s19021_s1 + $0x18a0] sm:$0xff]  }
 0x2ed   :  { %13917 = vmatprep.subr.bf16.mxu0 %v15229_v40  ;;  %13938 = vmatpush3.bf16.msra.mxu1 %v15228_v39  ;;  %v15270_v39 = vld [vmem:[%s19021_s1 + $0x1868] sm:$0xff]  }
 0x2ee   :  { %13939 = vmatprep.subr.bf16.mxu1 %v15230_v42  ;;  %v15271_v42 = vld [vmem:[%s19021_s1 + $0x18e8] sm:$0xff]  }
 0x2f0   :  { %13918 = vmatpush3.bf16.msra.mxu0 %v15231_v43 }
 0x2f1   :  { %13919 = vmatprep.subr.bf16.mxu0 %v15233_v45  ;;  %13940 = vmatpush3.bf16.msra.mxu1 %v15232_v44  ;;  %v15272_v44 = vld [vmem:[%s19021_s1 + $0x1828] sm:$0xff]  }
 0x2f2   :  { %13941 = vmatprep.subr.bf16.mxu1 %v15234_v46 }
 0x2f4   :  { %13920 = vmatpush3.bf16.msra.mxu0 %v15235_v47 }
 0x2f5   :  { %13921 = vmatprep.subr.bf16.mxu0 %v15237_v49  ;;  %13942 = vmatpush3.bf16.msra.mxu1 %v15236_v48  ;;  %v15273_v48 = vld [vmem:[%s19021_s1 + $0x18a8] sm:$0xff]   ;;  %v15274_v49 = vld [vmem:[%s19021_s1 + $0x1870] sm:$0xff]  }
 0x2f6   :  { %v13619_v50 = vpop.f32.mrb[64].mxu0  ;;  %13943 = vmatprep.subr.bf16.mxu1 %v15238_v51 }
 0x2f7   :  { %v13620_v52 = vpop.f32.mrb[65].mxu0  ;;  %v13641_v54 = vpop.f32.mrb[64].mxu1 }
 0x2f8   :  { %v13621_v55 = vadd.f32 %v13620_v52, %v13619_v50  ;;  %v13622_v56 = vpop.f32.mrb[66].mxu0  ;;  %v13642_v57 = vpop.f32.mrb[65].mxu1  ;;  %13922 = vmatpush3.bf16.msra.mxu0 %v15239_v53 }
 0x2f9   :  { %v13623_v59 = vpop.f32.mrb[67].mxu0  ;;  %v13643_v62 = vadd.f32 %v13642_v57, %v13641_v54  ;;  %v13644_v63 = vpop.f32.mrb[66].mxu1  ;;  %13923 = vmatprep.subr.bf16.mxu0 %v15241_v60  ;;  %13944 = vmatpush3.bf16.msra.mxu1 %v15240_v58  ;;  %v15276_v57 = vld [vmem:[%s19021_s1 + $0x1830] sm:$0xff]   ;;  %v15278_v60 = vld [vmem:[%s19021_s1 + $0x1878] sm:$0xff]  }
 0x2fa   :  { %v10413_v61 = vadd.f32 %v13621_v55, %v17933_v12  ;;  %v13645_v1 = vpop.f32.mrb[67].mxu1  ;;  %13945 = vmatprep.subr.bf16.mxu1 %v15242_v0  ;;  %v15248_v12 = vld [vmem:[%s19021_s1 + $0x17b8] sm:$0xff]   ;;  %v15275_v55 = vld [vmem:[%s19021_s1 + $0x18f0] sm:$0xff]   ;;  %v66_v63 = vld [vmem:[%s19020_s0 + $0xc0] sm:$0xff] }
 0x2fb   :  { %v15277_v59 = vld [vmem:[%s19021_s1 + $0x18b0] sm:$0xff]   ;;  %v521_v0 = vrot.slane %v66_v63, %v15688_v41  ;;  %v514_v1 = vcombine.high %v66_v63, %v66_v63  ;;  %v15318_v63 = vld [vmem:[%s19021_s1 + $0x1a00] sm:$0xff]  }
 0x2fc   :  { %v18037_v3 = vadd.f32 %v13643_v62, %v10413_v61  ;;  %13924 = vmatpush3.bf16.msra.mxu0 %v15243_v2  ;;  %v15279_v61 = vld [vmem:[%s19021_s1 + $0x18f8] sm:$0xff]   ;;  %v15283_v2 = vld [vmem:[%s19021_s1 + $0x1940] sm:$0xff]  }
 0x2fd   :  { %13925 = vmatprep.subr.bf16.mxu0 %v15245_v4  ;;  %13946 = vmatpush3.bf16.msra.mxu1 %v15244_v5  ;;  %v15280_v62 = vld [vmem:[%s19021_s1 + $0x1838] sm:$0xff]   ;;  %v529_v4 = vcombine.high %v521_v0, %v521_v0  ;;  %v528_v5 = vrot.slane %v514_v1, %v15688_v41 }
 0x2fe   :  { %13947 = vmatprep.subr.bf16.mxu1 %v15246_v6  ;;  %v15284_v6 = vld [vmem:[%s19021_s1 + $0x19c0] sm:$0xff]  }
 0x2ff   :  { %v875_v9 = vpack.c.bf16 %v529_v4, %v529_v4  ;;  %v530_v10 = vcombine.high %v528_v5, %v528_v5  ;;  %v15320_v4 = vld [vmem:[%s19021_s1 + $0x1a48] sm:$0xff]  }
 0x300   :  { %13926 = vmatpush3.bf16.msra.mxu0 %v15247_v7  ;;  %v874_v7 = vpack.c.bf16 %v521_v0, %v521_v0 }
 0x301   :  { %13955 = vmatprep.subr.bf16.mxu0 %v15250_v11  ;;  %13948 = vmatpush3.bf16.msra.mxu1 %v15248_v12  ;;  %v15286_v11 = vld [vmem:[%s19021_s1 + $0x1980] sm:$0xff]   ;;  %v876_v12 = vpack.c.bf16 %v528_v5, %v528_v5  ;;  %v877_v14 = vpack.c.bf16 %v530_v10, %v530_v10  ;;  %v15325_v10 = vld [vmem:[%s19021_s1 + $0x1ad0] sm:$0xff]  }
 0x302   :  { %13977 = vmatprep.subr.bf16.mxu1 %v15251_v15  ;;  %v15288_v15 = vld [vmem:[%s19021_s1 + $0x19c8] sm:$0xff]  }
 0x303   :  { %10971 = vmatmul.mubr.bf16.vlgmr.msra.gmra.mrb[92].mxu0 %v870_v16  ;;  %v15289_v16 = vld [vmem:[%s19021_s1 + $0x1908] sm:$0xff]  }
 0x304   :  { %13956 = vmatpush3.bf16.msra.mxu0 %v15252_v17  ;;  %11011 = vmatmul.mubr.bf16.vlgmr.msra.gmra.mrb[92].mxu1 %v872_v21  ;;  %v15290_v17 = vld [vmem:[%s19021_s1 + $0x1988] sm:$0xff]   ;;  %v15294_v21 = vld [vmem:[%s19021_s1 + $0x1990] sm:$0xff]  }
 0x305   :  { %13957 = vmatprep.subr.bf16.mxu0 %v15254_v22  ;;  %13978 = vmatpush3.bf16.msra.mxu1 %v15253_v20  ;;  %v15293_v20 = vld [vmem:[%s19021_s1 + $0x1910] sm:$0xff]   ;;  %v15295_v22 = vld [vmem:[%s19021_s1 + $0x1958] sm:$0xff]  }
 0x306   :  { %13979 = vmatprep.subr.bf16.mxu1 %v15255_v24  ;;  %11050 = vmatprep.mubr.bf16.mxu0 %v875_v9  ;;  %v15297_v24 = vld [vmem:[%s19021_s1 + $0x1918] sm:$0xff]   ;;  %v15324_v9 = vld [vmem:[%s19021_s1 + $0x1a50] sm:$0xff]  }
 0x307   :  { %11090 = vmatprep.mubr.bf16.mxu1 %v877_v14  ;;  %v15329_v14 = vld [vmem:[%s19021_s1 + $0x1ad8] sm:$0xff]  }
 0x308   :  { %13958 = vmatpush3.bf16.msra.mxu0 %v15256_v25  ;;  %v15298_v25 = vld [vmem:[%s19021_s1 + $0x1998] sm:$0xff]  }
 0x309   :  { %13959 = vmatprep.subr.bf16.mxu0 %v15258_v27  ;;  %13980 = vmatpush3.bf16.msra.mxu1 %v15257_v26  ;;  %v15299_v26 = vld [vmem:[%s19021_s1 + $0x1960] sm:$0xff]  }
 0x30a   :  { %13981 = vmatprep.subr.bf16.mxu1 %v15259_v28  ;;  %v15300_v27 = vld [vmem:[%s19021_s1 + $0x19e0] sm:$0xff]  }
 0x30b   :  { %v15301_v28 = vld [vmem:[%s19021_s1 + $0x1920] sm:$0xff]  }
 0x30c   :  { %13960 = vmatpush3.bf16.msra.mxu0 %v15260_v29  ;;  %v15302_v29 = vld [vmem:[%s19021_s1 + $0x19a0] sm:$0xff]  }
 0x30d   :  { %13961 = vmatprep.subr.bf16.mxu0 %v15262_v31  ;;  %13982 = vmatpush3.bf16.msra.mxu1 %v15261_v30  ;;  %v15303_v30 = vld [vmem:[%s19021_s1 + $0x1968] sm:$0xff]  }
 0x30e   :  { %13983 = vmatprep.subr.bf16.mxu1 %v15263_v32  ;;  %v15304_v32 = vld [vmem:[%s19021_s1 + $0x19e8] sm:$0xff]  }
 0x310   :  { %13962 = vmatpush3.bf16.msra.mxu0 %v15264_v33 }
 0x311   :  { %13963 = vmatprep.subr.bf16.mxu0 %v15266_v35  ;;  %13984 = vmatpush3.bf16.msra.mxu1 %v15265_v34  ;;  %v15305_v34 = vld [vmem:[%s19021_s1 + $0x1928] sm:$0xff]  }
 0x312   :  { %13985 = vmatprep.subr.bf16.mxu1 %v15267_v36 }
 0x314   :  { %13964 = vmatpush3.bf16.msra.mxu0 %v15268_v37 }
 0x315   :  { %13965 = vmatprep.subr.bf16.mxu0 %v15270_v39  ;;  %13986 = vmatpush3.bf16.msra.mxu1 %v15269_v38  ;;  %v15306_v38 = vld [vmem:[%s19021_s1 + $0x19a8] sm:$0xff]   ;;  %v15307_v39 = vld [vmem:[%s19021_s1 + $0x1970] sm:$0xff]  }
 0x316   :  { %v13663_v40 = vpop.f32.mrb[68].mxu0  ;;  %13987 = vmatprep.subr.bf16.mxu1 %v15271_v42 }
 0x317   :  { %v13664_v43 = vpop.f32.mrb[69].mxu0  ;;  %v13685_v45 = vpop.f32.mrb[68].mxu1 }
 0x318   :  { %v13665_v46 = vadd.f32 %v13664_v43, %v13663_v40  ;;  %v13666_v47 = vpop.f32.mrb[70].mxu0  ;;  %v13686_v50 = vpop.f32.mrb[69].mxu1  ;;  %13966 = vmatpush3.bf16.msra.mxu0 %v15272_v44 }
 0x319   :  { %v13667_v51 = vpop.f32.mrb[71].mxu0  ;;  %v13687_v53 = vadd.f32 %v13686_v50, %v13685_v45  ;;  %v13688_v54 = vpop.f32.mrb[70].mxu1  ;;  %13967 = vmatprep.subr.bf16.mxu0 %v15274_v49  ;;  %13988 = vmatpush3.bf16.msra.mxu1 %v15273_v48  ;;  %v15309_v48 = vld [vmem:[%s19021_s1 + $0x1930] sm:$0xff]  }
 0x31a   :  { %v10493_v52 = vadd.f32 %v13665_v46, %v18037_v3  ;;  %v13689_v56 = vpop.f32.mrb[71].mxu1  ;;  %13989 = vmatprep.subr.bf16.mxu1 %v15275_v55  ;;  %v15281_v3 = vld [vmem:[%s19021_s1 + $0x18b8] sm:$0xff]   ;;  %v15308_v46 = vld [vmem:[%s19021_s1 + $0x19f0] sm:$0xff]   ;;  %v67_v54 = vld [vmem:[%s19020_s0 + $0xc8] sm:$0xff] }
 0x31b   :  { %v15310_v50 = vld [vmem:[%s19021_s1 + $0x19b0] sm:$0xff]   ;;  %v15311_v51 = vld [vmem:[%s19021_s1 + $0x1978] sm:$0xff]   ;;  %v538_v56 = vrot.slane %v67_v54, %v15688_v41 }
 0x31c   :  { %v18141_v58 = vadd.f32 %v13687_v53, %v10493_v52  ;;  %13968 = vmatpush3.bf16.msra.mxu0 %v15276_v57  ;;  %v15312_v52 = vld [vmem:[%s19021_s1 + $0x19f8] sm:$0xff]   ;;  %v531_v57 = vcombine.high %v67_v54, %v67_v54  ;;  %v15351_v54 = vld [vmem:[%s19021_s1 + $0x1b00] sm:$0xff]  }
 0x31d   :  { %13969 = vmatprep.subr.bf16.mxu0 %v15278_v60  ;;  %13990 = vmatpush3.bf16.msra.mxu1 %v15277_v59  ;;  %v15313_v53 = vld [vmem:[%s19021_s1 + $0x1938] sm:$0xff]   ;;  %v546_v59 = vcombine.high %v538_v56, %v538_v56 }
 0x31e   :  { %13991 = vmatprep.subr.bf16.mxu1 %v15279_v61  ;;  %v15314_v55 = vld [vmem:[%s19021_s1 + $0x19b8] sm:$0xff]   ;;  %v545_v60 = vrot.slane %v531_v57, %v15688_v41  ;;  %v15317_v61 = vld [vmem:[%s19021_s1 + $0x1ac0] sm:$0xff]  }
 0x31f   :  { %v879_v0 = vpack.c.bf16 %v546_v59, %v546_v59  ;;  %v15352_v57 = vld [vmem:[%s19021_s1 + $0x1b80] sm:$0xff]   ;;  %v15353_v59 = vld [vmem:[%s19021_s1 + $0x1b48] sm:$0xff]  }
 0x320   :  { %13970 = vmatpush3.bf16.msra.mxu0 %v15280_v62  ;;  %v878_v62 = vpack.c.bf16 %v538_v56, %v538_v56  ;;  %v547_v1 = vcombine.high %v545_v60, %v545_v60 }
 0x321   :  { %13999 = vmatprep.subr.bf16.mxu0 %v15283_v2  ;;  %13992 = vmatpush3.bf16.msra.mxu1 %v15281_v3  ;;  %v15319_v2 = vld [vmem:[%s19021_s1 + $0x1a80] sm:$0xff]   ;;  %v880_v3 = vpack.c.bf16 %v545_v60, %v545_v60 }
 0x322   :  { %14021 = vmatprep.subr.bf16.mxu1 %v15284_v6  ;;  %v881_v5 = vpack.c.bf16 %v547_v1, %v547_v1  ;;  %v15321_v6 = vld [vmem:[%s19021_s1 + $0x1ac8] sm:$0xff]   ;;  %v15358_v1 = vld [vmem:[%s19021_s1 + $0x1bd0] sm:$0xff]  }
 0x323   :  { %11051 = vmatmul.mubr.bf16.vlgmr.msra.gmra.mrb[96].mxu0 %v874_v7  ;;  %v15322_v7 = vld [vmem:[%s19021_s1 + $0x1a08] sm:$0xff]  }
 0x324   :  { %14000 = vmatpush3.bf16.msra.mxu0 %v15285_v8  ;;  %11091 = vmatmul.mubr.bf16.vlgmr.msra.gmra.mrb[96].mxu1 %v876_v12  ;;  %v15323_v8 = vld [vmem:[%s19021_s1 + $0x1a88] sm:$0xff]   ;;  %v15327_v12 = vld [vmem:[%s19021_s1 + $0x1a90] sm:$0xff]  }
 0x325   :  { %14001 = vmatprep.subr.bf16.mxu0 %v15287_v13  ;;  %14022 = vmatpush3.bf16.msra.mxu1 %v15286_v11  ;;  %v15326_v11 = vld [vmem:[%s19021_s1 + $0x1a10] sm:$0xff]   ;;  %v15328_v13 = vld [vmem:[%s19021_s1 + $0x1a58] sm:$0xff]  }
 0x326   :  { %14023 = vmatprep.subr.bf16.mxu1 %v15288_v15  ;;  %11130 = vmatprep.mubr.bf16.mxu0 %v879_v0  ;;  %v15330_v15 = vld [vmem:[%s19021_s1 + $0x1a18] sm:$0xff]   ;;  %v15357_v0 = vld [vmem:[%s19021_s1 + $0x1b50] sm:$0xff]  }
 0x327   :  { %11170 = vmatprep.mubr.bf16.mxu1 %v881_v5  ;;  %v15362_v5 = vld [vmem:[%s19021_s1 + $0x1bd8] sm:$0xff]  }
 0x328   :  { %14002 = vmatpush3.bf16.msra.mxu0 %v15289_v16  ;;  %v15331_v16 = vld [vmem:[%s19021_s1 + $0x1a98] sm:$0xff]  }
 0x329   :  { %14003 = vmatprep.subr.bf16.mxu0 %v15291_v18  ;;  %14024 = vmatpush3.bf16.msra.mxu1 %v15290_v17  ;;  %v15332_v17 = vld [vmem:[%s19021_s1 + $0x1a60] sm:$0xff]  }
 0x32a   :  { %14025 = vmatprep.subr.bf16.mxu1 %v15292_v19  ;;  %v15333_v18 = vld [vmem:[%s19021_s1 + $0x1ae0] sm:$0xff]  }
 0x32b   :  { %v15334_v19 = vld [vmem:[%s19021_s1 + $0x1a20] sm:$0xff]  }
 0x32c   :  { %14004 = vmatpush3.bf16.msra.mxu0 %v15293_v20  ;;  %v15335_v20 = vld [vmem:[%s19021_s1 + $0x1aa0] sm:$0xff]  }
 0x32d   :  { %14005 = vmatprep.subr.bf16.mxu0 %v15295_v22  ;;  %14026 = vmatpush3.bf16.msra.mxu1 %v15294_v21  ;;  %v15336_v21 = vld [vmem:[%s19021_s1 + $0x1a68] sm:$0xff]  }
 0x32e   :  { %14027 = vmatprep.subr.bf16.mxu1 %v15296_v23  ;;  %v15337_v23 = vld [vmem:[%s19021_s1 + $0x1ae8] sm:$0xff]  }
 0x330   :  { %14006 = vmatpush3.bf16.msra.mxu0 %v15297_v24 }
 0x331   :  { %14007 = vmatprep.subr.bf16.mxu0 %v15299_v26  ;;  %14028 = vmatpush3.bf16.msra.mxu1 %v15298_v25  ;;  %v15338_v25 = vld [vmem:[%s19021_s1 + $0x1a28] sm:$0xff]  }
 0x332   :  { %14029 = vmatprep.subr.bf16.mxu1 %v15300_v27 }
 0x334   :  { %14008 = vmatpush3.bf16.msra.mxu0 %v15301_v28 }
 0x335   :  { %14009 = vmatprep.subr.bf16.mxu0 %v15303_v30  ;;  %14030 = vmatpush3.bf16.msra.mxu1 %v15302_v29  ;;  %v15339_v30 = vld [vmem:[%s19021_s1 + $0x1aa8] sm:$0xff]  }
 0x336   :  { %v13707_v31 = vpop.f32.mrb[72].mxu0  ;;  %14031 = vmatprep.subr.bf16.mxu1 %v15304_v32  ;;  %v15340_v32 = vld [vmem:[%s19021_s1 + $0x1a70] sm:$0xff]  }
 0x337   :  { %v13708_v33 = vpop.f32.mrb[73].mxu0  ;;  %v13729_v35 = vpop.f32.mrb[72].mxu1 }
 0x338   :  { %v13709_v36 = vadd.f32 %v13708_v33, %v13707_v31  ;;  %v13710_v37 = vpop.f32.mrb[74].mxu0  ;;  %v13730_v40 = vpop.f32.mrb[73].mxu1  ;;  %14010 = vmatpush3.bf16.msra.mxu0 %v15305_v34 }
 0x339   :  { %v13711_v42 = vpop.f32.mrb[75].mxu0  ;;  %v13731_v44 = vadd.f32 %v13730_v40, %v13729_v35  ;;  %v13732_v45 = vpop.f32.mrb[74].mxu1  ;;  %14011 = vmatprep.subr.bf16.mxu0 %v15307_v39  ;;  %14032 = vmatpush3.bf16.msra.mxu1 %v15306_v38  ;;  %v15342_v38 = vld [vmem:[%s19021_s1 + $0x1a30] sm:$0xff]   ;;  %v15344_v40 = vld [vmem:[%s19021_s1 + $0x1a78] sm:$0xff]  }
 0x33a   :  { %v10573_v43 = vadd.f32 %v13709_v36, %v18141_v58  ;;  %v13733_v47 = vpop.f32.mrb[75].mxu1  ;;  %14033 = vmatprep.subr.bf16.mxu1 %v15308_v46  ;;  %v15316_v58 = vld [vmem:[%s19021_s1 + $0x1a40] sm:$0xff]   ;;  %v15341_v36 = vld [vmem:[%s19021_s1 + $0x1af0] sm:$0xff]  }
 0x33b   :  { %v15343_v42 = vld [vmem:[%s19021_s1 + $0x1ab0] sm:$0xff]  }
 0x33c   :  { %v18245_v49 = vadd.f32 %v13731_v44, %v10573_v43  ;;  %14012 = vmatpush3.bf16.msra.mxu0 %v15309_v48  ;;  %v15345_v43 = vld [vmem:[%s19021_s1 + $0x1af8] sm:$0xff]   ;;  %v68_v45 = vld [vmem:[%s19020_s0 + $0xd0] sm:$0xff]  ;;  %v15349_v48 = vld [vmem:[%s19021_s1 + $0x1b40] sm:$0xff]  }
 0x33d   :  { %14013 = vmatprep.subr.bf16.mxu0 %v15311_v51  ;;  %14034 = vmatpush3.bf16.msra.mxu1 %v15310_v50  ;;  %v15346_v44 = vld [vmem:[%s19021_s1 + $0x1a38] sm:$0xff]   ;;  %v555_v46 = vrot.slane %v68_v45, %v15688_v41  ;;  %v548_v47 = vcombine.high %v68_v45, %v68_v45  ;;  %v15384_v45 = vld [vmem:[%s19021_s1 + $0x1c00] sm:$0xff]  }
 0x33e   :  { %14035 = vmatprep.subr.bf16.mxu1 %v15312_v52  ;;  %v15350_v52 = vld [vmem:[%s19021_s1 + $0x1bc0] sm:$0xff]  }
 0x33f   :  { %v563_v50 = vcombine.high %v555_v46, %v555_v46  ;;  %v562_v51 = vrot.slane %v548_v47, %v15688_v41 }
 0x340   :  { %14014 = vmatpush3.bf16.msra.mxu0 %v15313_v53  ;;  %v882_v53 = vpack.c.bf16 %v555_v46, %v555_v46 }
 0x341   :  { %14043 = vmatprep.subr.bf16.mxu0 %v15316_v58  ;;  %14036 = vmatpush3.bf16.msra.mxu1 %v15314_v55  ;;  %v883_v55 = vpack.c.bf16 %v563_v50, %v563_v50  ;;  %v564_v56 = vcombine.high %v562_v51, %v562_v51  ;;  %v884_v58 = vpack.c.bf16 %v562_v51, %v562_v51  ;;  %v15386_v50 = vld [vmem:[%s19021_s1 + $0x1c48] sm:$0xff]  }
 0x342   :  { %14065 = vmatprep.subr.bf16.mxu1 %v15317_v61  ;;  %v15354_v61 = vld [vmem:[%s19021_s1 + $0x1bc8] sm:$0xff]  }
 0x343   :  { %11131 = vmatmul.mubr.bf16.vlgmr.msra.gmra.mrb[100].mxu0 %v878_v62  ;;  %v885_v60 = vpack.c.bf16 %v564_v56, %v564_v56  ;;  %v15355_v62 = vld [vmem:[%s19021_s1 + $0x1b08] sm:$0xff]   ;;  %v15391_v56 = vld [vmem:[%s19021_s1 + $0x1cd0] sm:$0xff]  }
 0x344   :  { %14044 = vmatpush3.bf16.msra.mxu0 %v15318_v63  ;;  %11171 = vmatmul.mubr.bf16.vlgmr.msra.gmra.mrb[100].mxu1 %v880_v3  ;;  %v15356_v63 = vld [vmem:[%s19021_s1 + $0x1b88] sm:$0xff]   ;;  %v15360_v3 = vld [vmem:[%s19021_s1 + $0x1b90] sm:$0xff]  }
 0x345   :  { %14045 = vmatprep.subr.bf16.mxu0 %v15320_v4  ;;  %14066 = vmatpush3.bf16.msra.mxu1 %v15319_v2  ;;  %v15359_v2 = vld [vmem:[%s19021_s1 + $0x1b10] sm:$0xff]   ;;  %v15361_v4 = vld [vmem:[%s19021_s1 + $0x1b58] sm:$0xff]  }
 0x346   :  { %14067 = vmatprep.subr.bf16.mxu1 %v15321_v6  ;;  %11210 = vmatprep.mubr.bf16.mxu0 %v883_v55  ;;  %v15363_v6 = vld [vmem:[%s19021_s1 + $0x1b18] sm:$0xff]   ;;  %v15390_v55 = vld [vmem:[%s19021_s1 + $0x1c50] sm:$0xff]  }
 0x347   :  { %11250 = vmatprep.mubr.bf16.mxu1 %v885_v60  ;;  %v15395_v60 = vld [vmem:[%s19021_s1 + $0x1cd8] sm:$0xff]  }
 0x348   :  { %14046 = vmatpush3.bf16.msra.mxu0 %v15322_v7  ;;  %v15364_v7 = vld [vmem:[%s19021_s1 + $0x1b98] sm:$0xff]  }
 0x349   :  { %14047 = vmatprep.subr.bf16.mxu0 %v15324_v9  ;;  %14068 = vmatpush3.bf16.msra.mxu1 %v15323_v8  ;;  %v15365_v8 = vld [vmem:[%s19021_s1 + $0x1b60] sm:$0xff]  }
 0x34a   :  { %14069 = vmatprep.subr.bf16.mxu1 %v15325_v10  ;;  %v15366_v9 = vld [vmem:[%s19021_s1 + $0x1be0] sm:$0xff]  }
 0x34b   :  { %v15367_v10 = vld [vmem:[%s19021_s1 + $0x1b20] sm:$0xff]  }
 0x34c   :  { %14048 = vmatpush3.bf16.msra.mxu0 %v15326_v11  ;;  %v15368_v11 = vld [vmem:[%s19021_s1 + $0x1ba0] sm:$0xff]  }
 0x34d   :  { %14049 = vmatprep.subr.bf16.mxu0 %v15328_v13  ;;  %14070 = vmatpush3.bf16.msra.mxu1 %v15327_v12  ;;  %v15369_v12 = vld [vmem:[%s19021_s1 + $0x1b68] sm:$0xff]  }
 0x34e   :  { %14071 = vmatprep.subr.bf16.mxu1 %v15329_v14  ;;  %v15370_v14 = vld [vmem:[%s19021_s1 + $0x1be8] sm:$0xff]  }
 0x350   :  { %14050 = vmatpush3.bf16.msra.mxu0 %v15330_v15 }
 0x351   :  { %14051 = vmatprep.subr.bf16.mxu0 %v15332_v17  ;;  %14072 = vmatpush3.bf16.msra.mxu1 %v15331_v16  ;;  %v15371_v16 = vld [vmem:[%s19021_s1 + $0x1b28] sm:$0xff]  }
 0x352   :  { %14073 = vmatprep.subr.bf16.mxu1 %v15333_v18 }
 0x354   :  { %14052 = vmatpush3.bf16.msra.mxu0 %v15334_v19 }
 0x355   :  { %14053 = vmatprep.subr.bf16.mxu0 %v15336_v21  ;;  %14074 = vmatpush3.bf16.msra.mxu1 %v15335_v20  ;;  %v15372_v20 = vld [vmem:[%s19021_s1 + $0x1ba8] sm:$0xff]   ;;  %v15373_v21 = vld [vmem:[%s19021_s1 + $0x1b70] sm:$0xff]  }
 0x356   :  { %v13751_v22 = vpop.f32.mrb[76].mxu0  ;;  %14075 = vmatprep.subr.bf16.mxu1 %v15337_v23 }
 0x357   :  { %v13752_v24 = vpop.f32.mrb[77].mxu0  ;;  %v13773_v26 = vpop.f32.mrb[76].mxu1 }
 0x358   :  { %v13753_v27 = vadd.f32 %v13752_v24, %v13751_v22  ;;  %v13754_v28 = vpop.f32.mrb[78].mxu0  ;;  %v13774_v29 = vpop.f32.mrb[77].mxu1  ;;  %14054 = vmatpush3.bf16.msra.mxu0 %v15338_v25 }
 0x359   :  { %v13755_v31 = vpop.f32.mrb[79].mxu0  ;;  %v13775_v34 = vadd.f32 %v13774_v29, %v13773_v26  ;;  %v13776_v35 = vpop.f32.mrb[78].mxu1  ;;  %14055 = vmatprep.subr.bf16.mxu0 %v15340_v32  ;;  %14076 = vmatpush3.bf16.msra.mxu1 %v15339_v30  ;;  %v15375_v29 = vld [vmem:[%s19021_s1 + $0x1b30] sm:$0xff]   ;;  %v15377_v32 = vld [vmem:[%s19021_s1 + $0x1b78] sm:$0xff]  }
 0x35a   :  { %v10653_v33 = vadd.f32 %v13753_v27, %v18245_v49  ;;  %v13777_v37 = vpop.f32.mrb[79].mxu1  ;;  %14077 = vmatprep.subr.bf16.mxu1 %v15341_v36  ;;  %v15347_v49 = vld [vmem:[%s19021_s1 + $0x1ab8] sm:$0xff]   ;;  %v15374_v27 = vld [vmem:[%s19021_s1 + $0x1bf0] sm:$0xff]  }
 0x35b   :  { %v15376_v31 = vld [vmem:[%s19021_s1 + $0x1bb0] sm:$0xff]   ;;  %v69_v35 = vld [vmem:[%s19020_s0 + $0xd8] sm:$0xff] }
 0x35c   :  { %v18349_v39 = vadd.f32 %v13775_v34, %v10653_v33  ;;  %14056 = vmatpush3.bf16.msra.mxu0 %v15342_v38  ;;  %v15378_v33 = vld [vmem:[%s19021_s1 + $0x1bf8] sm:$0xff]   ;;  %v572_v36 = vrot.slane %v69_v35, %v15688_v41  ;;  %v565_v37 = vcombine.high %v69_v35, %v69_v35  ;;  %v15382_v38 = vld [vmem:[%s19021_s1 + $0x1c40] sm:$0xff]  }
 0x35d   :  { %14057 = vmatprep.subr.bf16.mxu0 %v15344_v40  ;;  %14078 = vmatpush3.bf16.msra.mxu1 %v15343_v42  ;;  %v15379_v34 = vld [vmem:[%s19021_s1 + $0x1b38] sm:$0xff]   ;;  %v15417_v35 = vld [vmem:[%s19021_s1 + $0x1d00] sm:$0xff]  }
 0x35e   :  { %14079 = vmatprep.subr.bf16.mxu1 %v15345_v43  ;;  %v580_v40 = vcombine.high %v572_v36, %v572_v36  ;;  %v579_v42 = vrot.slane %v565_v37, %v15688_v41  ;;  %v15383_v43 = vld [vmem:[%s19021_s1 + $0x1cc0] sm:$0xff]  }
 0x360   :  { %14058 = vmatpush3.bf16.msra.mxu0 %v15346_v44  ;;  %v886_v44 = vpack.c.bf16 %v572_v36, %v572_v36  ;;  %v887_v46 = vpack.c.bf16 %v580_v40, %v580_v40  ;;  %v581_v47 = vcombine.high %v579_v42, %v579_v42  ;;  %v15419_v40 = vld [vmem:[%s19021_s1 + $0x1d48] sm:$0xff]  }
 0x361   :  { %14087 = vmatprep.subr.bf16.mxu0 %v15349_v48  ;;  %14080 = vmatpush3.bf16.msra.mxu1 %v15347_v49  ;;  %v15385_v48 = vld [vmem:[%s19021_s1 + $0x1c80] sm:$0xff]   ;;  %v888_v49 = vpack.c.bf16 %v579_v42, %v579_v42 }
 0x362   :  { %14109 = vmatprep.subr.bf16.mxu1 %v15350_v52  ;;  %v889_v51 = vpack.c.bf16 %v581_v47, %v581_v47  ;;  %v15387_v52 = vld [vmem:[%s19021_s1 + $0x1cc8] sm:$0xff]   ;;  %v15424_v47 = vld [vmem:[%s19021_s1 + $0x1dd0] sm:$0xff]  }
 0x363   :  { %11211 = vmatmul.mubr.bf16.vlgmr.msra.gmra.mrb[104].mxu0 %v882_v53  ;;  %v15388_v53 = vld [vmem:[%s19021_s1 + $0x1c08] sm:$0xff]  }
 0x364   :  { %14088 = vmatpush3.bf16.msra.mxu0 %v15351_v54  ;;  %11251 = vmatmul.mubr.bf16.vlgmr.msra.gmra.mrb[104].mxu1 %v884_v58  ;;  %v15389_v54 = vld [vmem:[%s19021_s1 + $0x1c88] sm:$0xff]   ;;  %v15393_v58 = vld [vmem:[%s19021_s1 + $0x1c90] sm:$0xff]  }
 0x365   :  { %14089 = vmatprep.subr.bf16.mxu0 %v15353_v59  ;;  %14110 = vmatpush3.bf16.msra.mxu1 %v15352_v57  ;;  %v15392_v57 = vld [vmem:[%s19021_s1 + $0x1c10] sm:$0xff]   ;;  %v15394_v59 = vld [vmem:[%s19021_s1 + $0x1c58] sm:$0xff]  }
 0x366   :  { %14111 = vmatprep.subr.bf16.mxu1 %v15354_v61  ;;  %11290 = vmatprep.mubr.bf16.mxu0 %v887_v46  ;;  %v15396_v61 = vld [vmem:[%s19021_s1 + $0x1c18] sm:$0xff]   ;;  %v15423_v46 = vld [vmem:[%s19021_s1 + $0x1d50] sm:$0xff]  }
 0x367   :  { %11330 = vmatprep.mubr.bf16.mxu1 %v889_v51  ;;  %v15428_v51 = vld [vmem:[%s19021_s1 + $0x1dd8] sm:$0xff]  }
 0x368   :  { %14090 = vmatpush3.bf16.msra.mxu0 %v15355_v62  ;;  %v15397_v62 = vld [vmem:[%s19021_s1 + $0x1c98] sm:$0xff]  }
 0x369   :  { %14091 = vmatprep.subr.bf16.mxu0 %v15357_v0  ;;  %14112 = vmatpush3.bf16.msra.mxu1 %v15356_v63  ;;  %v15398_v63 = vld [vmem:[%s19021_s1 + $0x1c60] sm:$0xff]  }
 0x36a   :  { %14113 = vmatprep.subr.bf16.mxu1 %v15358_v1  ;;  %v15399_v0 = vld [vmem:[%s19021_s1 + $0x1ce0] sm:$0xff]  }
 0x36b   :  { %v15400_v1 = vld [vmem:[%s19021_s1 + $0x1c20] sm:$0xff]  }
 0x36c   :  { %14092 = vmatpush3.bf16.msra.mxu0 %v15359_v2  ;;  %v15401_v2 = vld [vmem:[%s19021_s1 + $0x1ca0] sm:$0xff]  }
 0x36d   :  { %14093 = vmatprep.subr.bf16.mxu0 %v15361_v4  ;;  %14114 = vmatpush3.bf16.msra.mxu1 %v15360_v3  ;;  %v15402_v3 = vld [vmem:[%s19021_s1 + $0x1c68] sm:$0xff]  }
 0x36e   :  { %14115 = vmatprep.subr.bf16.mxu1 %v15362_v5  ;;  %v15403_v5 = vld [vmem:[%s19021_s1 + $0x1ce8] sm:$0xff]  }
 0x370   :  { %14094 = vmatpush3.bf16.msra.mxu0 %v15363_v6 }
 0x371   :  { %14095 = vmatprep.subr.bf16.mxu0 %v15365_v8  ;;  %14116 = vmatpush3.bf16.msra.mxu1 %v15364_v7  ;;  %v15404_v7 = vld [vmem:[%s19021_s1 + $0x1c28] sm:$0xff]  }
 0x372   :  { %14117 = vmatprep.subr.bf16.mxu1 %v15366_v9 }
 0x374   :  { %14096 = vmatpush3.bf16.msra.mxu0 %v15367_v10 }
 0x375   :  { %14097 = vmatprep.subr.bf16.mxu0 %v15369_v12  ;;  %14118 = vmatpush3.bf16.msra.mxu1 %v15368_v11  ;;  %v15405_v11 = vld [vmem:[%s19021_s1 + $0x1ca8] sm:$0xff]   ;;  %v15406_v12 = vld [vmem:[%s19021_s1 + $0x1c70] sm:$0xff]  }
 0x376   :  { %v13795_v13 = vpop.f32.mrb[80].mxu0  ;;  %14119 = vmatprep.subr.bf16.mxu1 %v15370_v14 }
 0x377   :  { %v13796_v15 = vpop.f32.mrb[81].mxu0  ;;  %v13817_v17 = vpop.f32.mrb[80].mxu1 }
 0x378   :  { %v13797_v18 = vadd.f32 %v13796_v15, %v13795_v13  ;;  %v13798_v19 = vpop.f32.mrb[82].mxu0  ;;  %v13818_v22 = vpop.f32.mrb[81].mxu1  ;;  %14098 = vmatpush3.bf16.msra.mxu0 %v15371_v16 }
 0x379   :  { %v13799_v23 = vpop.f32.mrb[83].mxu0  ;;  %v13819_v25 = vadd.f32 %v13818_v22, %v13817_v17  ;;  %v13820_v26 = vpop.f32.mrb[82].mxu1  ;;  %14099 = vmatprep.subr.bf16.mxu0 %v15373_v21  ;;  %14120 = vmatpush3.bf16.msra.mxu1 %v15372_v20  ;;  %v15408_v20 = vld [vmem:[%s19021_s1 + $0x1c30] sm:$0xff]  }
 0x37a   :  { %v10733_v24 = vadd.f32 %v13797_v18, %v18349_v39  ;;  %v13821_v28 = vpop.f32.mrb[83].mxu1  ;;  %14121 = vmatprep.subr.bf16.mxu1 %v15374_v27  ;;  %v15380_v39 = vld [vmem:[%s19021_s1 + $0x1bb8] sm:$0xff]   ;;  %v15407_v18 = vld [vmem:[%s19021_s1 + $0x1cf0] sm:$0xff]   ;;  %v70_v26 = vld [vmem:[%s19020_s0 + $0xe0] sm:$0xff] }
 0x37b   :  { %v15409_v22 = vld [vmem:[%s19021_s1 + $0x1cb0] sm:$0xff]   ;;  %v15410_v23 = vld [vmem:[%s19021_s1 + $0x1c78] sm:$0xff]   ;;  %v589_v28 = vrot.slane %v70_v26, %v15688_v41 }
 0x37c   :  { %v18453_v30 = vadd.f32 %v13819_v25, %v10733_v24  ;;  %14100 = vmatpush3.bf16.msra.mxu0 %v15375_v29  ;;  %v15411_v24 = vld [vmem:[%s19021_s1 + $0x1cf8] sm:$0xff]   ;;  %v582_v29 = vcombine.high %v70_v26, %v70_v26  ;;  %v15450_v26 = vld [vmem:[%s19021_s1 + $0x1e00] sm:$0xff]  }
 0x37d   :  { %14101 = vmatprep.subr.bf16.mxu0 %v15377_v32  ;;  %14122 = vmatpush3.bf16.msra.mxu1 %v15376_v31  ;;  %v15412_v25 = vld [vmem:[%s19021_s1 + $0x1c38] sm:$0xff]   ;;  %v597_v31 = vcombine.high %v589_v28, %v589_v28 }
 0x37e   :  { %14123 = vmatprep.subr.bf16.mxu1 %v15378_v33  ;;  %v15413_v27 = vld [vmem:[%s19021_s1 + $0x1cb8] sm:$0xff]   ;;  %v596_v32 = vrot.slane %v582_v29, %v15688_v41  ;;  %v15416_v33 = vld [vmem:[%s19021_s1 + $0x1dc0] sm:$0xff]  }
 0x37f   :  { %v891_v36 = vpack.c.bf16 %v597_v31, %v597_v31  ;;  %v15451_v29 = vld [vmem:[%s19021_s1 + $0x1e80] sm:$0xff]   ;;  %v15452_v31 = vld [vmem:[%s19021_s1 + $0x1e48] sm:$0xff]  }
 0x380   :  { %14102 = vmatpush3.bf16.msra.mxu0 %v15379_v34  ;;  %v890_v34 = vpack.c.bf16 %v589_v28, %v589_v28  ;;  %v598_v37 = vcombine.high %v596_v32, %v596_v32 }
 0x381   :  { %14131 = vmatprep.subr.bf16.mxu0 %v15382_v38  ;;  %14124 = vmatpush3.bf16.msra.mxu1 %v15380_v39  ;;  %v15418_v38 = vld [vmem:[%s19021_s1 + $0x1d80] sm:$0xff]   ;;  %v892_v39 = vpack.c.bf16 %v596_v32, %v596_v32 }
 0x382   :  { %14153 = vmatprep.subr.bf16.mxu1 %v15383_v43  ;;  %v893_v42 = vpack.c.bf16 %v598_v37, %v598_v37  ;;  %v15420_v43 = vld [vmem:[%s19021_s1 + $0x1dc8] sm:$0xff]   ;;  %v15457_v37 = vld [vmem:[%s19021_s1 + $0x1ed0] sm:$0xff]  }
 0x383   :  { %11291 = vmatmul.mubr.bf16.vlgmr.msra.gmra.mrb[108].mxu0 %v886_v44  ;;  %v15421_v44 = vld [vmem:[%s19021_s1 + $0x1d08] sm:$0xff]  }
 0x384   :  { %14132 = vmatpush3.bf16.msra.mxu0 %v15384_v45  ;;  %11331 = vmatmul.mubr.bf16.vlgmr.msra.gmra.mrb[108].mxu1 %v888_v49  ;;  %v15422_v45 = vld [vmem:[%s19021_s1 + $0x1d88] sm:$0xff]   ;;  %v15426_v49 = vld [vmem:[%s19021_s1 + $0x1d90] sm:$0xff]  }
 0x385   :  { %14133 = vmatprep.subr.bf16.mxu0 %v15386_v50  ;;  %14154 = vmatpush3.bf16.msra.mxu1 %v15385_v48  ;;  %v15425_v48 = vld [vmem:[%s19021_s1 + $0x1d10] sm:$0xff]   ;;  %v15427_v50 = vld [vmem:[%s19021_s1 + $0x1d58] sm:$0xff]  }
 0x386   :  { %14155 = vmatprep.subr.bf16.mxu1 %v15387_v52  ;;  %11370 = vmatprep.mubr.bf16.mxu0 %v891_v36  ;;  %v15429_v52 = vld [vmem:[%s19021_s1 + $0x1d18] sm:$0xff]   ;;  %v15456_v36 = vld [vmem:[%s19021_s1 + $0x1e50] sm:$0xff]  }
 0x387   :  { %11410 = vmatprep.mubr.bf16.mxu1 %v893_v42  ;;  %v15461_v42 = vld [vmem:[%s19021_s1 + $0x1ed8] sm:$0xff]  }
 0x388   :  { %14134 = vmatpush3.bf16.msra.mxu0 %v15388_v53  ;;  %v15430_v53 = vld [vmem:[%s19021_s1 + $0x1d98] sm:$0xff]  }
 0x389   :  { %14135 = vmatprep.subr.bf16.mxu0 %v15390_v55  ;;  %14156 = vmatpush3.bf16.msra.mxu1 %v15389_v54  ;;  %v15431_v54 = vld [vmem:[%s19021_s1 + $0x1d60] sm:$0xff]  }
 0x38a   :  { %14157 = vmatprep.subr.bf16.mxu1 %v15391_v56  ;;  %v15432_v55 = vld [vmem:[%s19021_s1 + $0x1de0] sm:$0xff]  }
 0x38b   :  { %v15433_v56 = vld [vmem:[%s19021_s1 + $0x1d20] sm:$0xff]  }
 0x38c   :  { %14136 = vmatpush3.bf16.msra.mxu0 %v15392_v57  ;;  %v15434_v57 = vld [vmem:[%s19021_s1 + $0x1da0] sm:$0xff]  }
 0x38d   :  { %14137 = vmatprep.subr.bf16.mxu0 %v15394_v59  ;;  %14158 = vmatpush3.bf16.msra.mxu1 %v15393_v58  ;;  %v15435_v58 = vld [vmem:[%s19021_s1 + $0x1d68] sm:$0xff]  }
 0x38e   :  { %14159 = vmatprep.subr.bf16.mxu1 %v15395_v60  ;;  %v15436_v60 = vld [vmem:[%s19021_s1 + $0x1de8] sm:$0xff]  }
 0x390   :  { %14138 = vmatpush3.bf16.msra.mxu0 %v15396_v61 }
 0x391   :  { %14139 = vmatprep.subr.bf16.mxu0 %v15398_v63  ;;  %14160 = vmatpush3.bf16.msra.mxu1 %v15397_v62  ;;  %v15437_v62 = vld [vmem:[%s19021_s1 + $0x1d28] sm:$0xff]  }
 0x392   :  { %14161 = vmatprep.subr.bf16.mxu1 %v15399_v0 }
 0x394   :  { %14140 = vmatpush3.bf16.msra.mxu0 %v15400_v1 }
 0x395   :  { %14141 = vmatprep.subr.bf16.mxu0 %v15402_v3  ;;  %14162 = vmatpush3.bf16.msra.mxu1 %v15401_v2  ;;  %v15438_v3 = vld [vmem:[%s19021_s1 + $0x1da8] sm:$0xff]  }
 0x396   :  { %v13839_v4 = vpop.f32.mrb[84].mxu0  ;;  %14163 = vmatprep.subr.bf16.mxu1 %v15403_v5  ;;  %v15439_v5 = vld [vmem:[%s19021_s1 + $0x1d70] sm:$0xff]  }
 0x397   :  { %v13840_v6 = vpop.f32.mrb[85].mxu0  ;;  %v13861_v8 = vpop.f32.mrb[84].mxu1 }
 0x398   :  { %v13841_v9 = vadd.f32 %v13840_v6, %v13839_v4  ;;  %v13842_v10 = vpop.f32.mrb[86].mxu0  ;;  %v13862_v13 = vpop.f32.mrb[85].mxu1  ;;  %14142 = vmatpush3.bf16.msra.mxu0 %v15404_v7 }
 0x399   :  { %v13843_v14 = vpop.f32.mrb[87].mxu0  ;;  %v13863_v16 = vadd.f32 %v13862_v13, %v13861_v8  ;;  %v13864_v17 = vpop.f32.mrb[86].mxu1  ;;  %14143 = vmatprep.subr.bf16.mxu0 %v15406_v12  ;;  %14164 = vmatpush3.bf16.msra.mxu1 %v15405_v11  ;;  %v15441_v11 = vld [vmem:[%s19021_s1 + $0x1d30] sm:$0xff]   ;;  %v15443_v13 = vld [vmem:[%s19021_s1 + $0x1d78] sm:$0xff]  }
 0x39a   :  { %v10813_v15 = vadd.f32 %v13841_v9, %v18453_v30  ;;  %v13865_v19 = vpop.f32.mrb[87].mxu1  ;;  %14165 = vmatprep.subr.bf16.mxu1 %v15407_v18  ;;  %v15415_v30 = vld [vmem:[%s19021_s1 + $0x1d40] sm:$0xff]   ;;  %v15440_v9 = vld [vmem:[%s19021_s1 + $0x1df0] sm:$0xff]   ;;  %v71_v17 = vld [vmem:[%s19020_s0 + $0xe8] sm:$0xff] }
 0x39b   :  { %v15442_v14 = vld [vmem:[%s19021_s1 + $0x1db0] sm:$0xff]   ;;  %v606_v18 = vrot.slane %v71_v17, %v15688_v41  ;;  %v599_v19 = vcombine.high %v71_v17, %v71_v17 }
 0x39c   :  { %v18557_v21 = vadd.f32 %v13863_v16, %v10813_v15  ;;  %14144 = vmatpush3.bf16.msra.mxu0 %v15408_v20  ;;  %v15444_v15 = vld [vmem:[%s19021_s1 + $0x1df8] sm:$0xff]   ;;  %v15448_v20 = vld [vmem:[%s19021_s1 + $0x1e40] sm:$0xff]  }
 0x39d   :  { %14145 = vmatprep.subr.bf16.mxu0 %v15410_v23  ;;  %14166 = vmatpush3.bf16.msra.mxu1 %v15409_v22  ;;  %v15445_v16 = vld [vmem:[%s19021_s1 + $0x1d38] sm:$0xff]   ;;  %v614_v22 = vcombine.high %v606_v18, %v606_v18  ;;  %v613_v23 = vrot.slane %v599_v19, %v15688_v41  ;;  %v15483_v19 = vld [vmem:[%s19021_s1 + $0x1f00] sm:$0xff]  }
 0x39e   :  { %14167 = vmatprep.subr.bf16.mxu1 %v15411_v24  ;;  %v15449_v24 = vld [vmem:[%s19021_s1 + $0x1ec0] sm:$0xff]  }
 0x39f   :  { %v615_v28 = vcombine.high %v613_v23, %v613_v23 }
 0x3a0   :  { %14146 = vmatpush3.bf16.msra.mxu0 %v15412_v25  ;;  %v894_v25 = vpack.c.bf16 %v606_v18, %v606_v18 }
 0x3a1   :  { %14175 = vmatprep.subr.bf16.mxu0 %v15415_v30  ;;  %14168 = vmatpush3.bf16.msra.mxu1 %v15413_v27  ;;  %v895_v27 = vpack.c.bf16 %v614_v22, %v614_v22  ;;  %v896_v30 = vpack.c.bf16 %v613_v23, %v613_v23  ;;  %v897_v32 = vpack.c.bf16 %v615_v28, %v615_v28  ;;  %v15484_v23 = vld [vmem:[%s19021_s1 + $0x1f80] sm:$0xff]   ;;  %v15490_v28 = vld [vmem:[%s19021_s1 + $0x1fd0] sm:$0xff]  }
 0x3a2   :  { %14197 = vmatprep.subr.bf16.mxu1 %v15416_v33  ;;  %v15453_v33 = vld [vmem:[%s19021_s1 + $0x1ec8] sm:$0xff]  }
 0x3a3   :  { %11371 = vmatmul.mubr.bf16.vlgmr.msra.gmra.mrb[112].mxu0 %v890_v34  ;;  %v15454_v34 = vld [vmem:[%s19021_s1 + $0x1e08] sm:$0xff]  }
 0x3a4   :  { %14176 = vmatpush3.bf16.msra.mxu0 %v15417_v35  ;;  %11411 = vmatmul.mubr.bf16.vlgmr.msra.gmra.mrb[112].mxu1 %v892_v39  ;;  %v15455_v35 = vld [vmem:[%s19021_s1 + $0x1e88] sm:$0xff]   ;;  %v15459_v39 = vld [vmem:[%s19021_s1 + $0x1e90] sm:$0xff]  }
 0x3a5   :  { %14177 = vmatprep.subr.bf16.mxu0 %v15419_v40  ;;  %14198 = vmatpush3.bf16.msra.mxu1 %v15418_v38  ;;  %v15458_v38 = vld [vmem:[%s19021_s1 + $0x1e10] sm:$0xff]   ;;  %v15460_v40 = vld [vmem:[%s19021_s1 + $0x1e58] sm:$0xff]  }
 0x3a6   :  { %14199 = vmatprep.subr.bf16.mxu1 %v15420_v43  ;;  %11450 = vmatprep.mubr.bf16.mxu0 %v895_v27  ;;  %v15462_v43 = vld [vmem:[%s19021_s1 + $0x1e18] sm:$0xff]   ;;  %v15488_v27 = vld [vmem:[%s19021_s1 + $0x1f88] sm:$0xff]  }
 0x3a7   :  { %11490 = vmatprep.mubr.bf16.mxu1 %v897_v32  ;;  %v15494_v32 = vld [vmem:[%s19021_s1 + $0x1fd8] sm:$0xff]  }
 0x3a8   :  { %14178 = vmatpush3.bf16.msra.mxu0 %v15421_v44  ;;  %v15463_v44 = vld [vmem:[%s19021_s1 + $0x1e98] sm:$0xff]  }
 0x3a9   :  { %14179 = vmatprep.subr.bf16.mxu0 %v15423_v46  ;;  %14200 = vmatpush3.bf16.msra.mxu1 %v15422_v45  ;;  %v15464_v45 = vld [vmem:[%s19021_s1 + $0x1e60] sm:$0xff]  }
 0x3aa   :  { %14201 = vmatprep.subr.bf16.mxu1 %v15424_v47  ;;  %v15465_v46 = vld [vmem:[%s19021_s1 + $0x1ee0] sm:$0xff]  }
 0x3ab   :  { %v15466_v47 = vld [vmem:[%s19021_s1 + $0x1e20] sm:$0xff]  }
 0x3ac   :  { %14180 = vmatpush3.bf16.msra.mxu0 %v15425_v48  ;;  %v15467_v48 = vld [vmem:[%s19021_s1 + $0x1ea0] sm:$0xff]  }
 0x3ad   :  { %14181 = vmatprep.subr.bf16.mxu0 %v15427_v50  ;;  %14202 = vmatpush3.bf16.msra.mxu1 %v15426_v49  ;;  %v15468_v49 = vld [vmem:[%s19021_s1 + $0x1e68] sm:$0xff]  }
 0x3ae   :  { %14203 = vmatprep.subr.bf16.mxu1 %v15428_v51  ;;  %v15469_v51 = vld [vmem:[%s19021_s1 + $0x1ee8] sm:$0xff]  }
 0x3b0   :  { %14182 = vmatpush3.bf16.msra.mxu0 %v15429_v52 }
 0x3b1   :  { %14183 = vmatprep.subr.bf16.mxu0 %v15431_v54  ;;  %14204 = vmatpush3.bf16.msra.mxu1 %v15430_v53  ;;  %v15470_v53 = vld [vmem:[%s19021_s1 + $0x1e28] sm:$0xff]  }
 0x3b2   :  { %14205 = vmatprep.subr.bf16.mxu1 %v15432_v55 }
 0x3b4   :  { %14184 = vmatpush3.bf16.msra.mxu0 %v15433_v56 }
 0x3b5   :  { %14185 = vmatprep.subr.bf16.mxu0 %v15435_v58  ;;  %14206 = vmatpush3.bf16.msra.mxu1 %v15434_v57  ;;  %v15471_v57 = vld [vmem:[%s19021_s1 + $0x1ea8] sm:$0xff]   ;;  %v15472_v58 = vld [vmem:[%s19021_s1 + $0x1e70] sm:$0xff]  }
 0x3b6   :  { %v13883_v59 = vpop.f32.mrb[88].mxu0  ;;  %14207 = vmatprep.subr.bf16.mxu1 %v15436_v60 }
 0x3b7   :  { %v13884_v61 = vpop.f32.mrb[89].mxu0  ;;  %v13905_v63 = vpop.f32.mrb[88].mxu1 }
 0x3b8   :  { %v13885_v0 = vadd.f32 %v13884_v61, %v13883_v59  ;;  %v13886_v1 = vpop.f32.mrb[90].mxu0  ;;  %v13906_v2 = vpop.f32.mrb[89].mxu1  ;;  %14186 = vmatpush3.bf16.msra.mxu0 %v15437_v62 }
 0x3b9   :  { %v13887_v4 = vpop.f32.mrb[91].mxu0  ;;  %v13907_v7 = vadd.f32 %v13906_v2, %v13905_v63  ;;  %v13908_v8 = vpop.f32.mrb[90].mxu1  ;;  %14187 = vmatprep.subr.bf16.mxu0 %v15439_v5  ;;  %14208 = vmatpush3.bf16.msra.mxu1 %v15438_v3  ;;  %v15474_v2 = vld [vmem:[%s19021_s1 + $0x1e30] sm:$0xff]   ;;  %v15476_v5 = vld [vmem:[%s19021_s1 + $0x1e78] sm:$0xff]  }
 0x3ba   :  { %v10893_v6 = vadd.f32 %v13885_v0, %v18557_v21  ;;  %v13909_v10 = vpop.f32.mrb[91].mxu1  ;;  %14209 = vmatprep.subr.bf16.mxu1 %v15440_v9  ;;  %v15446_v21 = vld [vmem:[%s19021_s1 + $0x1db8] sm:$0xff]   ;;  %v15473_v0 = vld [vmem:[%s19021_s1 + $0x1ef0] sm:$0xff]  }
 0x3bb   :  { %v15475_v4 = vld [vmem:[%s19021_s1 + $0x1eb0] sm:$0xff]  }
 0x3bc   :  { %v18661_v12 = vadd.f32 %v13907_v7, %v10893_v6  ;;  %14188 = vmatpush3.bf16.msra.mxu0 %v15441_v11  ;;  %v15477_v6 = vld [vmem:[%s19021_s1 + $0x1ef8] sm:$0xff]   ;;  %v72_v8 = vld [vmem:[%s19020_s0 + $0xf0] sm:$0xff]  ;;  %v15481_v11 = vld [vmem:[%s19021_s1 + $0x1f40] sm:$0xff]  }
 0x3bd   :  { %14189 = vmatprep.subr.bf16.mxu0 %v15443_v13  ;;  %14210 = vmatpush3.bf16.msra.mxu1 %v15442_v14  ;;  %v15478_v7 = vld [vmem:[%s19021_s1 + $0x1e38] sm:$0xff]   ;;  %v623_v9 = vrot.slane %v72_v8, %v15688_v41  ;;  %v616_v10 = vcombine.high %v72_v8, %v72_v8 }
 0x3be   :  { %14211 = vmatprep.subr.bf16.mxu1 %v15444_v15  ;;  %v15482_v15 = vld [vmem:[%s19021_s1 + $0x1fc0] sm:$0xff]  }
 0x3bf   :  { %v631_v13 = vcombine.high %v623_v9, %v623_v9  ;;  %v630_v14 = vrot.slane %v616_v10, %v15688_v41 }
 0x3c0   :  { %14190 = vmatpush3.bf16.msra.mxu0 %v15445_v16  ;;  %v898_v16 = vpack.c.bf16 %v623_v9, %v623_v9 }
 0x3c1   :  { %14219 = vmatprep.subr.bf16.mxu0 %v15448_v20  ;;  %14212 = vmatpush3.bf16.msra.mxu1 %v15446_v21  ;;  %v899_v17 = vpack.c.bf16 %v631_v13, %v631_v13  ;;  %v632_v18 = vcombine.high %v630_v14, %v630_v14  ;;  %v900_v20 = vpack.c.bf16 %v630_v14, %v630_v14  ;;  %v15485_v21 = vld [vmem:[%s19021_s1 + $0x1f48] sm:$0xff]  }
 0x3c2   :  { %14241 = vmatprep.subr.bf16.mxu1 %v15449_v24  ;;  %v15486_v24 = vld [vmem:[%s19021_s1 + $0x1fc8] sm:$0xff]  }
 0x3c3   :  { %11451 = vmatmul.mubr.bf16.vlgmr.msra.gmra.mrb[116].mxu0 %v894_v25  ;;  %v901_v22 = vpack.c.bf16 %v632_v18, %v632_v18  ;;  %v15487_v25 = vld [vmem:[%s19021_s1 + $0x1f08] sm:$0xff]  }
 0x3c4   :  { %14220 = vmatpush3.bf16.msra.mxu0 %v15450_v26  ;;  %11491 = vmatmul.mubr.bf16.vlgmr.msra.gmra.mrb[116].mxu1 %v896_v30  ;;  %v15489_v26 = vld [vmem:[%s19021_s1 + $0x1f50] sm:$0xff]   ;;  %v15493_v30 = vld [vmem:[%s19021_s1 + $0x1f58] sm:$0xff]  }
 0x3c5   :  { %14221 = vmatprep.subr.bf16.mxu0 %v15452_v31  ;;  %14242 = vmatpush3.bf16.msra.mxu1 %v15451_v29  ;;  %v15491_v29 = vld [vmem:[%s19021_s1 + $0x1f10] sm:$0xff]  }
 0x3c6   :  { %14243 = vmatprep.subr.bf16.mxu1 %v15453_v33  ;;  %11530 = vmatprep.mubr.bf16.mxu0 %v899_v17  ;;  %v15492_v31 = vld [vmem:[%s19021_s1 + $0x1f90] sm:$0xff]   ;;  %v15495_v33 = vld [vmem:[%s19021_s1 + $0x1f18] sm:$0xff]  }
 0x3c7   :  { %11570 = vmatprep.mubr.bf16.mxu1 %v901_v22 }
 0x3c8   :  { %14222 = vmatpush3.bf16.msra.mxu0 %v15454_v34  ;;  %v15497_v34 = vld [vmem:[%s19021_s1 + $0x1f60] sm:$0xff]  }
 0x3c9   :  { %14223 = vmatprep.subr.bf16.mxu0 %v15456_v36  ;;  %14244 = vmatpush3.bf16.msra.mxu1 %v15455_v35  ;;  %v15496_v35 = vld [vmem:[%s19021_s1 + $0x1f98] sm:$0xff]   ;;  %v15498_v36 = vld [vmem:[%s19021_s1 + $0x1fe0] sm:$0xff]  }
 0x3ca   :  { %14245 = vmatprep.subr.bf16.mxu1 %v15457_v37  ;;  %v15499_v37 = vld [vmem:[%s19021_s1 + $0x1f20] sm:$0xff]  }
 0x3cc   :  { %14224 = vmatpush3.bf16.msra.mxu0 %v15458_v38  ;;  %v15501_v38 = vld [vmem:[%s19021_s1 + $0x1f68] sm:$0xff]  }
 0x3cd   :  { %14225 = vmatprep.subr.bf16.mxu0 %v15460_v40  ;;  %14246 = vmatpush3.bf16.msra.mxu1 %v15459_v39  ;;  %v15500_v39 = vld [vmem:[%s19021_s1 + $0x1fa0] sm:$0xff]  }
 0x3ce   :  { %14247 = vmatprep.subr.bf16.mxu1 %v15461_v42 }
 0x3d0   :  { %14226 = vmatpush3.bf16.msra.mxu0 %v15462_v43  ;;  %v15502_v43 = vld [vmem:[%s19021_s1 + $0x1fe8] sm:$0xff]  }
 0x3d1   :  { %14227 = vmatprep.subr.bf16.mxu0 %v15464_v45  ;;  %14248 = vmatpush3.bf16.msra.mxu1 %v15463_v44 }
 0x3d2   :  { %14249 = vmatprep.subr.bf16.mxu1 %v15465_v46 }
 0x3d4   :  { %14228 = vmatpush3.bf16.msra.mxu0 %v15466_v47  ;;  %v15503_v47 = vld [vmem:[%s19021_s1 + $0x1f28] sm:$0xff]  }
 0x3d5   :  { %14229 = vmatprep.subr.bf16.mxu0 %v15468_v49  ;;  %14250 = vmatpush3.bf16.msra.mxu1 %v15467_v48  ;;  %v15505_v48 = vld [vmem:[%s19021_s1 + $0x1f70] sm:$0xff]  }
 0x3d6   :  { %v13927_v50 = vpop.f32.mrb[92].mxu0  ;;  %14251 = vmatprep.subr.bf16.mxu1 %v15469_v51 }
 0x3d7   :  { %v13928_v52 = vpop.f32.mrb[93].mxu0  ;;  %v13949_v54 = vpop.f32.mrb[92].mxu1 }
 0x3d8   :  { %v13929_v55 = vadd.f32 %v13928_v52, %v13927_v50  ;;  %v13930_v56 = vpop.f32.mrb[94].mxu0  ;;  %v13950_v59 = vpop.f32.mrb[93].mxu1  ;;  %14230 = vmatpush3.bf16.msra.mxu0 %v15470_v53 }
 0x3d9   :  { %v13931_v60 = vpop.f32.mrb[95].mxu0  ;;  %v13951_v62 = vadd.f32 %v13950_v59, %v13949_v54  ;;  %v13952_v63 = vpop.f32.mrb[94].mxu1  ;;  %14231 = vmatprep.subr.bf16.mxu0 %v15472_v58  ;;  %14252 = vmatpush3.bf16.msra.mxu1 %v15471_v57  ;;  %v15504_v54 = vld [vmem:[%s19021_s1 + $0x1fa8] sm:$0xff]   ;;  %v15506_v56 = vld [vmem:[%s19021_s1 + $0x1ff0] sm:$0xff]   ;;  %v15509_v59 = vld [vmem:[%s19021_s1 + $0x1f78] sm:$0xff]  }
 0x3da   :  { %v10973_v61 = vadd.f32 %v13929_v55, %v18661_v12  ;;  %v13953_v1 = vpop.f32.mrb[95].mxu1  ;;  %14253 = vmatprep.subr.bf16.mxu1 %v15473_v0  ;;  %v15479_v12 = vld [vmem:[%s19021_s1 + $0x1eb8] sm:$0xff]   ;;  %v15507_v58 = vld [vmem:[%s19021_s1 + $0x1f30] sm:$0xff]  }
 0x3db   :  { %v15508_v60 = vld [vmem:[%s19021_s1 + $0x1fb0] sm:$0xff]   ;;  %v15511_v63 = vld [vmem:[%s19021_s1 + $0x1f38] sm:$0xff]  }
 0x3dc   :  { %v18765_v3 = vadd.f32 %v13951_v62, %v10973_v61  ;;  %14232 = vmatpush3.bf16.msra.mxu0 %v15474_v2  ;;  %v15510_v61 = vld [vmem:[%s19021_s1 + $0x1ff8] sm:$0xff]  }
 0x3dd   :  { %14233 = vmatprep.subr.bf16.mxu0 %v15476_v5  ;;  %14254 = vmatpush3.bf16.msra.mxu1 %v15475_v4  ;;  %v73_v62 = vld [vmem:[%s19020_s0 + $0xf8] sm:$0xff] }
 0x3de   :  { %14255 = vmatprep.subr.bf16.mxu1 %v15477_v6  ;;  %v640_v0 = vrot.slane %v73_v62, %v15688_v41  ;;  %v633_v1 = vcombine.high %v73_v62, %v73_v62 }
 0x3e0   :  { %14234 = vmatpush3.bf16.msra.mxu0 %v15478_v7 }
 0x3e1   :  { %14263 = vmatprep.subr.bf16.mxu0 %v15481_v11  ;;  %14256 = vmatpush3.bf16.msra.mxu1 %v15479_v12 }
 0x3e2   :  { %14285 = vmatprep.subr.bf16.mxu1 %v15482_v15 }
 0x3e3   :  { %11531 = vmatmul.mubr.bf16.vlgmr.msra.gmra.mrb[120].mxu0 %v898_v16 }
 0x3e4   :  { %14264 = vmatpush3.bf16.msra.mxu0 %v15483_v19  ;;  %11571 = vmatmul.mubr.bf16.vlgmr.msra.gmra.mrb[120].mxu1 %v900_v20 }
 0x3e5   :  { %14265 = vmatprep.subr.bf16.mxu0 %v15485_v21  ;;  %14286 = vmatpush3.bf16.msra.mxu1 %v15484_v23 }
 0x3e6   :  { %14287 = vmatprep.subr.bf16.mxu1 %v15486_v24 }
 0x3e8   :  { %14266 = vmatpush3.bf16.msra.mxu0 %v15487_v25 }
 0x3e9   :  { %14267 = vmatprep.subr.bf16.mxu0 %v15489_v26  ;;  %14288 = vmatpush3.bf16.msra.mxu1 %v15488_v27 }
 0x3ea   :  { %14289 = vmatprep.subr.bf16.mxu1 %v15490_v28 }
 0x3ec   :  { %14268 = vmatpush3.bf16.msra.mxu0 %v15491_v29 }
 0x3ed   :  { %14269 = vmatprep.subr.bf16.mxu0 %v15493_v30  ;;  %14290 = vmatpush3.bf16.msra.mxu1 %v15492_v31 }
 0x3ee   :  { %14291 = vmatprep.subr.bf16.mxu1 %v15494_v32 }
 0x3f0   :  { %14270 = vmatpush3.bf16.msra.mxu0 %v15495_v33 }
 0x3f1   :  { %14271 = vmatprep.subr.bf16.mxu0 %v15497_v34  ;;  %14292 = vmatpush3.bf16.msra.mxu1 %v15496_v35 }
 0x3f2   :  { %14293 = vmatprep.subr.bf16.mxu1 %v15498_v36 }
 0x3f4   :  { %14272 = vmatpush3.bf16.msra.mxu0 %v15499_v37 }
 0x3f5   :  { %14273 = vmatprep.subr.bf16.mxu0 %v15501_v38  ;;  %14294 = vmatpush3.bf16.msra.mxu1 %v15500_v39 }
 0x3f6   :  { %v13971_v40 = vpop.f32.mrb[96].mxu0  ;;  %14295 = vmatprep.subr.bf16.mxu1 %v15502_v43 }
 0x3f7   :  { %v13972_v42 = vpop.f32.mrb[97].mxu0  ;;  %v13993_v44 = vpop.f32.mrb[96].mxu1 }
 0x3f8   :  { %v13973_v45 = vadd.f32 %v13972_v42, %v13971_v40  ;;  %v13974_v46 = vpop.f32.mrb[98].mxu0  ;;  %v13994_v49 = vpop.f32.mrb[97].mxu1  ;;  %14274 = vmatpush3.bf16.msra.mxu0 %v15503_v47 }
 0x3f9   :  { %v13975_v50 = vpop.f32.mrb[99].mxu0  ;;  %v13995_v52 = vadd.f32 %v13994_v49, %v13993_v44  ;;  %v13996_v53 = vpop.f32.mrb[98].mxu1  ;;  %14275 = vmatprep.subr.bf16.mxu0 %v15505_v48  ;;  %14296 = vmatpush3.bf16.msra.mxu1 %v15504_v54 }
 0x3fa   :  { %v11053_v51 = vadd.f32 %v13973_v45, %v18765_v3  ;;  %v13997_v55 = vpop.f32.mrb[99].mxu1  ;;  %14297 = vmatprep.subr.bf16.mxu1 %v15506_v56 }
 0x3fc   :  { %v11093_v57 = vadd.f32 %v13995_v52, %v11053_v51  ;;  %14276 = vmatpush3.bf16.msra.mxu0 %v15507_v58 }
 0x3fd   :  { %12 = vsyncpa [#allocation4], 0  ;;  %14277 = vmatprep.subr.bf16.mxu0 %v15509_v59  ;;  %14298 = vmatpush3.bf16.msra.mxu1 %v15508_v60  ;;  %v15512_v2 = vld [vmem:[%s19021_s1 + $0x1fb8] sm:$0xff]   ;;  %v648_v3 = vcombine.high %v640_v0, %v640_v0  ;;  %v647_v4 = vrot.slane %v633_v1, %v15688_v41  ;;  %v902_v5 = vpack.c.bf16 %v640_v0, %v640_v0  ;;  %v11666_v33 = vld [vmem:[%s19023_s3] sm:$0xff]  ;;  %v15539_v36 = vmov 0.0|0.0   ;;  %s15542_s9 = smov [#allocation3]  }
 0x3fe   :  { %14299 = vmatprep.subr.bf16.mxu1 %v15510_v61  ;;  %v11667_v34 = vld [vmem:[%s19023_s3 + $0x8] sm:$0xff]  ;;  %v11668_v35 = vld [vmem:[%s19023_s3 + $0x10] sm:$0xff]  ;;  %v11669_v38 = vld [vmem:[%s19023_s3 + $0x18] sm:$0xff]  ;;  %vm39_vm0 = vcmask 975872   ;;  %vm15540_vm1 = vmmov 0   ;;  %vm11688_vm2 = vcmask 982016  }
 0x3ff   :  { %v903_v6 = vpack.c.bf16 %v648_v3, %v648_v3  ;;  %v649_v7 = vcombine.high %v647_v4, %v647_v4  ;;  %v904_v8 = vpack.c.bf16 %v647_v4, %v647_v4  ;;  %v14409_v37 = vpack.c.bf16 %v11667_v34, %v11666_v33  ;;  %v11670_v40 = vld [vmem:[%s19023_s3 + $0x20] sm:$0xff]  ;;  %v11671_v42 = vld [vmem:[%s19023_s3 + $0x28] sm:$0xff]  ;;  %v11672_v55 = vld [vmem:[%s19023_s3 + $0x30] sm:$0xff]  ;;  %s11863_s10 = sshll.u32 %s15542_s9, 4  ;;  %s11864_s10 = int_to_ptr.vmem [resolvable:$true] %s11863_s10 }
 0x400   :  { %14278 = vmatpush3.bf16.msra.mxu0 %v15511_v63  ;;  %v14412_v39 = vpack.c.bf16 %v11669_v38, %v11668_v35  ;;  %v14415_v43 = vpack.c.bf16 %v11671_v42, %v11670_v40  ;;  %v11871_v51 = vld [vmem:[%s19022_s2] ss:$0 sm:$0xff]  ;;  %v11673_v56 = vld [vmem:[%s19023_s3 + $0x38] sm:$0xff]  ;;  %v11675_v61 = vld [vmem:[%s19023_s3 + $0x48] sm:$0xff]  ;;  %v15541_v4 = vmov 0.0   ;;  %p15519_p1 = scmp.lt.s32.totalorder %s11864_s10, %s11864_s10 }
 0x401   :  { %14300 = vmatpush3.bf16.msra.mxu1 %v15512_v2  ;;  %11610 = vmatprep.mubr.bf16.mxu0 %v903_v6  ;;  %v905_v9 = vpack.c.bf16 %v649_v7, %v649_v7  ;;  %40 = vst.msk [vmem:[#allocation2] sm:$0x3] %vm39_vm0, %v11871_v51  ;;  %v14418_v58 = vpack.c.bf16 %v11673_v56, %v11672_v55  ;;  %v11674_v60 = vld [vmem:[%s19023_s3 + $0x40] sm:$0xff]  ;;  %v11676_v63 = vld [vmem:[%s19023_s3 + $0x50] sm:$0xff]  ;;  %v11677_v0 = vld [vmem:[%s19023_s3 + $0x58] sm:$0xff] }
 0x402   :  { %14408 = vmatprep.subr.bf16.mxu0 %v15539_v36  ;;  %14429 = vmatprep.subr.bf16.mxu1 %v15539_v36  ;;  %v14421_v62 = vpack.c.bf16 %v11675_v61, %v11674_v60  ;;  %v11678_v1 = vld [vmem:[%s19023_s3 + $0x60] sm:$0xff]  ;;  %v14424_v2 = vpack.c.bf16 %v11677_v0, %v11676_v63  ;;  %v11679_v3 = vld [vmem:[%s19023_s3 + $0x68] sm:$0xff]  ;;  %v11680_v6 = vld [vmem:[%s19023_s3 + $0x70] sm:$0xff] }
 0x403   :  { %11611 = vmatmul.mubr.bf16.vlgmr.msra.gmra.mrb[124].mxu0 %v902_v5  ;;  %11650 = vmatprep.mubr.bf16.mxu1 %v905_v9  ;;  %v14427_v5 = vpack.c.bf16 %v11679_v3, %v11678_v1  ;;  %v11763_v7 = vld [vmem:[%s19025_s5] sm:$0xff]  ;;  %v11765_v9 = vld [vmem:[%s19025_s5 + $0x10] sm:$0xff]  ;;  %v11774_v34 = vld [vmem:[%s19025_s5 + $0x58] sm:$0xff] }
 0x404   :  { %11651 = vmatmul.mubr.bf16.vlgmr.msra.gmra.mrb[124].mxu1 %v904_v8  ;;  %14410 = vmatpush3.bf16.msra.mxu0 %v14409_v37  ;;  %v11764_v8 = vld [vmem:[%s19025_s5 + $0x8] sm:$0xff]  ;;  %v11773_v33 = vld [vmem:[%s19025_s5 + $0x50] sm:$0xff]  ;;  %v11775_v37 = vld [vmem:[%s19025_s5 + $0x60] sm:$0xff] }
 0x405   :  { %14411 = vmatprep.subr.bf16.mxu0 %v15539_v36  ;;  %14370 = vmatprep.mubr.msk.f32.mxu0 %vm15540_vm1, %v15541_v4  ;;  %v14445_v35 = vpack.c.bf16 %v11774_v34, %v11773_v33  ;;  %v11776_v38 = vld [vmem:[%s19025_s5 + $0x68] sm:$0xff] }
 0x406   :  { %14405 = vmatprep.mubr.msk.f32.mxu1 %vm15540_vm1, %v15541_v4 }
 0x408   :  { %14413 = vmatpush3.bf16.msra.mxu0 %v14412_v39  ;;  %v14448_v39 = vpack.c.bf16 %v11776_v38, %v11775_v37 }
 0x409   :  { %14414 = vmatprep.subr.bf16.mxu0 %v15539_v36 }
 0x40c   :  { %14416 = vmatpush3.bf16.msra.mxu0 %v14415_v43 }
 0x40d   :  { %14417 = vmatprep.subr.bf16.mxu0 %v15539_v36 }
 0x410   :  { %14419 = vmatpush3.bf16.msra.mxu0 %v14418_v58 }
 0x411   :  { %14420 = vmatprep.subr.bf16.mxu0 %v15539_v36 }
 0x414   :  { %14422 = vmatpush3.bf16.msra.mxu0 %v14421_v62 }
 0x415   :  { %14423 = vmatprep.subr.bf16.mxu0 %v15539_v36 }
 0x416   :  { %v14015_v10 = vpop.f32.mrb[100].mxu0 }
 0x417   :  { %v14016_v11 = vpop.f32.mrb[101].mxu0  ;;  %v14037_v12 = vpop.f32.mrb[100].mxu1 }
 0x418   :  { %v14017_v13 = vadd.f32 %v14016_v11, %v14015_v10  ;;  %v14018_v14 = vpop.f32.mrb[102].mxu0  ;;  %v14038_v15 = vpop.f32.mrb[101].mxu1  ;;  %14425 = vmatpush3.bf16.msra.mxu0 %v14424_v2  ;;  %v14430_v10 = vpack.c.bf16 %v11764_v8, %v11763_v7  ;;  %v11766_v11 = vld [vmem:[%s19025_s5 + $0x18] sm:$0xff] }
 0x419   :  { %v14019_v16 = vpop.f32.mrb[103].mxu0  ;;  %v14039_v17 = vadd.f32 %v14038_v15, %v14037_v12  ;;  %v14040_v18 = vpop.f32.mrb[102].mxu1  ;;  %14426 = vmatprep.subr.bf16.mxu0 %v15539_v36  ;;  %v14433_v12 = vpack.c.bf16 %v11766_v11, %v11765_v9  ;;  %v11768_v14 = vld [vmem:[%s19025_s5 + $0x28] sm:$0xff] }
 0x41a   :  { %v11133_v41 = vadd.f32 %v14017_v13, %v11093_v57  ;;  %v14041_v19 = vpop.f32.mrb[103].mxu1  ;;  %14431 = vmatpush3.bf16.msra.mxu1 %v14430_v10  ;;  %v11767_v13 = vld [vmem:[%s19025_s5 + $0x20] sm:$0xff]  ;;  %v11769_v16 = vld [vmem:[%s19025_s5 + $0x30] sm:$0xff] }
 0x41b   :  { %14432 = vmatprep.subr.bf16.mxu1 %v15539_v36  ;;  %v14436_v15 = vpack.c.bf16 %v11768_v14, %v11767_v13  ;;  %v41_v10 = vld [vmem:[#allocation2] sm:$0x3] }
 0x41c   :  { %v11173_v20 = vadd.f32 %v14039_v17, %v11133_v41  ;;  %14428 = vmatpush3.bf16.msra.mxu0 %v14427_v5  ;;  %v11770_v41 = vld [vmem:[%s19025_s5 + $0x38] sm:$0xff] }
 0x41d   :  { %14368 = vmatprep.subr.mxu0 %v15541_v4  ;;  %v14439_v19 = vpack.c.bf16 %v11770_v41, %v11769_v16  ;;  %v11777_v16 = vld [vmem:[%s19025_s5 + $0x70] sm:$0xff]  ;;  %v11778_v41 = vld [vmem:[%s19025_s5 + $0x78] sm:$0xff] }
 0x41e   :  { %14434 = vmatpush3.bf16.msra.mxu1 %v14433_v12 }
 0x41f   :  { %14435 = vmatprep.subr.bf16.mxu1 %v15539_v36 }
 0x420   :  { %14369 = vmatpush3.msra.mxu0 %v11680_v6 }
 0x422   :  { %14437 = vmatpush3.bf16.msra.mxu1 %v14436_v15 }
 0x423   :  { %14438 = vmatprep.subr.bf16.mxu1 %v15539_v36 }
 0x426   :  { %14440 = vmatpush3.bf16.msra.mxu1 %v14439_v19 }
 0x427   :  { %14441 = vmatprep.subr.bf16.mxu1 %v15539_v36 }
 0x436   :  { %v14059_v21 = vpop.f32.mrb[104].mxu0 }
 0x437   :  { %v14060_v22 = vpop.f32.mrb[105].mxu0  ;;  %v14081_v23 = vpop.f32.mrb[104].mxu1 }
 0x438   :  { %v14061_v24 = vadd.f32 %v14060_v22, %v14059_v21  ;;  %v14062_v25 = vpop.f32.mrb[106].mxu0  ;;  %v14082_v26 = vpop.f32.mrb[105].mxu1 }
 0x439   :  { %v14063_v27 = vpop.f32.mrb[107].mxu0  ;;  %v14083_v29 = vadd.f32 %v14082_v26, %v14081_v23  ;;  %v14084_v30 = vpop.f32.mrb[106].mxu1  ;;  %v11771_v23 = vld [vmem:[%s19025_s5 + $0x40] sm:$0xff] }
 0x43a   :  { %v11213_v28 = vadd.f32 %v14061_v24, %v11173_v20  ;;  %v14085_v31 = vpop.f32.mrb[107].mxu1  ;;  %v11772_v24 = vld [vmem:[%s19025_s5 + $0x48] sm:$0xff]  ;;  %s15514_s5 = scalar_lea.vmem %s11864_s10, 32 }
 0x43b   :  { %v14442_v31 = vpack.c.bf16 %v11772_v24, %v11771_v23  ;;  %v12898_v23 = vld [vmem:[%s19026_s6] ss:$0 sm:$0xff]  ;;  %p15515_p0 = scmp.ne.s32.totalorder %s11864_s10, %s15514_s5  ;;  %p15520_p2 = scmp.lt.s32.totalorder %s15514_s5, %s15514_s5 }
 0x43c   :  { %v11253_v32 = vadd.f32 %v14083_v29, %v11213_v28 }
 0x43d   :  { %14443 = vmatpush3.bf16.msra.mxu1 %v14442_v31  ;;  %p15521_p3 = por %p15520_p2, %p15519_p1 }
 0x43e   :  { %14444 = vmatprep.subr.bf16.mxu1 %v15539_v36 }
 0x43f   :  { %p15522_p4 = pnand %p15521_p3, %p15515_p0 }
 0x441   :  { %14446 = vmatpush3.bf16.msra.mxu1 %v14445_v35 }
 0x442   :  { %14447 = vmatprep.subr.bf16.mxu1 %v15539_v36 }
 0x445   :  { %14449 = vmatpush3.bf16.msra.mxu1 %v14448_v39 }
 0x446   :  { %14450 = vmatprep.subr.bf16.mxu1 %v15539_v36 }
 0x456   :  { %v14103_v44 = vpop.f32.mrb[108].mxu0 }
 0x457   :  { %v14104_v45 = vpop.f32.mrb[109].mxu0  ;;  %v14125_v46 = vpop.f32.mrb[108].mxu1 }
 0x458   :  { %v14105_v47 = vadd.f32 %v14104_v45, %v14103_v44  ;;  %v14106_v48 = vpop.f32.mrb[110].mxu0  ;;  %v14126_v49 = vpop.f32.mrb[109].mxu1 }
 0x459   :  { %v14107_v50 = vpop.f32.mrb[111].mxu0  ;;  %v14127_v53 = vadd.f32 %v14126_v49, %v14125_v46  ;;  %v14128_v54 = vpop.f32.mrb[110].mxu1 }
 0x45a   :  { %v11293_v52 = vadd.f32 %v14105_v47, %v11253_v32  ;;  %v14129_v57 = vpop.f32.mrb[111].mxu1 }
 0x45c   :  { %v11333_v59 = vadd.f32 %v14127_v53, %v11293_v52 }
 0x476   :  { %v14147_v17 = vpop.f32.mrb[112].mxu0 }
 0x477   :  { %v14148_v18 = vpop.f32.mrb[113].mxu0  ;;  %v14169_v20 = vpop.f32.mrb[112].mxu1 }
 0x478   :  { %v14149_v21 = vadd.f32 %v14148_v18, %v14147_v17  ;;  %v14150_v22 = vpop.f32.mrb[114].mxu0  ;;  %v14170_v25 = vpop.f32.mrb[113].mxu1  ;;  %v14451_v17 = vpack.c.bf16 %v11778_v41, %v11777_v16  ;;  %v12896_v18 = vld [vmem:[%s19024_s4] ss:$0 sm:$0xff] }
 0x479   :  { %v14151_v26 = vpop.f32.mrb[115].mxu0  ;;  %v14171_v28 = vadd.f32 %v14170_v25, %v14169_v20  ;;  %v14172_v29 = vpop.f32.mrb[114].mxu1 }
 0x47a   :  { %v11373_v27 = vadd.f32 %v14149_v21, %v11333_v59  ;;  %v14173_v30 = vpop.f32.mrb[115].mxu1  ;;  %14452 = vmatpush3.bf16.msra.mxu1 %v14451_v17 }
 0x47c   :  { %v11413_v32 = vadd.f32 %v14171_v28, %v11373_v27 }
 0x496   :  { %v14191_v40 = vpop.f32.mrb[116].mxu0 }
 0x497   :  { %v14192_v42 = vpop.f32.mrb[117].mxu0  ;;  %v14213_v43 = vpop.f32.mrb[116].mxu1 }
 0x498   :  { %v14193_v44 = vadd.f32 %v14192_v42, %v14191_v40  ;;  %v14194_v45 = vpop.f32.mrb[118].mxu0  ;;  %v14214_v46 = vpop.f32.mrb[117].mxu1 }
 0x499   :  { %v14195_v47 = vpop.f32.mrb[119].mxu0  ;;  %v14215_v49 = vadd.f32 %v14214_v46, %v14213_v43  ;;  %v14216_v50 = vpop.f32.mrb[118].mxu1 }
 0x49a   :  { %v11453_v48 = vadd.f32 %v14193_v44, %v11413_v32  ;;  %v14217_v51 = vpop.f32.mrb[119].mxu1 }
 0x49c   :  { %v11493_v52 = vadd.f32 %v14215_v49, %v11453_v48 }
 0x4b6   :  { %v14235_v53 = vpop.f32.mrb[120].mxu0 }
 0x4b7   :  { %v14236_v54 = vpop.f32.mrb[121].mxu0  ;;  %v14257_v55 = vpop.f32.mrb[120].mxu1 }
 0x4b8   :  { %v14237_v56 = vadd.f32 %v14236_v54, %v14235_v53  ;;  %v14238_v57 = vpop.f32.mrb[122].mxu0  ;;  %v14258_v58 = vpop.f32.mrb[121].mxu1 }
 0x4b9   :  { %v14239_v59 = vpop.f32.mrb[123].mxu0  ;;  %v14259_v60 = vadd.f32 %v14258_v58, %v14257_v55  ;;  %v14260_v61 = vpop.f32.mrb[122].mxu1 }
 0x4ba   :  { %v11533_v36 = vadd.f32 %v14237_v56, %v11493_v52  ;;  %v14261_v62 = vpop.f32.mrb[123].mxu1 }
 0x4bc   :  { %v11573_v63 = vadd.f32 %v14259_v60, %v11533_v36 }
 0x4d6   :  { %v14279_v0 = vpop.f32.mrb[124].mxu0 }
 0x4d7   :  { %v14280_v1 = vpop.f32.mrb[125].mxu0  ;;  %v14301_v2 = vpop.f32.mrb[124].mxu1 }
 0x4d8   :  { %v14281_v3 = vadd.f32 %v14280_v1, %v14279_v0  ;;  %v14282_v4 = vpop.f32.mrb[126].mxu0  ;;  %v14302_v5 = vpop.f32.mrb[125].mxu1 }
 0x4d9   :  { %v14283_v6 = vpop.f32.mrb[127].mxu0  ;;  %v14303_v8 = vadd.f32 %v14302_v5, %v14301_v2  ;;  %v14304_v9 = vpop.f32.mrb[126].mxu1 }
 0x4da   :  { %v11613_v7 = vadd.f32 %v14281_v3, %v11573_v63  ;;  %v14305_v11 = vpop.f32.mrb[127].mxu1 }
 0x4dc   :  { %v11653_v12 = vadd.f32 %v14303_v8, %v11613_v7 }
 0x4de   :  { %v11658_v13 = vadd.f32 %v11653_v12, %v41_v10 }
 0x4e0   :  { %11660 = vst.msk [vmem:[#allocation2] sm:$0x3] %vm39_vm0, %v11658_v13 }
 0x4e7   :  { %v11664_v14 = vld [vmem:[#allocation2] sm:$0x3] }
 0x4e8   :  { %v11665_v15 = vmax.f32 %v11664_v14, 0.0 }
 0x4ea   :  { %14371 = vmatmul.mubr.msk.f32.vlgmr.msra.gmra.mrb[128].mxu0 %vm11688_vm2, %v11665_v15 }
 0x5bd   :  { %v11758_v19 = vpop.f32.mrb[128].mxu0 }
 0x5be   :  { %v11759_v20 = vadd.f32 %v12896_v18, %v11758_v19  ;;  %v14372_v21 = vpop.f32.mrb[129].mxu0 }
 0x5c0   :  { %v11762_v22 = vmax.f32 %v11759_v20, 0.0 }
 0x5c2   :  { %14406 = vmatmul.mubr.f32.vlgmr.msra.gmra.mrb[128].mxu1 %v11762_v22 }
 0x695   :  { %v11852_v24 = vpop.f32.mrb[128].mxu1 }
 0x696   :  { %v11853_v25 = vadd.f32 %v12898_v23, %v11852_v24  ;;  %v14407_v26 = vpop.f32.mrb[129].mxu1 }
 0x698   :  { %11856 = vst [vmem:[#allocation3] sm:$0x3] %v11853_v25 }
 0x699   :  { %15525 = shalt.err (!%p15522_p4)
}
 0x69a   :  { %s15526_s12 = scalar_lea.hbm %s19027_s7, 32 }
 0x69b   :  { %p15527_p5 = scmp.ne.s32.totalorder %s19027_s7, %s15526_s12  ;;  %p15530_p6 = scmp.lt.u32.totalorder %s15526_s12, %s19027_s7 }
 0x69d   :  { %p15532_p7 = pnand %p15530_p6, %p15527_p5 }
 0x69f   :  { %15535 = shalt.err (!%p15532_p7)
}
 0x6a0   :  { %11866 = dma.vmem_to_hbm [thread:$0]  %s11864_s10, 32, %s19027_s7, [#allocation4]  }
 0x6a1   :  { %15536 = dma.done.wait [#allocation4], 32  }
 0x6a2   :  { %15537 = vsyncadd [#allocation4], 4294967264 }
 0x6a3   :  { %11870 = vsyncpa [#allocation4], 1 }

</bundles_post_ra>
